<compile_context>
chip_gen: v7x
topology: tpu7x:2x2x1
jax: 0.10.0
libtpu: 0.0.40
codegen_flags: <defaults>
</compile_context>

<pallas_src>
import numpy as np
import jax
import jax.numpy as jnp
from jax.experimental import pallas as pl
from jax.experimental.pallas import tpu as pltpu


def _round_up(x: int, m: int) -> int:
    return ((x + m - 1) // m) * m


def _propagate_kernel(xr_ref, xi_ref,          # (B_BLK, P, P)   bf16 field planes
                      gpr_ref, gpi_ref,        # (N, P)          bf16 G_P
                      gptr_ref, gpti_ref,      # (P, N)          bf16 G_P^T
                      flr_ref, fli_ref,        # (S8, N)         bf16 conj(F)[:S,:], zero-padded rows
                      frr_ref, fri_ref,        # (N, S128)       bf16 conj(F)[:S,:]^T, zero-padded cols
                      hr_ref, hi_ref,          # (N, N)          f32  H_fr / N^2
                      or_ref, oi_ref):         # (B_BLK, S8, S128) f32 outputs
    f32 = jnp.float32
    bf16 = jnp.bfloat16

    gpr, gpi = gpr_ref[...], gpi_ref[...]
    gptr, gpti = gptr_ref[...], gpti_ref[...]
    flr, fli = flr_ref[...], fli_ref[...]
    frr, fri = frr_ref[...], fri_ref[...]
    hr, hi = hr_ref[...], hi_ref[...]

    def cmm(ar, ai, br, bi):
        # Gauss/Karatsuba complex matmul: 3 MXU matmuls instead of 4,
        # bf16 operands, f32 accumulation.
        t1 = jnp.dot(ar, br, preferred_element_type=f32)
        t2 = jnp.dot(ai, bi, preferred_element_type=f32)
        t3 = jnp.dot(ar + ai, br + bi, preferred_element_type=f32)
        return t1 - t2, t3 - t1 - t2

    for b in range(xr_ref.shape[0]):           # static unroll over the batch block
        xr = xr_ref[b]                         # (P, P)
        xi = xi_ref[b]

        # Xc = conj(fft2(flip(conj(x)), s=(N, N))) = G_P @ x @ G_P^T
        ar, ai = cmm(gpr, gpi, xr, xi)                                  # (N, P)
        xcr, xci = cmm(ar.astype(bf16), ai.astype(bf16), gptr, gpti)    # (N, N)

        # Fourier-domain product with the pre-scaled transfer function (H_fr / N^2).
        mr = hr * xcr - hi * xci
        mi = hr * xci + hi * xcr

        # Valid-window inverse DFT, written as a lane-dense padded tile.
        er, ei = cmm(flr, fli, mr.astype(bf16), mi.astype(bf16))        # (S8, N)
        outr, outi = cmm(er.astype(bf16), ei.astype(bf16), frr, fri)    # (S8, S128)

        or_ref[b] = outr
        oi_ref[b] = outi


class PropagatePallas:
    """JAX/Pallas equivalent of the torch `Propagate` module."""

    def __init__(self, preceding_shape, succeeding_shape, propagation_distance,
                 wavelength, pixel_size, batch_block=None):
        P = int(preceding_shape)
        S = int(succeeding_shape)

        # Impulse response & its FFT (same as the torch register_buffer), float64.
        grid_extent = (P + S) / 2
        coords = np.arange(-grid_extent + 1, grid_extent, dtype=np.float64)
        x, y = np.meshgrid(coords * pixel_size, coords * pixel_size, indexing="ij")
        r_sq = x ** 2 + y ** 2 + propagation_distance ** 2
        r = np.sqrt(r_sq)
        impulse = (propagation_distance / r_sq
                   * (1.0 / (2.0 * np.pi * r) - 1j / wavelength)
                   * np.exp(2j * np.pi * r / wavelength)
                   * pixel_size ** 2)
        self.H_fr = np.fft.fft2(impulse)                   # (N, N) complex128 buffer
        N = self.H_fr.shape[-1]
        assert N == P + S - 1
        self.P, self.S, self.N = P, S, N
        self.S8 = _round_up(S, 8)                          # sublane-aligned output rows
        self.S128 = _round_up(S, 128)                      # lane-dense output columns
        self._batch_block = batch_block

        # DFT matrix F[k, n] = exp(-2*pi*i*k*n/N) (symmetric) and its conjugate.
        k = np.arange(N)
        F = np.exp(-2j * np.pi * np.outer(k, k) / N)
        Fc = np.conj(F)

        # Slim forward factor with the field flip + conj folded in:
        #   conj(fft2(flip(conj(x)), s=(N,N))) = G_P @ x @ G_P^T,
        #   G_P[k, m] = conj(F)[k, P-1-m]
        G_P = np.ascontiguousarray(Fc[:, :P][:, ::-1])     # (N, P)

        # Valid-window inverse-DFT factors, zero-padded to aligned tiles.
        Fl = np.zeros((self.S8, N), np.complex128)
        Fl[:S, :] = Fc[:S, :]                              # left factor  (S8, N)
        FrT = np.zeros((N, self.S128), np.complex128)
        FrT[:, :S] = Fc[:S, :].T                           # right factor (N, S128)

        Hs = self.H_fr / (N * N)                           # fold the ifft 1/N^2 scale

        bf16 = jnp.bfloat16
        self._gpr = jnp.asarray(G_P.real, bf16)
        self._gpi = jnp.asarray(G_P.imag, bf16)
        self._gptr = jnp.asarray(np.ascontiguousarray(G_P.T).real, bf16)
        self._gpti = jnp.asarray(np.ascontiguousarray(G_P.T).imag, bf16)
        self._flr = jnp.asarray(Fl.real, bf16)
        self._fli = jnp.asarray(Fl.imag, bf16)
        self._frr = jnp.asarray(FrT.real, bf16)
        self._fri = jnp.asarray(FrT.imag, bf16)
        self._hr = jnp.asarray(Hs.real, jnp.float32)
        self._hi = jnp.asarray(Hs.imag, jnp.float32)

    def _build_call(self, b_pad, bblk, nblk, single_buffer_consts):
        P, N, S8, S128 = self.P, self.N, self.S8, self.S128

        def const_spec(shape):
            if single_buffer_consts:
                # Grid-invariant inputs: no second pipeline buffer needed.
                return pl.BlockSpec(shape, lambda i: (0, 0),
                                    pipeline_mode=pl.Buffered(buffer_count=1))
            return pl.BlockSpec(shape, lambda i: (0, 0))

        # Explicit VMEM budget sized from the actual buffers (+ margin).
        bf2, f4 = 2, 4
        need = (2 * 2 * bblk * P * P * bf2                  # x planes, double-buffered
                + 2 * 2 * bblk * S8 * S128 * f4             # outputs, double-buffered
                + 2 * (N * P + P * N + S8 * N + N * S128) * bf2
                + 2 * N * N * f4                            # constant factors
                + 24 * N * max(N, S128) * f4)               # matmul intermediates
        vmem_limit = int(min(max(2 * need, 8 << 20), 64 << 20))

        return pl.pallas_call(
            _propagate_kernel,
            out_shape=(jax.ShapeDtypeStruct((b_pad, S8, S128), jnp.float32),
                       jax.ShapeDtypeStruct((b_pad, S8, S128), jnp.float32)),
            grid_spec=pltpu.PrefetchScalarGridSpec(
                num_scalar_prefetch=0,
                grid=(nblk,),
                in_specs=[
                    pl.BlockSpec((bblk, P, P), lambda i: (i, 0, 0)),    # x real
                    pl.BlockSpec((bblk, P, P), lambda i: (i, 0, 0)),    # x imag
                    const_spec((N, P)),        # G_P real
                    const_spec((N, P)),        # G_P imag
                    const_spec((P, N)),        # G_P^T real
                    const_spec((P, N)),        # G_P^T imag
                    const_spec((S8, N)),       # conj(F)[:S,:] real (padded rows)
                    const_spec((S8, N)),       # conj(F)[:S,:] imag
                    const_spec((N, S128)),     # conj(F)[:S,:]^T real (padded cols)
                    const_spec((N, S128)),     # conj(F)[:S,:]^T imag
                    const_spec((N, N)),        # H_fr / N^2 real (f32)
                    const_spec((N, N)),        # H_fr / N^2 imag (f32)
                ],
                out_specs=[
                    pl.BlockSpec((bblk, S8, S128), lambda i: (i, 0, 0)),
                    pl.BlockSpec((bblk, S8, S128), lambda i: (i, 0, 0)),
                ],
            ),
            compiler_params=pltpu.CompilerParams(
                dimension_semantics=("parallel",),
                vmem_limit_bytes=vmem_limit),
        )

    def __call__(self, field):
        # field: (B, P, P) complex
        B = field.shape[0]
        P, S = self.P, self.S

        # Batch block: amortize per-grid-step overhead at small N while keeping
        # >= 2 grid steps when possible (so both TensorCores get work on 2-TC chips).
        bblk = self._batch_block or max(
            1, min(8, max(1, 256 // P), max(1, (B + 1) // 2)))
        nblk = int(pl.cdiv(B, bblk))
        b_pad = nblk * bblk

        xr = jnp.real(field).astype(jnp.bfloat16)
        xi = jnp.imag(field).astype(jnp.bfloat16)
        if b_pad != B:
            pad = ((0, b_pad - B), (0, 0), (0, 0))
            xr = jnp.pad(xr, pad)
            xi = jnp.pad(xi, pad)

        consts = (self._gpr, self._gpi, self._gptr, self._gpti,
                  self._flr, self._fli, self._frr, self._fri,
                  self._hr, self._hi)

        outr = outi = None
        for single_buf in (True, False):
            try:
                fn = self._build_call(b_pad, bblk, nblk, single_buf)
                outr, outi = fn(xr, xi, *consts)
                outr, outi = jax.block_until_ready((outr, outi))
                break
            except Exception:
                # Fallback: retry with default (double) buffering of constants.
                if not single_buf:
                    raise

        out = (outr[:B, :S, :S].astype(jnp.float32)
               + 1j * outi[:B, :S, :S].astype(jnp.float32))
        return out.astype(jnp.complex64)


def _reference_numpy(field, H_fr):
    # Direct transcription of torch conv2d_fft in float64/complex128 (numpy).
    N = H_fr.shape[-1]
    P = field.shape[-1]
    S = N - P + 1
    x = np.conj(field)[:, ::-1, ::-1]
    x_fr = np.fft.fft2(x, s=(N, N))
    out_fr = H_fr * np.conj(x_fr)
    return np.fft.ifft2(out_fr)[..., :S, :S]


if __name__ == "__main__":
    # Small, deterministic example.
    B = 4
    preceding_shape = 16      # input field is (B, 16, 16)
    succeeding_shape = 17     # N = 16 + 17 - 1 = 32, output is (B, 17, 17)
    propagation_distance = 10.0
    wavelength = 0.5
    pixel_size = 1.0

    prop = PropagatePallas(preceding_shape, succeeding_shape,
                           propagation_distance, wavelength, pixel_size)

    key = jax.random.PRNGKey(0)
    kr, ki = jax.random.split(key)
    field_re = jax.random.normal(kr, (B, preceding_shape, preceding_shape),
                                 dtype=jnp.float32)
    field_im = jax.random.normal(ki, (B, preceding_shape, preceding_shape),
                                 dtype=jnp.float32)
    field = (field_re + 1j * field_im).astype(jnp.complex64)

    out = jax.block_until_ready(prop(field))

    # Sanity check against a float64 numpy reference of the torch forward pass.
    # Tolerance accounts for bf16 MXU operands (f32 accumulation) across the four
    # chained DFT matmuls; typical observed relative error is ~1e-2 or less.
    ref = _reference_numpy(np.asarray(field, dtype=np.complex128), prop.H_fr)
    err = np.max(np.abs(np.asarray(out) - ref)) / (np.max(np.abs(ref)) + 1e-30)
    assert out.shape == (B, succeeding_shape, succeeding_shape), out.shape
    assert err < 3e-2, f"relative error too large: {err}"

    print("KERNEL_OK")
</pallas_src>

<mosaic_0001>
module attributes {stable_mosaic.version = 11 : i64} {
  func.func @_propagate_kernel(%arg0: i32, %arg1: memref<2x16x16xbf16, #tpu.memory_space<vmem>>, %arg2: memref<2x16x16xbf16, #tpu.memory_space<vmem>>, %arg3: memref<32x16xbf16, #tpu.memory_space<vmem>>, %arg4: memref<32x16xbf16, #tpu.memory_space<vmem>>, %arg5: memref<16x32xbf16, #tpu.memory_space<vmem>>, %arg6: memref<16x32xbf16, #tpu.memory_space<vmem>>, %arg7: memref<24x32xbf16, #tpu.memory_space<vmem>>, %arg8: memref<24x32xbf16, #tpu.memory_space<vmem>>, %arg9: memref<32x128xbf16, #tpu.memory_space<vmem>>, %arg10: memref<32x128xbf16, #tpu.memory_space<vmem>>, %arg11: memref<32x32xf32, #tpu.memory_space<vmem>>, %arg12: memref<32x32xf32, #tpu.memory_space<vmem>>, %arg13: memref<2x24x128xf32, #tpu.memory_space<vmem>>, %arg14: memref<2x24x128xf32, #tpu.memory_space<vmem>>) attributes {dimension_semantics = [#tpu.dimension_semantics<parallel>], iteration_bounds = array<i64: 2>, scalar_prefetch = 0 : i64, scratch_operands = 0 : i64, tpu.core_type = #tpu.core_type<tc>, window_params = [{transform_indices = @transform_0, window_bounds = array<i64: 2, 16, 16>}, {transform_indices = @transform_1, window_bounds = array<i64: 2, 16, 16>}, {pipeline_mode = #tpu.pipeline_mode<synchronous>, transform_indices = @transform_2, window_bounds = array<i64: 32, 16>}, {pipeline_mode = #tpu.pipeline_mode<synchronous>, transform_indices = @transform_3, window_bounds = array<i64: 32, 16>}, {pipeline_mode = #tpu.pipeline_mode<synchronous>, transform_indices = @transform_4, window_bounds = array<i64: 16, 32>}, {pipeline_mode = #tpu.pipeline_mode<synchronous>, transform_indices = @transform_5, window_bounds = array<i64: 16, 32>}, {pipeline_mode = #tpu.pipeline_mode<synchronous>, transform_indices = @transform_6, window_bounds = array<i64: 24, 32>}, {pipeline_mode = #tpu.pipeline_mode<synchronous>, transform_indices = @transform_7, window_bounds = array<i64: 24, 32>}, {pipeline_mode = #tpu.pipeline_mode<synchronous>, transform_indices = @transform_8, window_bounds = array<i64: 32, 128>}, {pipeline_mode = #tpu.pipeline_mode<synchronous>, transform_indices = @transform_9, window_bounds = array<i64: 32, 128>}, {pipeline_mode = #tpu.pipeline_mode<synchronous>, transform_indices = @transform_10, window_bounds = array<i64: 32, 32>}, {pipeline_mode = #tpu.pipeline_mode<synchronous>, transform_indices = @transform_11, window_bounds = array<i64: 32, 32>}, {transform_indices = @transform_12, window_bounds = array<i64: 2, 24, 128>}, {transform_indices = @transform_13, window_bounds = array<i64: 2, 24, 128>}]} {
    %c0 = arith.constant 0 : index
    %c0_0 = arith.constant 0 : index
    %0 = vector.load %arg3[%c0, %c0_0] : memref<32x16xbf16, #tpu.memory_space<vmem>>, vector<32x16xbf16>
    %c0_1 = arith.constant 0 : index
    %c0_2 = arith.constant 0 : index
    %1 = vector.load %arg4[%c0_1, %c0_2] : memref<32x16xbf16, #tpu.memory_space<vmem>>, vector<32x16xbf16>
    %c0_3 = arith.constant 0 : index
    %c0_4 = arith.constant 0 : index
    %2 = vector.load %arg5[%c0_3, %c0_4] : memref<16x32xbf16, #tpu.memory_space<vmem>>, vector<16x32xbf16>
    %c0_5 = arith.constant 0 : index
    %c0_6 = arith.constant 0 : index
    %3 = vector.load %arg6[%c0_5, %c0_6] : memref<16x32xbf16, #tpu.memory_space<vmem>>, vector<16x32xbf16>
    %c0_7 = arith.constant 0 : index
    %c0_8 = arith.constant 0 : index
    %4 = vector.load %arg7[%c0_7, %c0_8] : memref<24x32xbf16, #tpu.memory_space<vmem>>, vector<24x32xbf16>
    %c0_9 = arith.constant 0 : index
    %c0_10 = arith.constant 0 : index
    %5 = vector.load %arg8[%c0_9, %c0_10] : memref<24x32xbf16, #tpu.memory_space<vmem>>, vector<24x32xbf16>
    %c0_11 = arith.constant 0 : index
    %c0_12 = arith.constant 0 : index
    %6 = vector.load %arg9[%c0_11, %c0_12] : memref<32x128xbf16, #tpu.memory_space<vmem>>, vector<32x128xbf16>
    %c0_13 = arith.constant 0 : index
    %c0_14 = arith.constant 0 : index
    %7 = vector.load %arg10[%c0_13, %c0_14] : memref<32x128xbf16, #tpu.memory_space<vmem>>, vector<32x128xbf16>
    %c0_15 = arith.constant 0 : index
    %c0_16 = arith.constant 0 : index
    %8 = vector.load %arg11[%c0_15, %c0_16] : memref<32x32xf32, #tpu.memory_space<vmem>>, vector<32x32xf32>
    %c0_17 = arith.constant 0 : index
    %c0_18 = arith.constant 0 : index
    %9 = vector.load %arg12[%c0_17, %c0_18] : memref<32x32xf32, #tpu.memory_space<vmem>>, vector<32x32xf32>
    %c0_19 = arith.constant 0 : index
    %c0_20 = arith.constant 0 : index
    %c0_21 = arith.constant 0 : index
    %10 = vector.load %arg1[%c0_19, %c0_20, %c0_21] : memref<2x16x16xbf16, #tpu.memory_space<vmem>>, vector<1x16x16xbf16>
    %11 = vector.shape_cast %10 : vector<1x16x16xbf16> to vector<16x16xbf16>
    %c0_22 = arith.constant 0 : index
    %c0_23 = arith.constant 0 : index
    %c0_24 = arith.constant 0 : index
    %12 = vector.load %arg2[%c0_22, %c0_23, %c0_24] : memref<2x16x16xbf16, #tpu.memory_space<vmem>>, vector<1x16x16xbf16>
    %13 = vector.shape_cast %12 : vector<1x16x16xbf16> to vector<16x16xbf16>
    %cst = arith.constant dense<0.000000e+00> : vector<32x16xf32>
    %14 = tpu.matmul %0, %11, %cst {dimension_numbers = #tpu.dot_dimension_numbers<[1], [0], [0], [1], [0, 0, 1, 1], [], []>} : vector<32x16xbf16>, vector<16x16xbf16>, vector<32x16xf32> -> vector<32x16xf32>
    %cst_25 = arith.constant dense<0.000000e+00> : vector<32x16xf32>
    %15 = tpu.matmul %1, %13, %cst_25 {dimension_numbers = #tpu.dot_dimension_numbers<[1], [0], [0], [1], [0, 0, 1, 1], [], []>} : vector<32x16xbf16>, vector<16x16xbf16>, vector<32x16xf32> -> vector<32x16xf32>
    %16 = arith.addf %0, %1 : vector<32x16xbf16>
    %17 = arith.addf %11, %13 : vector<16x16xbf16>
    %cst_26 = arith.constant dense<0.000000e+00> : vector<32x16xf32>
    %18 = tpu.matmul %16, %17, %cst_26 {dimension_numbers = #tpu.dot_dimension_numbers<[1], [0], [0], [1], [0, 0, 1, 1], [], []>} : vector<32x16xbf16>, vector<16x16xbf16>, vector<32x16xf32> -> vector<32x16xf32>
    %19 = arith.subf %14, %15 : vector<32x16xf32>
    %20 = arith.subf %18, %14 : vector<32x16xf32>
    %21 = arith.subf %20, %15 : vector<32x16xf32>
    %22 = arith.truncf %19 : vector<32x16xf32> to vector<32x16xbf16>
    %23 = arith.truncf %21 : vector<32x16xf32> to vector<32x16xbf16>
    %cst_27 = arith.constant dense<0.000000e+00> : vector<32x32xf32>
    %24 = tpu.matmul %22, %2, %cst_27 {dimension_numbers = #tpu.dot_dimension_numbers<[1], [0], [0], [1], [0, 0, 1, 1], [], []>} : vector<32x16xbf16>, vector<16x32xbf16>, vector<32x32xf32> -> vector<32x32xf32>
    %cst_28 = arith.constant dense<0.000000e+00> : vector<32x32xf32>
    %25 = tpu.matmul %23, %3, %cst_28 {dimension_numbers = #tpu.dot_dimension_numbers<[1], [0], [0], [1], [0, 0, 1, 1], [], []>} : vector<32x16xbf16>, vector<16x32xbf16>, vector<32x32xf32> -> vector<32x32xf32>
    %26 = arith.addf %22, %23 : vector<32x16xbf16>
    %27 = arith.addf %2, %3 : vector<16x32xbf16>
    %cst_29 = arith.constant dense<0.000000e+00> : vector<32x32xf32>
    %28 = tpu.matmul %26, %27, %cst_29 {dimension_numbers = #tpu.dot_dimension_numbers<[1], [0], [0], [1], [0, 0, 1, 1], [], []>} : vector<32x16xbf16>, vector<16x32xbf16>, vector<32x32xf32> -> vector<32x32xf32>
    %29 = arith.subf %24, %25 : vector<32x32xf32>
    %30 = arith.subf %28, %24 : vector<32x32xf32>
    %31 = arith.subf %30, %25 : vector<32x32xf32>
    %32 = arith.mulf %8, %29 : vector<32x32xf32>
    %33 = arith.mulf %9, %31 : vector<32x32xf32>
    %34 = arith.subf %32, %33 : vector<32x32xf32>
    %35 = arith.mulf %8, %31 : vector<32x32xf32>
    %36 = arith.mulf %9, %29 : vector<32x32xf32>
    %37 = arith.addf %35, %36 : vector<32x32xf32>
    %38 = arith.truncf %34 : vector<32x32xf32> to vector<32x32xbf16>
    %39 = arith.truncf %37 : vector<32x32xf32> to vector<32x32xbf16>
    %cst_30 = arith.constant dense<0.000000e+00> : vector<24x32xf32>
    %40 = tpu.matmul %4, %38, %cst_30 {dimension_numbers = #tpu.dot_dimension_numbers<[1], [0], [0], [1], [0, 0, 1, 1], [], []>} : vector<24x32xbf16>, vector<32x32xbf16>, vector<24x32xf32> -> vector<24x32xf32>
    %cst_31 = arith.constant dense<0.000000e+00> : vector<24x32xf32>
    %41 = tpu.matmul %5, %39, %cst_31 {dimension_numbers = #tpu.dot_dimension_numbers<[1], [0], [0], [1], [0, 0, 1, 1], [], []>} : vector<24x32xbf16>, vector<32x32xbf16>, vector<24x32xf32> -> vector<24x32xf32>
    %42 = arith.addf %4, %5 : vector<24x32xbf16>
    %43 = arith.addf %38, %39 : vector<32x32xbf16>
    %cst_32 = arith.constant dense<0.000000e+00> : vector<24x32xf32>
    %44 = tpu.matmul %42, %43, %cst_32 {dimension_numbers = #tpu.dot_dimension_numbers<[1], [0], [0], [1], [0, 0, 1, 1], [], []>} : vector<24x32xbf16>, vector<32x32xbf16>, vector<24x32xf32> -> vector<24x32xf32>
    %45 = arith.subf %40, %41 : vector<24x32xf32>
    %46 = arith.subf %44, %40 : vector<24x32xf32>
    %47 = arith.subf %46, %41 : vector<24x32xf32>
    %48 = arith.truncf %45 : vector<24x32xf32> to vector<24x32xbf16>
    %49 = arith.truncf %47 : vector<24x32xf32> to vector<24x32xbf16>
    %cst_33 = arith.constant dense<0.000000e+00> : vector<24x128xf32>
    %50 = tpu.matmul %48, %6, %cst_33 {dimension_numbers = #tpu.dot_dimension_numbers<[1], [0], [0], [1], [0, 0, 1, 1], [], []>} : vector<24x32xbf16>, vector<32x128xbf16>, vector<24x128xf32> -> vector<24x128xf32>
    %cst_34 = arith.constant dense<0.000000e+00> : vector<24x128xf32>
    %51 = tpu.matmul %49, %7, %cst_34 {dimension_numbers = #tpu.dot_dimension_numbers<[1], [0], [0], [1], [0, 0, 1, 1], [], []>} : vector<24x32xbf16>, vector<32x128xbf16>, vector<24x128xf32> -> vector<24x128xf32>
    %52 = arith.addf %48, %49 : vector<24x32xbf16>
    %53 = arith.addf %6, %7 : vector<32x128xbf16>
    %cst_35 = arith.constant dense<0.000000e+00> : vector<24x128xf32>
    %54 = tpu.matmul %52, %53, %cst_35 {dimension_numbers = #tpu.dot_dimension_numbers<[1], [0], [0], [1], [0, 0, 1, 1], [], []>} : vector<24x32xbf16>, vector<32x128xbf16>, vector<24x128xf32> -> vector<24x128xf32>
    %55 = arith.subf %50, %51 : vector<24x128xf32>
    %56 = arith.subf %54, %50 : vector<24x128xf32>
    %57 = arith.subf %56, %51 : vector<24x128xf32>
    %c0_36 = arith.constant 0 : index
    %c0_37 = arith.constant 0 : index
    %c0_38 = arith.constant 0 : index
    %58 = vector.load %arg13[%c0_36, %c0_37, %c0_38] : memref<2x24x128xf32, #tpu.memory_space<vmem>>, vector<1x24x128xf32>
    %59 = vector.shape_cast %58 : vector<1x24x128xf32> to vector<24x128xf32>
    %60 = vector.shape_cast %55 : vector<24x128xf32> to vector<1x24x128xf32>
    tpu.vector_store %arg13[%c0_36, %c0_37, %c0_38], %60 {strides = array<i32>} : memref<2x24x128xf32, #tpu.memory_space<vmem>>, vector<1x24x128xf32>,
    %c0_39 = arith.constant 0 : index
    %c0_40 = arith.constant 0 : index
    %c0_41 = arith.constant 0 : index
    %61 = vector.load %arg14[%c0_39, %c0_40, %c0_41] : memref<2x24x128xf32, #tpu.memory_space<vmem>>, vector<1x24x128xf32>
    %62 = vector.shape_cast %61 : vector<1x24x128xf32> to vector<24x128xf32>
    %63 = vector.shape_cast %57 : vector<24x128xf32> to vector<1x24x128xf32>
    tpu.vector_store %arg14[%c0_39, %c0_40, %c0_41], %63 {strides = array<i32>} : memref<2x24x128xf32, #tpu.memory_space<vmem>>, vector<1x24x128xf32>,
    %c1 = arith.constant 1 : index
    %c0_42 = arith.constant 0 : index
    %c0_43 = arith.constant 0 : index
    %64 = vector.load %arg1[%c1, %c0_42, %c0_43] : memref<2x16x16xbf16, #tpu.memory_space<vmem>>, vector<1x16x16xbf16>
    %65 = vector.shape_cast %64 : vector<1x16x16xbf16> to vector<16x16xbf16>
    %c1_44 = arith.constant 1 : index
    %c0_45 = arith.constant 0 : index
    %c0_46 = arith.constant 0 : index
    %66 = vector.load %arg2[%c1_44, %c0_45, %c0_46] : memref<2x16x16xbf16, #tpu.memory_space<vmem>>, vector<1x16x16xbf16>
    %67 = vector.shape_cast %66 : vector<1x16x16xbf16> to vector<16x16xbf16>
    %cst_47 = arith.constant dense<0.000000e+00> : vector<32x16xf32>
    %68 = tpu.matmul %0, %65, %cst_47 {dimension_numbers = #tpu.dot_dimension_numbers<[1], [0], [0], [1], [0, 0, 1, 1], [], []>} : vector<32x16xbf16>, vector<16x16xbf16>, vector<32x16xf32> -> vector<32x16xf32>
    %cst_48 = arith.constant dense<0.000000e+00> : vector<32x16xf32>
    %69 = tpu.matmul %1, %67, %cst_48 {dimension_numbers = #tpu.dot_dimension_numbers<[1], [0], [0], [1], [0, 0, 1, 1], [], []>} : vector<32x16xbf16>, vector<16x16xbf16>, vector<32x16xf32> -> vector<32x16xf32>
    %70 = arith.addf %0, %1 : vector<32x16xbf16>
    %71 = arith.addf %65, %67 : vector<16x16xbf16>
    %cst_49 = arith.constant dense<0.000000e+00> : vector<32x16xf32>
    %72 = tpu.matmul %70, %71, %cst_49 {dimension_numbers = #tpu.dot_dimension_numbers<[1], [0], [0], [1], [0, 0, 1, 1], [], []>} : vector<32x16xbf16>, vector<16x16xbf16>, vector<32x16xf32> -> vector<32x16xf32>
    %73 = arith.subf %68, %69 : vector<32x16xf32>
    %74 = arith.subf %72, %68 : vector<32x16xf32>
    %75 = arith.subf %74, %69 : vector<32x16xf32>
    %76 = arith.truncf %73 : vector<32x16xf32> to vector<32x16xbf16>
    %77 = arith.truncf %75 : vector<32x16xf32> to vector<32x16xbf16>
    %cst_50 = arith.constant dense<0.000000e+00> : vector<32x32xf32>
    %78 = tpu.matmul %76, %2, %cst_50 {dimension_numbers = #tpu.dot_dimension_numbers<[1], [0], [0], [1], [0, 0, 1, 1], [], []>} : vector<32x16xbf16>, vector<16x32xbf16>, vector<32x32xf32> -> vector<32x32xf32>
    %cst_51 = arith.constant dense<0.000000e+00> : vector<32x32xf32>
    %79 = tpu.matmul %77, %3, %cst_51 {dimension_numbers = #tpu.dot_dimension_numbers<[1], [0], [0], [1], [0, 0, 1, 1], [], []>} : vector<32x16xbf16>, vector<16x32xbf16>, vector<32x32xf32> -> vector<32x32xf32>
    %80 = arith.addf %76, %77 : vector<32x16xbf16>
    %81 = arith.addf %2, %3 : vector<16x32xbf16>
    %cst_52 = arith.constant dense<0.000000e+00> : vector<32x32xf32>
    %82 = tpu.matmul %80, %81, %cst_52 {dimension_numbers = #tpu.dot_dimension_numbers<[1], [0], [0], [1], [0, 0, 1, 1], [], []>} : vector<32x16xbf16>, vector<16x32xbf16>, vector<32x32xf32> -> vector<32x32xf32>
    %83 = arith.subf %78, %79 : vector<32x32xf32>
    %84 = arith.subf %82, %78 : vector<32x32xf32>
    %85 = arith.subf %84, %79 : vector<32x32xf32>
    %86 = arith.mulf %8, %83 : vector<32x32xf32>
    %87 = arith.mulf %9, %85 : vector<32x32xf32>
    %88 = arith.subf %86, %87 : vector<32x32xf32>
    %89 = arith.mulf %8, %85 : vector<32x32xf32>
    %90 = arith.mulf %9, %83 : vector<32x32xf32>
    %91 = arith.addf %89, %90 : vector<32x32xf32>
    %92 = arith.truncf %88 : vector<32x32xf32> to vector<32x32xbf16>
    %93 = arith.truncf %91 : vector<32x32xf32> to vector<32x32xbf16>
    %cst_53 = arith.constant dense<0.000000e+00> : vector<24x32xf32>
    %94 = tpu.matmul %4, %92, %cst_53 {dimension_numbers = #tpu.dot_dimension_numbers<[1], [0], [0], [1], [0, 0, 1, 1], [], []>} : vector<24x32xbf16>, vector<32x32xbf16>, vector<24x32xf32> -> vector<24x32xf32>
    %cst_54 = arith.constant dense<0.000000e+00> : vector<24x32xf32>
    %95 = tpu.matmul %5, %93, %cst_54 {dimension_numbers = #tpu.dot_dimension_numbers<[1], [0], [0], [1], [0, 0, 1, 1], [], []>} : vector<24x32xbf16>, vector<32x32xbf16>, vector<24x32xf32> -> vector<24x32xf32>
    %96 = arith.addf %4, %5 : vector<24x32xbf16>
    %97 = arith.addf %92, %93 : vector<32x32xbf16>
    %cst_55 = arith.constant dense<0.000000e+00> : vector<24x32xf32>
    %98 = tpu.matmul %96, %97, %cst_55 {dimension_numbers = #tpu.dot_dimension_numbers<[1], [0], [0], [1], [0, 0, 1, 1], [], []>} : vector<24x32xbf16>, vector<32x32xbf16>, vector<24x32xf32> -> vector<24x32xf32>
    %99 = arith.subf %94, %95 : vector<24x32xf32>
    %100 = arith.subf %98, %94 : vector<24x32xf32>
    %101 = arith.subf %100, %95 : vector<24x32xf32>
    %102 = arith.truncf %99 : vector<24x32xf32> to vector<24x32xbf16>
    %103 = arith.truncf %101 : vector<24x32xf32> to vector<24x32xbf16>
    %cst_56 = arith.constant dense<0.000000e+00> : vector<24x128xf32>
    %104 = tpu.matmul %102, %6, %cst_56 {dimension_numbers = #tpu.dot_dimension_numbers<[1], [0], [0], [1], [0, 0, 1, 1], [], []>} : vector<24x32xbf16>, vector<32x128xbf16>, vector<24x128xf32> -> vector<24x128xf32>
    %cst_57 = arith.constant dense<0.000000e+00> : vector<24x128xf32>
    %105 = tpu.matmul %103, %7, %cst_57 {dimension_numbers = #tpu.dot_dimension_numbers<[1], [0], [0], [1], [0, 0, 1, 1], [], []>} : vector<24x32xbf16>, vector<32x128xbf16>, vector<24x128xf32> -> vector<24x128xf32>
    %106 = arith.addf %102, %103 : vector<24x32xbf16>
    %107 = arith.addf %6, %7 : vector<32x128xbf16>
    %cst_58 = arith.constant dense<0.000000e+00> : vector<24x128xf32>
    %108 = tpu.matmul %106, %107, %cst_58 {dimension_numbers = #tpu.dot_dimension_numbers<[1], [0], [0], [1], [0, 0, 1, 1], [], []>} : vector<24x32xbf16>, vector<32x128xbf16>, vector<24x128xf32> -> vector<24x128xf32>
    %109 = arith.subf %104, %105 : vector<24x128xf32>
    %110 = arith.subf %108, %104 : vector<24x128xf32>
    %111 = arith.subf %110, %105 : vector<24x128xf32>
    %c1_59 = arith.constant 1 : index
    %c0_60 = arith.constant 0 : index
    %c0_61 = arith.constant 0 : index
    %112 = vector.load %arg13[%c1_59, %c0_60, %c0_61] : memref<2x24x128xf32, #tpu.memory_space<vmem>>, vector<1x24x128xf32>
    %113 = vector.shape_cast %112 : vector<1x24x128xf32> to vector<24x128xf32>
    %114 = vector.shape_cast %109 : vector<24x128xf32> to vector<1x24x128xf32>
    tpu.vector_store %arg13[%c1_59, %c0_60, %c0_61], %114 {strides = array<i32>} : memref<2x24x128xf32, #tpu.memory_space<vmem>>, vector<1x24x128xf32>,
    %c1_62 = arith.constant 1 : index
    %c0_63 = arith.constant 0 : index
    %c0_64 = arith.constant 0 : index
    %115 = vector.load %arg14[%c1_62, %c0_63, %c0_64] : memref<2x24x128xf32, #tpu.memory_space<vmem>>, vector<1x24x128xf32>
    %116 = vector.shape_cast %115 : vector<1x24x128xf32> to vector<24x128xf32>
    %117 = vector.shape_cast %111 : vector<24x128xf32> to vector<1x24x128xf32>
    tpu.vector_store %arg14[%c1_62, %c0_63, %c0_64], %117 {strides = array<i32>} : memref<2x24x128xf32, #tpu.memory_space<vmem>>, vector<1x24x128xf32>,
    return
  }
  func.func @transform_0(%arg0: i32) -> (i32, i32, i32) {
    %c0_i32 = arith.constant 0 : i32
    %c0_i32_0 = arith.constant 0 : i32
    %c0_i32_1 = arith.constant 0 : i32
    return %arg0, %c0_i32, %c0_i32_0 : i32, i32, i32
  }
  func.func @transform_1(%arg0: i32) -> (i32, i32, i32) {
    %c0_i32 = arith.constant 0 : i32
    %c0_i32_0 = arith.constant 0 : i32
    %c0_i32_1 = arith.constant 0 : i32
    return %arg0, %c0_i32, %c0_i32_0 : i32, i32, i32
  }
  func.func @transform_2(%arg0: i32) -> (i32, i32) {
    %c0_i32 = arith.constant 0 : i32
    %c0_i32_0 = arith.constant 0 : i32
    %c0_i32_1 = arith.constant 0 : i32
    return %c0_i32, %c0_i32_0 : i32, i32
  }
  func.func @transform_3(%arg0: i32) -> (i32, i32) {
    %c0_i32 = arith.constant 0 : i32
    %c0_i32_0 = arith.constant 0 : i32
    %c0_i32_1 = arith.constant 0 : i32
    return %c0_i32, %c0_i32_0 : i32, i32
  }
  func.func @transform_4(%arg0: i32) -> (i32, i32) {
    %c0_i32 = arith.constant 0 : i32
    %c0_i32_0 = arith.constant 0 : i32
    %c0_i32_1 = arith.constant 0 : i32
    return %c0_i32, %c0_i32_0 : i32, i32
  }
  func.func @transform_5(%arg0: i32) -> (i32, i32) {
    %c0_i32 = arith.constant 0 : i32
    %c0_i32_0 = arith.constant 0 : i32
    %c0_i32_1 = arith.constant 0 : i32
    return %c0_i32, %c0_i32_0 : i32, i32
  }
  func.func @transform_6(%arg0: i32) -> (i32, i32) {
    %c0_i32 = arith.constant 0 : i32
    %c0_i32_0 = arith.constant 0 : i32
    %c0_i32_1 = arith.constant 0 : i32
    return %c0_i32, %c0_i32_0 : i32, i32
  }
  func.func @transform_7(%arg0: i32) -> (i32, i32) {
    %c0_i32 = arith.constant 0 : i32
    %c0_i32_0 = arith.constant 0 : i32
    %c0_i32_1 = arith.constant 0 : i32
    return %c0_i32, %c0_i32_0 : i32, i32
  }
  func.func @transform_8(%arg0: i32) -> (i32, i32) {
    %c0_i32 = arith.constant 0 : i32
    %c0_i32_0 = arith.constant 0 : i32
    %c0_i32_1 = arith.constant 0 : i32
    return %c0_i32, %c0_i32_0 : i32, i32
  }
  func.func @transform_9(%arg0: i32) -> (i32, i32) {
    %c0_i32 = arith.constant 0 : i32
    %c0_i32_0 = arith.constant 0 : i32
    %c0_i32_1 = arith.constant 0 : i32
    return %c0_i32, %c0_i32_0 : i32, i32
  }
  func.func @transform_10(%arg0: i32) -> (i32, i32) {
    %c0_i32 = arith.constant 0 : i32
    %c0_i32_0 = arith.constant 0 : i32
    %c0_i32_1 = arith.constant 0 : i32
    return %c0_i32, %c0_i32_0 : i32, i32
  }
  func.func @transform_11(%arg0: i32) -> (i32, i32) {
    %c0_i32 = arith.constant 0 : i32
    %c0_i32_0 = arith.constant 0 : i32
    %c0_i32_1 = arith.constant 0 : i32
    return %c0_i32, %c0_i32_0 : i32, i32
  }
  func.func @transform_12(%arg0: i32) -> (i32, i32, i32) {
    %c0_i32 = arith.constant 0 : i32
    %c0_i32_0 = arith.constant 0 : i32
    %c0_i32_1 = arith.constant 0 : i32
    return %arg0, %c0_i32, %c0_i32_0 : i32, i32, i32
  }
  func.func @transform_13(%arg0: i32) -> (i32, i32, i32) {
    %c0_i32 = arith.constant 0 : i32
    %c0_i32_0 = arith.constant 0 : i32
    %c0_i32_1 = arith.constant 0 : i32
    return %arg0, %c0_i32, %c0_i32_0 : i32, i32, i32
  }
}

module attributes {stable_mosaic.version = 11 : i64} {
  func.func @_propagate_kernel(%arg0: i32, %arg1: memref<2x16x16xbf16, #tpu.memory_space<vmem>>, %arg2: memref<2x16x16xbf16, #tpu.memory_space<vmem>>, %arg3: memref<32x16xbf16, #tpu.memory_space<vmem>>, %arg4: memref<32x16xbf16, #tpu.memory_space<vmem>>, %arg5: memref<16x32xbf16, #tpu.memory_space<vmem>>, %arg6: memref<16x32xbf16, #tpu.memory_space<vmem>>, %arg7: memref<24x32xbf16, #tpu.memory_space<vmem>>, %arg8: memref<24x32xbf16, #tpu.memory_space<vmem>>, %arg9: memref<32x128xbf16, #tpu.memory_space<vmem>>, %arg10: memref<32x128xbf16, #tpu.memory_space<vmem>>, %arg11: memref<32x32xf32, #tpu.memory_space<vmem>>, %arg12: memref<32x32xf32, #tpu.memory_space<vmem>>, %arg13: memref<2x24x128xf32, #tpu.memory_space<vmem>>, %arg14: memref<2x24x128xf32, #tpu.memory_space<vmem>>) attributes {dimension_semantics = [#tpu.dimension_semantics<parallel>], iteration_bounds = array<i64: 2>, scalar_prefetch = 0 : i64, scratch_operands = 0 : i64, tpu.core_type = #tpu.core_type<tc>, window_params = [{transform_indices = @transform_0, window_bounds = array<i64: 2, 16, 16>}, {transform_indices = @transform_1, window_bounds = array<i64: 2, 16, 16>}, {pipeline_mode = #tpu.pipeline_mode<synchronous>, transform_indices = @transform_2, window_bounds = array<i64: 32, 16>}, {pipeline_mode = #tpu.pipeline_mode<synchronous>, transform_indices = @transform_3, window_bounds = array<i64: 32, 16>}, {pipeline_mode = #tpu.pipeline_mode<synchronous>, transform_indices = @transform_4, window_bounds = array<i64: 16, 32>}, {pipeline_mode = #tpu.pipeline_mode<synchronous>, transform_indices = @transform_5, window_bounds = array<i64: 16, 32>}, {pipeline_mode = #tpu.pipeline_mode<synchronous>, transform_indices = @transform_6, window_bounds = array<i64: 24, 32>}, {pipeline_mode = #tpu.pipeline_mode<synchronous>, transform_indices = @transform_7, window_bounds = array<i64: 24, 32>}, {pipeline_mode = #tpu.pipeline_mode<synchronous>, transform_indices = @transform_8, window_bounds = array<i64: 32, 128>}, {pipeline_mode = #tpu.pipeline_mode<synchronous>, transform_indices = @transform_9, window_bounds = array<i64: 32, 128>}, {pipeline_mode = #tpu.pipeline_mode<synchronous>, transform_indices = @transform_10, window_bounds = array<i64: 32, 32>}, {pipeline_mode = #tpu.pipeline_mode<synchronous>, transform_indices = @transform_11, window_bounds = array<i64: 32, 32>}, {transform_indices = @transform_12, window_bounds = array<i64: 2, 24, 128>}, {transform_indices = @transform_13, window_bounds = array<i64: 2, 24, 128>}]} {
    %c0 = arith.constant 0 : index
    %c0_0 = arith.constant 0 : index
    %0 = vector.load %arg3[%c0, %c0_0] : memref<32x16xbf16, #tpu.memory_space<vmem>>, vector<32x16xbf16>
    %c0_1 = arith.constant 0 : index
    %c0_2 = arith.constant 0 : index
    %1 = vector.load %arg4[%c0_1, %c0_2] : memref<32x16xbf16, #tpu.memory_space<vmem>>, vector<32x16xbf16>
    %c0_3 = arith.constant 0 : index
    %c0_4 = arith.constant 0 : index
    %2 = vector.load %arg5[%c0_3, %c0_4] : memref<16x32xbf16, #tpu.memory_space<vmem>>, vector<16x32xbf16>
    %c0_5 = arith.constant 0 : index
    %c0_6 = arith.constant 0 : index
    %3 = vector.load %arg6[%c0_5, %c0_6] : memref<16x32xbf16, #tpu.memory_space<vmem>>, vector<16x32xbf16>
    %c0_7 = arith.constant 0 : index
    %c0_8 = arith.constant 0 : index
    %4 = vector.load %arg7[%c0_7, %c0_8] : memref<24x32xbf16, #tpu.memory_space<vmem>>, vector<24x32xbf16>
    %c0_9 = arith.constant 0 : index
    %c0_10 = arith.constant 0 : index
    %5 = vector.load %arg8[%c0_9, %c0_10] : memref<24x32xbf16, #tpu.memory_space<vmem>>, vector<24x32xbf16>
    %c0_11 = arith.constant 0 : index
    %c0_12 = arith.constant 0 : index
    %6 = vector.load %arg9[%c0_11, %c0_12] : memref<32x128xbf16, #tpu.memory_space<vmem>>, vector<32x128xbf16>
    %c0_13 = arith.constant 0 : index
    %c0_14 = arith.constant 0 : index
    %7 = vector.load %arg10[%c0_13, %c0_14] : memref<32x128xbf16, #tpu.memory_space<vmem>>, vector<32x128xbf16>
    %c0_15 = arith.constant 0 : index
    %c0_16 = arith.constant 0 : index
    %8 = vector.load %arg11[%c0_15, %c0_16] : memref<32x32xf32, #tpu.memory_space<vmem>>, vector<32x32xf32>
    %c0_17 = arith.constant 0 : index
    %c0_18 = arith.constant 0 : index
    %9 = vector.load %arg12[%c0_17, %c0_18] : memref<32x32xf32, #tpu.memory_space<vmem>>, vector<32x32xf32>
    %c0_19 = arith.constant 0 : index
    %c0_20 = arith.constant 0 : index
    %c0_21 = arith.constant 0 : index
    %10 = vector.load %arg1[%c0_19, %c0_20, %c0_21] : memref<2x16x16xbf16, #tpu.memory_space<vmem>>, vector<1x16x16xbf16>
    %11 = vector.shape_cast %10 : vector<1x16x16xbf16> to vector<16x16xbf16>
    %c0_22 = arith.constant 0 : index
    %c0_23 = arith.constant 0 : index
    %c0_24 = arith.constant 0 : index
    %12 = vector.load %arg2[%c0_22, %c0_23, %c0_24] : memref<2x16x16xbf16, #tpu.memory_space<vmem>>, vector<1x16x16xbf16>
    %13 = vector.shape_cast %12 : vector<1x16x16xbf16> to vector<16x16xbf16>
    %cst = arith.constant dense<0.000000e+00> : vector<32x16xf32>
    %14 = tpu.matmul %0, %11, %cst {dimension_numbers = #tpu.dot_dimension_numbers<[1], [0], [0], [1], [0, 0, 1, 1], [], []>} : vector<32x16xbf16>, vector<16x16xbf16>, vector<32x16xf32> -> vector<32x16xf32>
    %cst_25 = arith.constant dense<0.000000e+00> : vector<32x16xf32>
    %15 = tpu.matmul %1, %13, %cst_25 {dimension_numbers = #tpu.dot_dimension_numbers<[1], [0], [0], [1], [0, 0, 1, 1], [], []>} : vector<32x16xbf16>, vector<16x16xbf16>, vector<32x16xf32> -> vector<32x16xf32>
    %16 = arith.addf %0, %1 : vector<32x16xbf16>
    %17 = arith.addf %11, %13 : vector<16x16xbf16>
    %cst_26 = arith.constant dense<0.000000e+00> : vector<32x16xf32>
    %18 = tpu.matmul %16, %17, %cst_26 {dimension_numbers = #tpu.dot_dimension_numbers<[1], [0], [0], [1], [0, 0, 1, 1], [], []>} : vector<32x16xbf16>, vector<16x16xbf16>, vector<32x16xf32> -> vector<32x16xf32>
    %19 = arith.subf %14, %15 : vector<32x16xf32>
    %20 = arith.subf %18, %14 : vector<32x16xf32>
    %21 = arith.subf %20, %15 : vector<32x16xf32>
    %22 = arith.truncf %19 : vector<32x16xf32> to vector<32x16xbf16>
    %23 = arith.truncf %21 : vector<32x16xf32> to vector<32x16xbf16>
    %cst_27 = arith.constant dense<0.000000e+00> : vector<32x32xf32>
    %24 = tpu.matmul %22, %2, %cst_27 {dimension_numbers = #tpu.dot_dimension_numbers<[1], [0], [0], [1], [0, 0, 1, 1], [], []>} : vector<32x16xbf16>, vector<16x32xbf16>, vector<32x32xf32> -> vector<32x32xf32>
    %cst_28 = arith.constant dense<0.000000e+00> : vector<32x32xf32>
    %25 = tpu.matmul %23, %3, %cst_28 {dimension_numbers = #tpu.dot_dimension_numbers<[1], [0], [0], [1], [0, 0, 1, 1], [], []>} : vector<32x16xbf16>, vector<16x32xbf16>, vector<32x32xf32> -> vector<32x32xf32>
    %26 = arith.addf %22, %23 : vector<32x16xbf16>
    %27 = arith.addf %2, %3 : vector<16x32xbf16>
    %cst_29 = arith.constant dense<0.000000e+00> : vector<32x32xf32>
    %28 = tpu.matmul %26, %27, %cst_29 {dimension_numbers = #tpu.dot_dimension_numbers<[1], [0], [0], [1], [0, 0, 1, 1], [], []>} : vector<32x16xbf16>, vector<16x32xbf16>, vector<32x32xf32> -> vector<32x32xf32>
    %29 = arith.subf %24, %25 : vector<32x32xf32>
    %30 = arith.subf %28, %24 : vector<32x32xf32>
    %31 = arith.subf %30, %25 : vector<32x32xf32>
    %32 = arith.mulf %8, %29 : vector<32x32xf32>
    %33 = arith.mulf %9, %31 : vector<32x32xf32>
    %34 = arith.subf %32, %33 : vector<32x32xf32>
    %35 = arith.mulf %8, %31 : vector<32x32xf32>
    %36 = arith.mulf %9, %29 : vector<32x32xf32>
    %37 = arith.addf %35, %36 : vector<32x32xf32>
    %38 = arith.truncf %34 : vector<32x32xf32> to vector<32x32xbf16>
    %39 = arith.truncf %37 : vector<32x32xf32> to vector<32x32xbf16>
    %cst_30 = arith.constant dense<0.000000e+00> : vector<24x32xf32>
    %40 = tpu.matmul %4, %38, %cst_30 {dimension_numbers = #tpu.dot_dimension_numbers<[1], [0], [0], [1], [0, 0, 1, 1], [], []>} : vector<24x32xbf16>, vector<32x32xbf16>, vector<24x32xf32> -> vector<24x32xf32>
    %cst_31 = arith.constant dense<0.000000e+00> : vector<24x32xf32>
    %41 = tpu.matmul %5, %39, %cst_31 {dimension_numbers = #tpu.dot_dimension_numbers<[1], [0], [0], [1], [0, 0, 1, 1], [], []>} : vector<24x32xbf16>, vector<32x32xbf16>, vector<24x32xf32> -> vector<24x32xf32>
    %42 = arith.addf %4, %5 : vector<24x32xbf16>
    %43 = arith.addf %38, %39 : vector<32x32xbf16>
    %cst_32 = arith.constant dense<0.000000e+00> : vector<24x32xf32>
    %44 = tpu.matmul %42, %43, %cst_32 {dimension_numbers = #tpu.dot_dimension_numbers<[1], [0], [0], [1], [0, 0, 1, 1], [], []>} : vector<24x32xbf16>, vector<32x32xbf16>, vector<24x32xf32> -> vector<24x32xf32>
    %45 = arith.subf %40, %41 : vector<24x32xf32>
    %46 = arith.subf %44, %40 : vector<24x32xf32>
    %47 = arith.subf %46, %41 : vector<24x32xf32>
    %48 = arith.truncf %45 : vector<24x32xf32> to vector<24x32xbf16>
    %49 = arith.truncf %47 : vector<24x32xf32> to vector<24x32xbf16>
    %cst_33 = arith.constant dense<0.000000e+00> : vector<24x128xf32>
    %50 = tpu.matmul %48, %6, %cst_33 {dimension_numbers = #tpu.dot_dimension_numbers<[1], [0], [0], [1], [0, 0, 1, 1], [], []>} : vector<24x32xbf16>, vector<32x128xbf16>, vector<24x128xf32> -> vector<24x128xf32>
    %cst_34 = arith.constant dense<0.000000e+00> : vector<24x128xf32>
    %51 = tpu.matmul %49, %7, %cst_34 {dimension_numbers = #tpu.dot_dimension_numbers<[1], [0], [0], [1], [0, 0, 1, 1], [], []>} : vector<24x32xbf16>, vector<32x128xbf16>, vector<24x128xf32> -> vector<24x128xf32>
    %52 = arith.addf %48, %49 : vector<24x32xbf16>
    %53 = arith.addf %6, %7 : vector<32x128xbf16>
    %cst_35 = arith.constant dense<0.000000e+00> : vector<24x128xf32>
    %54 = tpu.matmul %52, %53, %cst_35 {dimension_numbers = #tpu.dot_dimension_numbers<[1], [0], [0], [1], [0, 0, 1, 1], [], []>} : vector<24x32xbf16>, vector<32x128xbf16>, vector<24x128xf32> -> vector<24x128xf32>
    %55 = arith.subf %50, %51 : vector<24x128xf32>
    %56 = arith.subf %54, %50 : vector<24x128xf32>
    %57 = arith.subf %56, %51 : vector<24x128xf32>
    %c0_36 = arith.constant 0 : index
    %c0_37 = arith.constant 0 : index
    %c0_38 = arith.constant 0 : index
    %58 = vector.load %arg13[%c0_36, %c0_37, %c0_38] : memref<2x24x128xf32, #tpu.memory_space<vmem>>, vector<1x24x128xf32>
    %59 = vector.shape_cast %58 : vector<1x24x128xf32> to vector<24x128xf32>
    %60 = vector.shape_cast %55 : vector<24x128xf32> to vector<1x24x128xf32>
    tpu.vector_store %arg13[%c0_36, %c0_37, %c0_38], %60 {strides = array<i32>} : memref<2x24x128xf32, #tpu.memory_space<vmem>>, vector<1x24x128xf32>,
    %c0_39 = arith.constant 0 : index
    %c0_40 = arith.constant 0 : index
    %c0_41 = arith.constant 0 : index
    %61 = vector.load %arg14[%c0_39, %c0_40, %c0_41] : memref<2x24x128xf32, #tpu.memory_space<vmem>>, vector<1x24x128xf32>
    %62 = vector.shape_cast %61 : vector<1x24x128xf32> to vector<24x128xf32>
    %63 = vector.shape_cast %57 : vector<24x128xf32> to vector<1x24x128xf32>
    tpu.vector_store %arg14[%c0_39, %c0_40, %c0_41], %63 {strides = array<i32>} : memref<2x24x128xf32, #tpu.memory_space<vmem>>, vector<1x24x128xf32>,
    %c1 = arith.constant 1 : index
    %c0_42 = arith.constant 0 : index
    %c0_43 = arith.constant 0 : index
    %64 = vector.load %arg1[%c1, %c0_42, %c0_43] : memref<2x16x16xbf16, #tpu.memory_space<vmem>>, vector<1x16x16xbf16>
    %65 = vector.shape_cast %64 : vector<1x16x16xbf16> to vector<16x16xbf16>
    %c1_44 = arith.constant 1 : index
    %c0_45 = arith.constant 0 : index
    %c0_46 = arith.constant 0 : index
    %66 = vector.load %arg2[%c1_44, %c0_45, %c0_46] : memref<2x16x16xbf16, #tpu.memory_space<vmem>>, vector<1x16x16xbf16>
    %67 = vector.shape_cast %66 : vector<1x16x16xbf16> to vector<16x16xbf16>
    %cst_47 = arith.constant dense<0.000000e+00> : vector<32x16xf32>
    %68 = tpu.matmul %0, %65, %cst_47 {dimension_numbers = #tpu.dot_dimension_numbers<[1], [0], [0], [1], [0, 0, 1, 1], [], []>} : vector<32x16xbf16>, vector<16x16xbf16>, vector<32x16xf32> -> vector<32x16xf32>
    %cst_48 = arith.constant dense<0.000000e+00> : vector<32x16xf32>
    %69 = tpu.matmul %1, %67, %cst_48 {dimension_numbers = #tpu.dot_dimension_numbers<[1], [0], [0], [1], [0, 0, 1, 1], [], []>} : vector<32x16xbf16>, vector<16x16xbf16>, vector<32x16xf32> -> vector<32x16xf32>
    %70 = arith.addf %0, %1 : vector<32x16xbf16>
    %71 = arith.addf %65, %67 : vector<16x16xbf16>
    %cst_49 = arith.constant dense<0.000000e+00> : vector<32x16xf32>
    %72 = tpu.matmul %70, %71, %cst_49 {dimension_numbers = #tpu.dot_dimension_numbers<[1], [0], [0], [1], [0, 0, 1, 1], [], []>} : vector<32x16xbf16>, vector<16x16xbf16>, vector<32x16xf32> -> vector<32x16xf32>
    %73 = arith.subf %68, %69 : vector<32x16xf32>
    %74 = arith.subf %72, %68 : vector<32x16xf32>
    %75 = arith.subf %74, %69 : vector<32x16xf32>
    %76 = arith.truncf %73 : vector<32x16xf32> to vector<32x16xbf16>
    %77 = arith.truncf %75 : vector<32x16xf32> to vector<32x16xbf16>
    %cst_50 = arith.constant dense<0.000000e+00> : vector<32x32xf32>
    %78 = tpu.matmul %76, %2, %cst_50 {dimension_numbers = #tpu.dot_dimension_numbers<[1], [0], [0], [1], [0, 0, 1, 1], [], []>} : vector<32x16xbf16>, vector<16x32xbf16>, vector<32x32xf32> -> vector<32x32xf32>
    %cst_51 = arith.constant dense<0.000000e+00> : vector<32x32xf32>
    %79 = tpu.matmul %77, %3, %cst_51 {dimension_numbers = #tpu.dot_dimension_numbers<[1], [0], [0], [1], [0, 0, 1, 1], [], []>} : vector<32x16xbf16>, vector<16x32xbf16>, vector<32x32xf32> -> vector<32x32xf32>
    %80 = arith.addf %76, %77 : vector<32x16xbf16>
    %81 = arith.addf %2, %3 : vector<16x32xbf16>
    %cst_52 = arith.constant dense<0.000000e+00> : vector<32x32xf32>
    %82 = tpu.matmul %80, %81, %cst_52 {dimension_numbers = #tpu.dot_dimension_numbers<[1], [0], [0], [1], [0, 0, 1, 1], [], []>} : vector<32x16xbf16>, vector<16x32xbf16>, vector<32x32xf32> -> vector<32x32xf32>
    %83 = arith.subf %78, %79 : vector<32x32xf32>
    %84 = arith.subf %82, %78 : vector<32x32xf32>
    %85 = arith.subf %84, %79 : vector<32x32xf32>
    %86 = arith.mulf %8, %83 : vector<32x32xf32>
    %87 = arith.mulf %9, %85 : vector<32x32xf32>
    %88 = arith.subf %86, %87 : vector<32x32xf32>
    %89 = arith.mulf %8, %85 : vector<32x32xf32>
    %90 = arith.mulf %9, %83 : vector<32x32xf32>
    %91 = arith.addf %89, %90 : vector<32x32xf32>
    %92 = arith.truncf %88 : vector<32x32xf32> to vector<32x32xbf16>
    %93 = arith.truncf %91 : vector<32x32xf32> to vector<32x32xbf16>
    %cst_53 = arith.constant dense<0.000000e+00> : vector<24x32xf32>
    %94 = tpu.matmul %4, %92, %cst_53 {dimension_numbers = #tpu.dot_dimension_numbers<[1], [0], [0], [1], [0, 0, 1, 1], [], []>} : vector<24x32xbf16>, vector<32x32xbf16>, vector<24x32xf32> -> vector<24x32xf32>
    %cst_54 = arith.constant dense<0.000000e+00> : vector<24x32xf32>
    %95 = tpu.matmul %5, %93, %cst_54 {dimension_numbers = #tpu.dot_dimension_numbers<[1], [0], [0], [1], [0, 0, 1, 1], [], []>} : vector<24x32xbf16>, vector<32x32xbf16>, vector<24x32xf32> -> vector<24x32xf32>
    %96 = arith.addf %4, %5 : vector<24x32xbf16>
    %97 = arith.addf %92, %93 : vector<32x32xbf16>
    %cst_55 = arith.constant dense<0.000000e+00> : vector<24x32xf32>
    %98 = tpu.matmul %96, %97, %cst_55 {dimension_numbers = #tpu.dot_dimension_numbers<[1], [0], [0], [1], [0, 0, 1, 1], [], []>} : vector<24x32xbf16>, vector<32x32xbf16>, vector<24x32xf32> -> vector<24x32xf32>
    %99 = arith.subf %94, %95 : vector<24x32xf32>
    %100 = arith.subf %98, %94 : vector<24x32xf32>
    %101 = arith.subf %100, %95 : vector<24x32xf32>
    %102 = arith.truncf %99 : vector<24x32xf32> to vector<24x32xbf16>
    %103 = arith.truncf %101 : vector<24x32xf32> to vector<24x32xbf16>
    %cst_56 = arith.constant dense<0.000000e+00> : vector<24x128xf32>
    %104 = tpu.matmul %102, %6, %cst_56 {dimension_numbers = #tpu.dot_dimension_numbers<[1], [0], [0], [1], [0, 0, 1, 1], [], []>} : vector<24x32xbf16>, vector<32x128xbf16>, vector<24x128xf32> -> vector<24x128xf32>
    %cst_57 = arith.constant dense<0.000000e+00> : vector<24x128xf32>
    %105 = tpu.matmul %103, %7, %cst_57 {dimension_numbers = #tpu.dot_dimension_numbers<[1], [0], [0], [1], [0, 0, 1, 1], [], []>} : vector<24x32xbf16>, vector<32x128xbf16>, vector<24x128xf32> -> vector<24x128xf32>
    %106 = arith.addf %102, %103 : vector<24x32xbf16>
    %107 = arith.addf %6, %7 : vector<32x128xbf16>
    %cst_58 = arith.constant dense<0.000000e+00> : vector<24x128xf32>
    %108 = tpu.matmul %106, %107, %cst_58 {dimension_numbers = #tpu.dot_dimension_numbers<[1], [0], [0], [1], [0, 0, 1, 1], [], []>} : vector<24x32xbf16>, vector<32x128xbf16>, vector<24x128xf32> -> vector<24x128xf32>
    %109 = arith.subf %104, %105 : vector<24x128xf32>
    %110 = arith.subf %108, %104 : vector<24x128xf32>
    %111 = arith.subf %110, %105 : vector<24x128xf32>
    %c1_59 = arith.constant 1 : index
    %c0_60 = arith.constant 0 : index
    %c0_61 = arith.constant 0 : index
    %112 = vector.load %arg13[%c1_59, %c0_60, %c0_61] : memref<2x24x128xf32, #tpu.memory_space<vmem>>, vector<1x24x128xf32>
    %113 = vector.shape_cast %112 : vector<1x24x128xf32> to vector<24x128xf32>
    %114 = vector.shape_cast %109 : vector<24x128xf32> to vector<1x24x128xf32>
    tpu.vector_store %arg13[%c1_59, %c0_60, %c0_61], %114 {strides = array<i32>} : memref<2x24x128xf32, #tpu.memory_space<vmem>>, vector<1x24x128xf32>,
    %c1_62 = arith.constant 1 : index
    %c0_63 = arith.constant 0 : index
    %c0_64 = arith.constant 0 : index
    %115 = vector.load %arg14[%c1_62, %c0_63, %c0_64] : memref<2x24x128xf32, #tpu.memory_space<vmem>>, vector<1x24x128xf32>
    %116 = vector.shape_cast %115 : vector<1x24x128xf32> to vector<24x128xf32>
    %117 = vector.shape_cast %111 : vector<24x128xf32> to vector<1x24x128xf32>
    tpu.vector_store %arg14[%c1_62, %c0_63, %c0_64], %117 {strides = array<i32>} : memref<2x24x128xf32, #tpu.memory_space<vmem>>, vector<1x24x128xf32>,
    return
  }
  func.func @transform_0(%arg0: i32) -> (i32, i32, i32) {
    %c0_i32 = arith.constant 0 : i32
    %c0_i32_0 = arith.constant 0 : i32
    %c0_i32_1 = arith.constant 0 : i32
    return %arg0, %c0_i32, %c0_i32_0 : i32, i32, i32
  }
  func.func @transform_1(%arg0: i32) -> (i32, i32, i32) {
    %c0_i32 = arith.constant 0 : i32
    %c0_i32_0 = arith.constant 0 : i32
    %c0_i32_1 = arith.constant 0 : i32
    return %arg0, %c0_i32, %c0_i32_0 : i32, i32, i32
  }
  func.func @transform_2(%arg0: i32) -> (i32, i32) {
    %c0_i32 = arith.constant 0 : i32
    %c0_i32_0 = arith.constant 0 : i32
    %c0_i32_1 = arith.constant 0 : i32
    return %c0_i32, %c0_i32_0 : i32, i32
  }
  func.func @transform_3(%arg0: i32) -> (i32, i32) {
    %c0_i32 = arith.constant 0 : i32
    %c0_i32_0 = arith.constant 0 : i32
    %c0_i32_1 = arith.constant 0 : i32
    return %c0_i32, %c0_i32_0 : i32, i32
  }
  func.func @transform_4(%arg0: i32) -> (i32, i32) {
    %c0_i32 = arith.constant 0 : i32
    %c0_i32_0 = arith.constant 0 : i32
    %c0_i32_1 = arith.constant 0 : i32
    return %c0_i32, %c0_i32_0 : i32, i32
  }
  func.func @transform_5(%arg0: i32) -> (i32, i32) {
    %c0_i32 = arith.constant 0 : i32
    %c0_i32_0 = arith.constant 0 : i32
    %c0_i32_1 = arith.constant 0 : i32
    return %c0_i32, %c0_i32_0 : i32, i32
  }
  func.func @transform_6(%arg0: i32) -> (i32, i32) {
    %c0_i32 = arith.constant 0 : i32
    %c0_i32_0 = arith.constant 0 : i32
    %c0_i32_1 = arith.constant 0 : i32
    return %c0_i32, %c0_i32_0 : i32, i32
  }
  func.func @transform_7(%arg0: i32) -> (i32, i32) {
    %c0_i32 = arith.constant 0 : i32
    %c0_i32_0 = arith.constant 0 : i32
    %c0_i32_1 = arith.constant 0 : i32
    return %c0_i32, %c0_i32_0 : i32, i32
  }
  func.func @transform_8(%arg0: i32) -> (i32, i32) {
    %c0_i32 = arith.constant 0 : i32
    %c0_i32_0 = arith.constant 0 : i32
    %c0_i32_1 = arith.constant 0 : i32
    return %c0_i32, %c0_i32_0 : i32, i32
  }
  func.func @transform_9(%arg0: i32) -> (i32, i32) {
    %c0_i32 = arith.constant 0 : i32
    %c0_i32_0 = arith.constant 0 : i32
    %c0_i32_1 = arith.constant 0 : i32
    return %c0_i32, %c0_i32_0 : i32, i32
  }
  func.func @transform_10(%arg0: i32) -> (i32, i32) {
    %c0_i32 = arith.constant 0 : i32
    %c0_i32_0 = arith.constant 0 : i32
    %c0_i32_1 = arith.constant 0 : i32
    return %c0_i32, %c0_i32_0 : i32, i32
  }
  func.func @transform_11(%arg0: i32) -> (i32, i32) {
    %c0_i32 = arith.constant 0 : i32
    %c0_i32_0 = arith.constant 0 : i32
    %c0_i32_1 = arith.constant 0 : i32
    return %c0_i32, %c0_i32_0 : i32, i32
  }
  func.func @transform_12(%arg0: i32) -> (i32, i32, i32) {
    %c0_i32 = arith.constant 0 : i32
    %c0_i32_0 = arith.constant 0 : i32
    %c0_i32_1 = arith.constant 0 : i32
    return %arg0, %c0_i32, %c0_i32_0 : i32, i32, i32
  }
  func.func @transform_13(%arg0: i32) -> (i32, i32, i32) {
    %c0_i32 = arith.constant 0 : i32
    %c0_i32_0 = arith.constant 0 : i32
    %c0_i32_1 = arith.constant 0 : i32
    return %arg0, %c0_i32, %c0_i32_0 : i32, i32, i32
  }
}

</mosaic_0001>

<bundles_post_ra>
// kernel: tpu_custom_call.1
= control target key start
LH: loop header
LB: loop body
LE: loop exit
PB: predicated region body
PF: predicated region fallthrough
CT: control target
= control target key end

     0   :  { %s4030_s0 = inlined_call_operand.vmem [shape: bf16[4,16,16], index: 0, kind: input, shape index: {}]   ;;  %s4031_s1 = inlined_call_operand.hbm [shape: bf16[4,16,16], index: 1, kind: input, shape index: {}]   ;;  %s4032_s2 = inlined_call_operand.vmem [shape: bf16[32,16], index: 2, kind: input, shape index: {}]   ;;  %s4033_s3 = inlined_call_operand.vmem [shape: bf16[32,16], index: 3, kind: input, shape index: {}]   ;;  %s4034_s4 = inlined_call_operand.hbm [shape: bf16[16,32], index: 4, kind: input, shape index: {}]   ;;  %s4035_s5 = inlined_call_operand.hbm [shape: bf16[16,32], index: 5, kind: input, shape index: {}]   ;;  %s4036_s6 = inlined_call_operand.hbm [shape: bf16[24,32], index: 6, kind: input, shape index: {}]   ;;  %s4037_s7 = inlined_call_operand.hbm [shape: bf16[24,32], index: 7, kind: input, shape index: {}]   ;;  %s4038_s8 = inlined_call_operand.hbm [shape: bf16[32,128], index: 8, kind: input, shape index: {}]   ;;  %s4039_s9 = inlined_call_operand.vmem [shape: bf16[32,128], index: 9, kind: input, shape index: {}]   ;;  %s4040_s10 = inlined_call_operand.vmem [shape: f32[32,32], index: 10, kind: input, shape index: {}]   ;;  %s4041_s11 = inlined_call_operand.hbm [shape: f32[32,32], index: 11, kind: input, shape index: {}]   ;;  %s4042_s12 = inlined_call_operand.hbm [shape: f32[4,24,128], index: 12, kind: output, shape index: {0}]   ;;  %s4043_s13 = inlined_call_operand.hbm [shape: f32[4,24,128], index: 13, kind: output, shape index: {1}]  }
   0x1   :  { %4055 = sst [smem:[#allocation23_spill]] %s4030_s0 }
   0x2   :  { %4056 = sst [smem:[#allocation24_spill]] %s4031_s1 }
   0x3   :  { %4057 = sst [smem:[#allocation25_spill]] %s4032_s2 }
   0x4   :  { %4058 = sst [smem:[#allocation26_spill]] %s4033_s3 }
   0x5   :  { %4059 = sst [smem:[#allocation27_spill]] %s4034_s4 }
   0x6   :  { %4060 = sst [smem:[#allocation28_spill]] %s4035_s5 }
   0x7   :  { %4061 = sst [smem:[#allocation29_spill]] %s4036_s6 }
   0x8   :  { %4062 = sst [smem:[#allocation30_spill]] %s4037_s7 }
   0x9   :  { %4063 = sst [smem:[#allocation31_spill]] %s4038_s8 }
   0xa   :  { %4064 = sst [smem:[#allocation32_spill]] %s4039_s9 }
   0xb   :  { %4065 = sst [smem:[#allocation33_spill]] %s4040_s10 }
   0xc   :  { %4066 = sst [smem:[#allocation34_spill]] %s4042_s12 }
   0xd   :  { %4067 = sst [smem:[#allocation35_spill]] %s4043_s13 }
   0xe   :  { %19 = vsyncpa [#allocation3], 0 }
   0xf   :  { %21 = vsyncpa [#allocation3 + $0x1], 0 }
  0x10   :  { %22 = vsyncpa [#allocation6], 0 }
  0x11   :  { %23 = vsyncpa [#allocation9], 0 }
  0x12   :  { %24 = vsyncpa [#allocation12], 0 }
  0x13   :  { %25 = vsyncpa [#allocation4], 0 }
  0x14   :  { %27 = vsyncpa [#allocation4 + $0x1], 0 }
  0x15   :  { %28 = vsyncpa [#allocation16], 0 }
  0x16   :  { %30 = vsyncpa [#allocation16 + $0x1], 0  ;;  %s3365_s25 = smov 0   ;;  %s3367_s26 = smov 0  }
  0x17   :  { %s3369_s27 = smov 0   ;;  %s3371_s28 = smov 0  }
  0x18 LB: > { %s3280_s29 = smov [#allocation5]   ;;  %s3386_s14 = sadd.s32 4294967295, %s3278_s28   ;;  %s3278_s28 = sphi %s3371_s28, %s4106_s28   ;;  %s3274_s27 = sphi %s3369_s27, %s4105_s27   ;;  %s3270_s26 = sphi %s3367_s26, %s4104_s26   ;;  %s3266_s25 = sphi %s3365_s25, %s4103_s25  }
  0x19   : > { %s373_s30 = sshll.u32 %s3280_s29, 4  ;;  %p2460_p0 = scmp.ge.s32.totalorder %s3278_s28, 1  ;;  %s3391_s30 = int_to_ptr.vmem [resolvable:$true] %s373_s30 }
  0x1a   : > { %p4049_p1 = scmp.eq.s32.totalorder %s3386_s14, 0  ;;  %p355_p2 = scmp.lt.s32.totalorder %s3278_s28, 3 }
  0x1b   : > { %s3281_s16 = smov [#allocation8]   ;;  %s3282_s19 = smov [#allocation11]  }
  0x1c   : > { %p3393_p3 = pnand %p2460_p0, %p355_p2  ;;  %s399_s17 = sshll.u32 %s3281_s16, 4  ;;  %s3406_s17 = int_to_ptr.vmem [resolvable:$true] %s399_s17 }
  0x1d   : > { %s425_s20 = sshll.u32 %s3282_s19, 4  ;;  %s4070_s4 = sld [smem:[#allocation27_spill]]  ;;  %s3408_s20 = int_to_ptr.vmem [resolvable:$true] %s425_s20 }
  0x1e   : > { %s4068_s15 = scalar_select %p3393_p3, 1, 0 }
  0x1f   : > { %p2864_p5 = pneg %p3393_p3 }
  0x21   : > { %p3402_p6 = pnand %p2864_p5, %p4049_p1 }
  0x23   : > { %s2970_s23 = scalar_lea.hbm %s4070_s4, 128  ;;  %p3418_p8 = pneg %p3402_p6 }
  0x24   : > { %p2971_p7 = scmp.ne.s32.totalorder %s4070_s4, %s2970_s23  ;;  %p2977_p11 = scmp.lt.u32.totalorder %s2970_s23, %s4070_s4 }
  0x26   : > { %p2973_p9 = pnand %p3418_p8, %p2971_p7 }
  0x28   : > { %p2974_p10 = pneg %p2973_p9 }
  0x2a   : > { %p2979_p12 = pnand %p2977_p11, %p2974_p10 }
  0x2c   : > { %2982 = shalt.err (!%p2979_p12)
}
  0x2d   : > { %s2983_s21 = scalar_lea.vmem %s3391_s30, 128  ;;  %p2991_p5 = scmp.lt.s32.totalorder %s3391_s30, %s3391_s30 }
  0x2e   : > { %p2984_p13 = scmp.ne.s32.totalorder %s3391_s30, %s2983_s21  ;;  %p2992_p4 = scmp.lt.s32.totalorder %s2983_s21, %s2983_s21 }
  0x30   : > { %p2986_p0 = pnand %p2984_p13, %p3418_p8  ;;  %p2993_p7 = por %p2992_p4, %p2991_p5 }
  0x32   : > { %p2987_p2 = pneg %p2986_p0 }
  0x34   : > { %p2994_p9 = pnand %p2993_p7, %p2987_p2 }
  0x36   : > { %2997 = shalt.err (!%p2994_p9)
}
  0x37   : > { %s4051_s22 = smov 64   ;;  %s3284_s13 = smov 4  }
  0x38   : > { %2867 = dma.hbm_to_vmem [thread:$0]  (!%p3402_p6), %s4070_s4, 128, %s3391_s30, [#allocation6], %s4051_s22, %s4051_s22, %s3284_s13  }
  0x39   : > { %s4072_s6 = sld [smem:[#allocation29_spill]] }
  0x3f   : > { %s2998_s21 = scalar_lea.hbm %s4072_s6, 192 }
  0x40   : > { %p2999_p4 = scmp.ne.s32.totalorder %s4072_s6, %s2998_s21  ;;  %p3005_p12 = scmp.lt.u32.totalorder %s2998_s21, %s4072_s6 }
  0x42   : > { %p3001_p10 = pnand %p2999_p4, %p3418_p8 }
  0x44   : > { %p3002_p11 = pneg %p3001_p10 }
  0x46   : > { %p3007_p13 = pnand %p3005_p12, %p3002_p11 }
  0x48   : > { %3010 = shalt.err (!%p3007_p13)
}
  0x49   : > { %s3011_s30 = scalar_lea.vmem %s3406_s17, 192  ;;  %p3019_p7 = scmp.lt.s32.totalorder %s3406_s17, %s3406_s17 }
  0x4a   : > { %p3012_p0 = scmp.ne.s32.totalorder %s3406_s17, %s3011_s30  ;;  %p3020_p9 = scmp.lt.s32.totalorder %s3011_s30, %s3011_s30 }
  0x4c   : > { %p3014_p2 = pnand %p3012_p0, %p3418_p8  ;;  %p3021_p4 = por %p3020_p9, %p3019_p7 }
  0x4e   : > { %p3015_p5 = pneg %p3014_p2 }
  0x50   : > { %p3022_p10 = pnand %p3021_p4, %p3015_p5 }
  0x52   : > { %3025 = shalt.err (!%p3022_p10)
}
  0x53   : > { %2873 = dma.hbm_to_vmem [thread:$0]  (!%p3402_p6), %s4072_s6, 192, %s3406_s17, [#allocation9], %s4051_s22, %s4051_s22, %s3284_s13  }
  0x54   : > { %s4073_s8 = sld [smem:[#allocation31_spill]] }
  0x5a   : > { %s3026_s23 = scalar_lea.hbm %s4073_s8, 256 }
  0x5b   : > { %p3027_p11 = scmp.ne.s32.totalorder %s4073_s8, %s3026_s23  ;;  %p3033_p0 = scmp.lt.u32.totalorder %s3026_s23, %s4073_s8 }
  0x5d   : > { %p3029_p12 = pnand %p3027_p11, %p3418_p8 }
  0x5f   : > { %p3030_p13 = pneg %p3029_p12 }
  0x61   : > { %p3035_p2 = pnand %p3033_p0, %p3030_p13 }
  0x63   : > { %3038 = shalt.err (!%p3035_p2)
}
  0x64   : > { %s3039_s17 = scalar_lea.vmem %s3408_s20, 256  ;;  %p3047_p4 = scmp.lt.s32.totalorder %s3408_s20, %s3408_s20 }
  0x65   : > { %p3040_p5 = scmp.ne.s32.totalorder %s3408_s20, %s3039_s17  ;;  %p3048_p10 = scmp.lt.s32.totalorder %s3039_s17, %s3039_s17 }
  0x67   : > { %p3042_p7 = pnand %p3040_p5, %p3418_p8  ;;  %p3049_p11 = por %p3048_p10, %p3047_p4 }
  0x69   : > { %p3043_p9 = pneg %p3042_p7 }
  0x6b   : > { %p3050_p12 = pnand %p3049_p11, %p3043_p9 }
  0x6d   : > { %3053 = shalt.err (!%p3050_p12)
}
  0x6e   : > { %2879 = dma.hbm_to_vmem [thread:$0]  (!%p3402_p6), %s4073_s8, 256, %s3408_s20, [#allocation12], %s4051_s22, %s4051_s22, %s3284_s13  }
  0x6f   : > { %s3285_s9 = smov [#allocation7]   ;;  %s3286_s12 = smov [#allocation10]  }
  0x70   : > { %s386_s10 = sshll.u32 %s3285_s9, 4  ;;  %s412_s23 = sshll.u32 %s3286_s12, 4  ;;  %s387_s10 = int_to_ptr.vmem [resolvable:$true] %s386_s10  ;;  %s413_s23 = int_to_ptr.vmem [resolvable:$true] %s412_s23 }
  0x71   : > { %s4074_s5 = sld [smem:[#allocation28_spill]] }
  0x77   : > { %s3054_s19 = scalar_lea.hbm %s4074_s5, 128 }
  0x78   : > { %p3055_p13 = scmp.ne.s32.totalorder %s4074_s5, %s3054_s19  ;;  %p3061_p5 = scmp.lt.u32.totalorder %s3054_s19, %s4074_s5 }
  0x7a   : > { %p3057_p0 = pnand %p3055_p13, %p3418_p8 }
  0x7c   : > { %p3058_p2 = pneg %p3057_p0 }
  0x7e   : > { %p3063_p7 = pnand %p3061_p5, %p3058_p2 }
  0x80   : > { %3066 = shalt.err (!%p3063_p7)
}
  0x81   : > { %s3067_s20 = scalar_lea.vmem %s387_s10, 128  ;;  %p3075_p11 = scmp.lt.s32.totalorder %s387_s10, %s387_s10 }
  0x82   : > { %p3068_p9 = scmp.ne.s32.totalorder %s387_s10, %s3067_s20  ;;  %p3076_p12 = scmp.lt.s32.totalorder %s3067_s20, %s3067_s20 }
  0x84   : > { %p3070_p4 = pnand %p3068_p9, %p3418_p8  ;;  %p3077_p1 = por %p3076_p12, %p3075_p11 }
  0x86   : > { %p3071_p10 = pneg %p3070_p4 }
  0x88   : > { %p3078_p3 = pnand %p3077_p1, %p3071_p10 }
  0x8a   : > { %3081 = shalt.err (!%p3078_p3)
}
  0x8b   : > { %2870 = dma.hbm_to_vmem [thread:$0]  (!%p3402_p6), %s4074_s5, 128, %s387_s10, [#allocation6], %s4051_s22, %s4051_s22, %s3284_s13  }
  0x8c   : > { %s4075_s7 = sld [smem:[#allocation30_spill]] }
  0x92   : > { %s3082_s24 = scalar_lea.hbm %s4075_s7, 192 }
  0x93   : > { %p3083_p1 = scmp.ne.s32.totalorder %s4075_s7, %s3082_s24  ;;  %p3089_p0 = scmp.lt.u32.totalorder %s3082_s24, %s4075_s7 }
  0x95   : > { %p3085_p3 = pnand %p3083_p1, %p3418_p8 }
  0x97   : > { %p3086_p13 = pneg %p3085_p3 }
  0x99   : > { %p3091_p2 = pnand %p3089_p0, %p3086_p13 }
  0x9b   : > { %3094 = shalt.err (!%p3091_p2)
}
  0x9c   : > { %s3095_s30 = scalar_lea.vmem %s413_s23, 192  ;;  %p3103_p4 = scmp.lt.s32.totalorder %s413_s23, %s413_s23 }
  0x9d   : > { %p3096_p5 = scmp.ne.s32.totalorder %s413_s23, %s3095_s30  ;;  %p3104_p10 = scmp.lt.s32.totalorder %s3095_s30, %s3095_s30 }
  0x9f   : > { %p3098_p7 = pnand %p3096_p5, %p3418_p8  ;;  %p3105_p11 = por %p3104_p10, %p3103_p4 }
  0xa1   : > { %p3099_p9 = pneg %p3098_p7 }
  0xa3   : > { %p3106_p12 = pnand %p3105_p11, %p3099_p9 }
  0xa5   : > { %3109 = shalt.err (!%p3106_p12)
}
  0xa6   : > { %2876 = dma.hbm_to_vmem [thread:$0]  (!%p3402_p6), %s4075_s7, 192, %s413_s23, [#allocation9], %s4051_s22, %s4051_s22, %s3284_s13  }
  0xa7   : > { %s3287_s4 = smov [#allocation13]   ;;  %s3110_s24 = scalar_lea.hbm %s4041_s11, 512 }
  0xa8   : > { %s444_s3 = sshll.u32 %s3287_s4, 4  ;;  %p3111_p1 = scmp.ne.s32.totalorder %s4041_s11, %s3110_s24  ;;  %s445_s3 = int_to_ptr.vmem [resolvable:$true] %s444_s3 }
  0xa9   : > { %p3117_p0 = scmp.lt.u32.totalorder %s3110_s24, %s4041_s11 }
  0xaa   : > { %p3113_p3 = pnand %p3111_p1, %p3418_p8 }
  0xac   : > { %p3114_p13 = pneg %p3113_p3 }
  0xae   : > { %p3119_p2 = pnand %p3117_p0, %p3114_p13 }
  0xb0   : > { %3122 = shalt.err (!%p3119_p2)
}
  0xb1   : > { %s3123_s23 = scalar_lea.vmem %s445_s3, 512  ;;  %p3131_p4 = scmp.lt.s32.totalorder %s445_s3, %s445_s3 }
  0xb2   : > { %p3124_p5 = scmp.ne.s32.totalorder %s445_s3, %s3123_s23  ;;  %p3132_p10 = scmp.lt.s32.totalorder %s3123_s23, %s3123_s23 }
  0xb4   : > { %p3126_p7 = pnand %p3124_p5, %p3418_p8  ;;  %p3133_p11 = por %p3132_p10, %p3131_p4 }
  0xb6   : > { %p3127_p9 = pneg %p3126_p7 }
  0xb8   : > { %p3134_p12 = pnand %p3133_p11, %p3127_p9 }
  0xba   : > { %3137 = shalt.err (!%p3134_p12)
}
  0xbb   : > { %s3288_s30 = smov 128   ;;  %s3289_s16 = smov 8  }
  0xbc   : > { %2882 = dma.hbm_to_vmem [thread:$0]  (!%p3402_p6), %s4041_s11, 512, %s445_s3, [#allocation12], %s3288_s30, %s3288_s30, %s3289_s16  }
  0xbd   : > { %s2459_s4 = sadd.s32 4294967294, %s3278_s28   ;;  %s3556_s9 = sadd.s32 1, %s3278_s28  }
  0xbe   : > { %s66_s12 = ssub.s32 %s3278_s28, %s3556_s9  ;;  %s69_s24 = sadd.s32 1, %s3274_s27 }
  0xbf   : > { %p67_p8 = scmp.eq.s32.totalorder %s66_s12, 0  ;;  %p76_p1 = scmp.ne.s32.totalorder %s3274_s27, %s3270_s26 }
  0xc0   : > { %p77_p3 = scmp.eq.s32.totalorder %s3278_s28, 0  ;;  %p82_p13 = scmp.ne.s32.totalorder %s3270_s26, %s3266_s25 }
  0xc1   : > { %s3567_s29 = scalar_select %p67_p8, %s3274_s27, %s69_s24  }
  0xc2   : > { %p3569_p0 = por %p77_p3, %p76_p1  ;;  %p4077_p2 = scmp.eq.s32.totalorder %s3386_s14, 0 }
  0xc3   : > { %p316_p5 = scmp.eq.s32.totalorder %s3386_s14, 1  ;;  %p322_p7 = scmp.eq.s32.totalorder %s2459_s4, 1 }
  0xc4   : > { %p3575_p6 = por %p4077_p2, %p82_p13  ;;  %p2900_p9 = scmp.lt.s32.totalorder %s3278_s28, 2 }
  0xc5   : > { %s468_s19 = sand.u32 1, %s3274_s27   ;;  %p3582_p4 = por %p316_p5, %p76_p1 }
  0xc6   : > { %p3586_p10 = por %p322_p7, %p82_p13  ;;  %s2468_s23 = sshll.u32 %s468_s19, 4 }
  0xc7   : > { %s4079_s21 = scalar_select %p3582_p4, 1, 0 }
  0xc8   : > { %s4080_s17 = scalar_select %p3586_p10, 1, 0 }
  0xc9   : > { %s2577_s30 = sshll.u32 %s3278_s28, 8  ;;  %s4081_s1 = sld [smem:[#allocation24_spill]] }
  0xca   : > { %s472_s4 = scalar_lea.vmem [#allocation2], %s2468_s23  ;;  %p3600_p11 = pnand %p2900_p9, %p3569_p0 }
  0xcb   : > { %s480_s12 = sshll.u32 %s472_s4, 4  ;;  %s3604_s22 = scalar_lea.sflag [#allocation3], %s468_s19  ;;  %s3596_s12 = int_to_ptr.vmem [resolvable:$true] %s480_s12 }
  0xcc   : > { %p3140_p8 = pneg %p3600_p11 }
  0xcf   : > { %s3594_s20 = scalar_lea.hbm %s4081_s1, %s2577_s30  ;;  %s3143_s18 = scalar_lea.hbm %s4081_s1, 512 }
  0xd0   : > { %s3138_s16 = scalar_lea.hbm %s3594_s20, 256  ;;  %p3144_p13 = scmp.lt.u32.totalorder %s3594_s20, %s4081_s1 }
  0xd1   : > { %p3139_p12 = scmp.ne.s32.totalorder %s3594_s20, %s3138_s16  ;;  %p3145_p0 = scmp.lt.u32.totalorder %s3143_s18, %s3138_s16 }
  0xd2   : > { %p3147_p5 = scmp.lt.u32.totalorder %s3138_s16, %s3594_s20 }
  0xd3   : > { %p3141_p1 = pnand %p3140_p8, %p3139_p12  ;;  %p3146_p2 = por %p3145_p0, %p3144_p13 }
  0xd5   : > { %p3142_p3 = pneg %p3141_p1  ;;  %p3148_p7 = por %p3147_p5, %p3146_p2 }
  0xd7   : > { %p3149_p9 = pnand %p3148_p7, %p3142_p3 }
  0xd9   : > { %3152 = shalt.err (!%p3149_p9)
}
  0xda   : > { %s3153_s19 = scalar_lea.vmem %s3596_s12, 256  ;;  %s3290_s23 = smov [#allocation2]  }
  0xdb   : > { %p3154_p12 = scmp.ne.s32.totalorder %s3596_s12, %s3153_s19  ;;  %s3158_s30 = sshll.u32 %s3290_s23, 4  ;;  %s3159_s30 = int_to_ptr.vmem [resolvable:$false] %s3158_s30 }
  0xdc   : > { %s3160_s10 = scalar_lea.vmem %s3159_s30, 512  ;;  %p3161_p4 = scmp.lt.s32.totalorder %s3596_s12, %s3159_s30 }
  0xdd   : > { %p3156_p1 = pnand %p3154_p12, %p3140_p8  ;;  %p3162_p13 = scmp.lt.s32.totalorder %s3160_s10, %s3153_s19 }
  0xdf   : > { %p3157_p10 = pneg %p3156_p1  ;;  %p3163_p0 = por %p3162_p13, %p3161_p4 }
  0xe1   : > { %p3164_p2 = pnand %p3163_p0, %p3157_p10 }
  0xe3   : > { %3167 = shalt.err (!%p3164_p2)
}
  0xe4   : > { %s4083_s16 = smov 64   ;;  %p4084_p8 = scmp.ne.s32.totalorder %s4068_s15, 0 }
  0xe5   : > { %2886 = dma.hbm_to_vmem [thread:$0]  (!%p3600_p11), %s3594_s20, 256, %s3596_s12, %s3604_s22, %s4083_s16, %s4083_s16, %s3284_s13  }
  0xe6   : > { %492 = sbr.rel (%p4084_p8) target bundleno = 1918 (0x77e), region = 68  ;;  %s3638_s18 = sand.u32 (!%p4084_p8), 1, %s3270_s26  }
  0xe7   : > { %s2473_s4 = sshll.u32 (!%p4084_p8), %s3638_s18, 4  ;;  %s495_s19 = scalar_lea.sflag (!%p4084_p8), [#allocation3], %s3638_s18 }
  0xe8   : > { %s3642_s23 = scalar_lea.vmem (!%p4084_p8), [#allocation2], %s2473_s4 }
  0xed   : > { %3241 = dma.done.wait (%p3575_p6), %s495_s19, 256  }
  0xee   : > { %3243 = vsyncadd (%p3575_p6), %s495_s19, 4294967040  ;;  %p4085_p4 = scmp.eq.s32.totalorder %s3386_s14, 0 }
  0xf0   : > { %3245 = dma.done.wait (%p4085_p4), [#allocation6], 256   ;;  %p4086_p10 = pmov %p4085_p4 }
  0xf1   : > { %p4087_p11 = pmov %p4085_p4 }
  0xf2   : > { %3247 = vsyncadd (%p4086_p10), [#allocation6], 4294967040 }
  0xf3   : > { %3249 = dma.done.wait (%p4087_p11), [#allocation9], 384   ;;  %p4088_p3 = pmov %p4085_p4 }
  0xf5   : > { %3251 = vsyncadd (%p4088_p3), [#allocation9], 4294966912  ;;  %p4089_p5 = pmov %p4088_p3 }
  0xf6   : > { %p4090_p7 = pmov %p4088_p3 }
  0xf7   : > { %3253 = dma.done.wait (%p4089_p5), [#allocation12], 768  }
  0xf8   : > { %3255 = vsyncadd (%p4090_p7), [#allocation12], 4294966528  ;;  %s2480_s15 = sshll.u32 %s3386_s14, 1  ;;  %s4091_s0 = sld [smem:[#allocation23_spill]]  ;;  %vm641_vm0 = vcmask 130048   ;;  %vm1096_vm1 = vcmask 261120  }
  0xf9   : > { %p577_p6 = scmp.lt.s32.totalorder %s2480_s15, 3  ;;  %v623_v2 = vld [vmem:[%s3642_s23] sm:$0xf]  ;;  %v624_v4 = vld [vmem:[%s3642_s23 + $0x4] sm:$0xf]  ;;  %s4092_s2 = sld [smem:[#allocation25_spill]] }
  0xfa   : > { %v2490_v8 = vcombine.low %v623_v2, %v624_v4  ;;  %s4093_s19 = sld [smem:[#allocation26_spill]]  ;;  %v595_v27 = vld [vmem:[#allocation5] sm:$0xf]  ;;  %v596_v28 = vld [vmem:[#allocation5 + $0x4] sm:$0xf]  ;;  %s4094_s13 = sld [smem:[#allocation33_spill]] }
  0xfb   : > { %s4108_s15 = smov (!%p577_p6, %s2480_s15), 3  ;;  %v3718_v29 = vcombine.low %v595_v27, %v596_v28  ;;  %v597_v30 = vld [vmem:[#allocation7] sm:$0xf]  ;;  %v598_v31 = vld [vmem:[#allocation7 + $0x4] sm:$0xf]  ;;  %s4053_s3 = smul.u32 768, %s3386_s14 }
  0xfc   : > { %s2578_s22 = sshll.u32 %s4108_s15, 3  ;;  %2669 = vmatprep.subr.bf16.mxu1 %v2490_v8  ;;  %v985_v32 = vadd.bf16 %v597_v30, %v595_v27  ;;  %v986_v33 = vadd.bf16 %v598_v31, %v596_v28  ;;  %v3722_v34 = vcombine.low %v597_v30, %v598_v31  ;;  %v3758_v27 = vld [vmem:[#allocation13] sm:$0xff]  ;;  %s4096_s10 = sld [smem:[#allocation34_spill]] }
  0xfd   : > { %2670 = vmatpush3.bf16.msra.mxu1 %v2490_v8  ;;  %p4097_p12 = scmp.ne.s32.totalorder %s4079_s21, 0  ;;  %s3291_s1 = smov [#allocation14]  }
  0xfe   : > { %s3664_s20 = scalar_lea.vmem %s4091_s0, %s2578_s22  ;;  %2681 = vmatprep.subr.bf16.mxu1 %v3718_v29  ;;  %v3724_v35 = vcombine.low %v985_v32, %v986_v33  ;;  %v3765_v33 = vld [vmem:[#allocation13 + $0x18] sm:$0xff]  ;;  %s4095_s22 = sld [smem:[#allocation32_spill]] }
  0xff   : > { %v621_v0 = vld [vmem:[%s3664_s20] sm:$0xf]  ;;  %v622_v1 = vld [vmem:[%s3664_s20 + $0x4] sm:$0xf]  ;;  %v589_v13 = vld [vmem:[%s4092_s2 + $0x8] sm:$0xf] }
 0x100   : > { %v2485_v3 = vcombine.low %v621_v0, %v622_v1  ;;  %v772_v5 = vadd.bf16 %v623_v2, %v621_v0  ;;  %v587_v6 = vld [vmem:[%s4092_s2] sm:$0xf]  ;;  %v588_v7 = vld [vmem:[%s4092_s2 + $0x4] sm:$0xf]  ;;  %v773_v9 = vadd.bf16 %v624_v4, %v622_v1  ;;  %v590_v17 = vld [vmem:[%s4092_s2 + $0xc] sm:$0xf] }
 0x101   : > { %v3676_v10 = vcombine.low %v587_v6, %v588_v7  ;;  %v591_v11 = vld [vmem:[%s4093_s19] sm:$0xf]  ;;  %v592_v12 = vld [vmem:[%s4093_s19 + $0x4] sm:$0xf]  ;;  %v593_v18 = vld [vmem:[%s4093_s19 + $0x8] sm:$0xf]  ;;  %v3698_v20 = vcombine.low %v589_v13, %v590_v17 }
 0x102   : > { %2663 = vmatprep.subr.bf16.mxu0 %v2485_v3  ;;  %v3687_v14 = vcombine.low %v591_v11, %v592_v12  ;;  %v768_v15 = vadd.bf16 %v591_v11, %v587_v6  ;;  %v769_v16 = vadd.bf16 %v592_v12, %v588_v7  ;;  %v594_v19 = vld [vmem:[%s4093_s19 + $0xc] sm:$0xf]  ;;  %v2495_v23 = vcombine.low %v772_v5, %v773_v9  ;;  %v599_v2 = vld [vmem:[#allocation8] sm:$0xf]  ;;  %v602_v4 = vld [vmem:[#allocation10] sm:$0xf]  ;;  %s3943_s16 = scalar_lea.hbm %s4096_s10, %s4053_s3 }
 0x103   : > { %2664 = vmatpush3.bf16.msra.mxu0 %v2485_v3  ;;  %v3700_v21 = vcombine.low %v593_v18, %v594_v19  ;;  %2665 = vmatprep.mubr.msk.bf16.mxu0 %vm641_vm0, %v3676_v10  ;;  %v770_v24 = vadd.bf16 %v593_v18, %v589_v13  ;;  %v771_v25 = vadd.bf16 %v594_v19, %v590_v17  ;;  %v600_v3 = vld [vmem:[#allocation8 + $0x4] sm:$0xf]  ;;  %v603_v6 = vld [vmem:[#allocation10 + $0x4] sm:$0xf]  ;;  %v3751_v19 = vld [vmem:[#allocation13 + $0x10] sm:$0xff]  ;;  %s3172_s2 = sshll.u32 %s3291_s1, 4  ;;  %s3173_s2 = int_to_ptr.vmem [resolvable:$false] %s3172_s2 }
 0x104   : > { %v3704_v22 = vcombine.low %v768_v15, %v769_v16  ;;  %2671 = vmatprep.mubr.msk.bf16.mxu1 %vm641_vm0, %v3687_v14  ;;  %2675 = vmatprep.subr.bf16.mxu0 %v2495_v23  ;;  %v3736_v5 = vcombine.low %v599_v2, %v600_v3  ;;  %v3738_v7 = vcombine.low %v602_v4, %v603_v6  ;;  %v3749_v18 = vld [vmem:[%s4094_s13 + $0x10] sm:$0xff]  ;;  %v3763_v32 = vld [vmem:[%s4094_s13 + $0x18] sm:$0xff]  ;;  %s3174_s24 = scalar_lea.vmem %s3173_s2, 1536 }
 0x105   : > { %2672 = vmatmul.mubr.msk.bf16.vlgmr.msra.gmra.mrb[0].mxu1 %vm641_vm0, %v3700_v21  ;;  %v3714_v26 = vcombine.low %v770_v24, %v771_v25  ;;  %v1213_v8 = vadd.bf16 %v602_v4, %v599_v2  ;;  %v1214_v9 = vadd.bf16 %v603_v6, %v600_v3  ;;  %v3756_v25 = vld [vmem:[%s4094_s13] sm:$0xff] }
 0x106   : > { %2666 = vmatmul.mubr.msk.bf16.vlgmr.msra.gmra.mrb[0].mxu0 %vm641_vm0, %v3698_v20  ;;  %2682 = vmatpush3.bf16.msra.mxu1 %v3718_v29 }
 0x107   : > { %2676 = vmatpush3.bf16.msra.mxu0 %v2495_v23  ;;  %2677 = vmatprep.mubr.msk.bf16.mxu0 %vm641_vm0, %v3704_v22  ;;  %v3744_v11 = vcombine.low %v1213_v8, %v1214_v9 }
 0x108   : > { %2687 = vmatprep.subr.bf16.mxu0 %v3722_v34  ;;  %2693 = vmatprep.subr.bf16.mxu1 %v3724_v35 }
 0x10e   : > { %2678 = vmatmul.mubr.msk.bf16.vlgmr.msra.gmra.mrb[4].mxu0 %vm641_vm0, %v3714_v26 }
 0x10f   : > { %2688 = vmatpush3.bf16.msra.mxu0 %v3722_v34 }
 0x1d8   : > { %v2673_v37 = vpop.f32.mrb[0].mxu1 }
 0x1d9   : > { %v2667_v36 = vpop.f32.mrb[0].mxu0  ;;  %v753_v40 = vpop.f32.mrb[1].mxu1 }
 0x1da   : > { %v682_v38 = vpop.f32.mrb[1].mxu0  ;;  %v847_v39 = vsub.f32 %v2667_v36, %v2673_v37  ;;  %v2674_v43 = vpop.f32.mrb[2].mxu1 }
 0x1db   : > { %v2668_v41 = vpop.f32.mrb[2].mxu0  ;;  %v845_v42 = vsub.f32 %v682_v38, %v753_v40  ;;  %v756_v46 = vpop.f32.mrb[3].mxu1 }
 0x1dc   : > { %v685_v44 = vpop.f32.mrb[3].mxu0  ;;  %v848_v45 = vsub.f32 %v2668_v41, %v2674_v43 }
 0x1dd   : > { %v846_v47 = vsub.f32 %v685_v44, %v756_v46 }
 0x1de   : > { %v858_v48 = vpack.c.bf16 %v848_v45, %v847_v39 }
 0x1df   : > { %v857_v49 = vpack.c.bf16 %v846_v47, %v845_v42  ;;  %v3772_v42 = vld [vmem:[%s4094_s13 + $0x8] sm:$0xff] }
 0x1e1   : > { %v2679_v50 = vpop.f32.mrb[4].mxu0  ;;  %2683 = vmatprep.mubr.msk.bf16.mxu1 %vm641_vm0, %v857_v49 }
 0x1e2   : > { %v851_v51 = vsub.f32 %v2679_v50, %v2667_v36  ;;  %v830_v52 = vpop.f32.mrb[5].mxu0  ;;  %2684 = vmatmul.mubr.msk.bf16.vlgmr.msra.gmra.mrb[4].mxu1 %vm641_vm0, %v858_v48 }
 0x1e3   : > { %v849_v53 = vsub.f32 %v830_v52, %v682_v38  ;;  %v2680_v54 = vpop.f32.mrb[6].mxu0  ;;  %2694 = vmatpush3.bf16.msra.mxu1 %v3724_v35 }
 0x1e4   : > { %v855_v55 = vsub.f32 %v851_v51, %v2673_v37  ;;  %v852_v56 = vsub.f32 %v2680_v54, %v2668_v41  ;;  %v833_v57 = vpop.f32.mrb[7].mxu0 }
 0x1e5   : > { %v853_v58 = vsub.f32 %v849_v53, %v753_v40  ;;  %v850_v59 = vsub.f32 %v833_v57, %v685_v44 }
 0x1e6   : > { %v856_v60 = vsub.f32 %v852_v56, %v2674_v43 }
 0x1e7   : > { %v854_v61 = vsub.f32 %v850_v59, %v756_v46 }
 0x1e8   : > { %v860_v62 = vpack.c.bf16 %v856_v60, %v855_v55 }
 0x1e9   : > { %v859_v63 = vpack.c.bf16 %v854_v61, %v853_v58 }
 0x1ea   : > { %v984_v0 = vadd.bf16 %v860_v62, %v858_v48 }
 0x1eb   : > { %v983_v1 = vadd.bf16 %v859_v63, %v857_v49  ;;  %2689 = vmatprep.mubr.msk.bf16.mxu0 %vm641_vm0, %v859_v63  ;;  %v3776_v49 = vld [vmem:[#allocation13 + $0x8] sm:$0xff] }
 0x1ec   : > { %2690 = vmatmul.mubr.msk.bf16.vlgmr.msra.gmra.mrb[8].mxu0 %vm641_vm0, %v860_v62 }
 0x1ed   : > { %2695 = vmatprep.mubr.msk.bf16.mxu1 %vm641_vm0, %v983_v1  ;;  %2703 = vmatprep.mubr.msk.bf16.mxu0 %vm1096_vm1, %v3736_v5 }
 0x1ee   : > { %2696 = vmatmul.mubr.msk.bf16.vlgmr.msra.gmra.mrb[8].mxu1 %vm641_vm0, %v984_v0 }
 0x1ef   : > { %2711 = vmatprep.mubr.msk.bf16.mxu1 %vm1096_vm1, %v3738_v7 }
 0x2b5   : > { %v2685_v12 = vpop.f32.mrb[4].mxu1 }
 0x2b6   : > { %v907_v13 = vpop.f32.mrb[5].mxu1 }
 0x2b7   : > { %v2686_v15 = vpop.f32.mrb[6].mxu1 }
 0x2b8   : > { %v910_v16 = vpop.f32.mrb[7].mxu1 }
 0x2bf   : > { %v2691_v17 = vpop.f32.mrb[8].mxu0 }
 0x2c0   : > { %v1050_v23 = vsub.f32 %v2685_v12, %v2691_v17  ;;  %v968_v24 = vpop.f32.mrb[9].mxu0 }
 0x2c1   : > { %v1048_v28 = vsub.f32 %v907_v13, %v968_v24  ;;  %v2692_v30 = vpop.f32.mrb[10].mxu0  ;;  %v2697_v31 = vpop.f32.mrb[8].mxu1 }
 0x2c2   : > { %v1051_v36 = vsub.f32 %v2686_v15, %v2692_v30  ;;  %v1054_v37 = vsub.f32 %v2697_v31, %v2685_v12  ;;  %v971_v38 = vpop.f32.mrb[11].mxu0  ;;  %v1033_v39 = vpop.f32.mrb[9].mxu1  ;;  %v1062_v40 = vmul.f32 %v1050_v23, %v3749_v18  ;;  %v1078_v41 = vmul.f32 %v1050_v23, %v3751_v19 }
 0x2c3   : > { %v1049_v43 = vsub.f32 %v910_v16, %v971_v38  ;;  %v1052_v44 = vsub.f32 %v1033_v39, %v907_v13  ;;  %v2698_v45 = vpop.f32.mrb[10].mxu1  ;;  %v1060_v46 = vmul.f32 %v1048_v28, %v3756_v25  ;;  %v1076_v47 = vmul.f32 %v1048_v28, %v3758_v27 }
 0x2c4   : > { %v1058_v48 = vsub.f32 %v1054_v37, %v2691_v17  ;;  %v1055_v50 = vsub.f32 %v2698_v45, %v2686_v15  ;;  %v1036_v51 = vpop.f32.mrb[11].mxu1  ;;  %v1063_v52 = vmul.f32 %v1051_v36, %v3763_v32  ;;  %v1079_v53 = vmul.f32 %v1051_v36, %v3765_v33  ;;  %v601_v36 = vld [vmem:[#allocation8 + $0x8] sm:$0xf]  ;;  %v604_v37 = vld [vmem:[#allocation10 + $0x8] sm:$0xf] }
 0x2c5   : > { %v1056_v54 = vsub.f32 %v1052_v44, %v968_v24  ;;  %v1053_v55 = vsub.f32 %v1036_v51, %v910_v16  ;;  %v1061_v58 = vmul.f32 %v1049_v43, %v3772_v42  ;;  %v1077_v60 = vmul.f32 %v1049_v43, %v3776_v49  ;;  %v605_v43 = vld [vmem:[#allocation11] sm:$0xf]  ;;  %v606_v44 = vld [vmem:[#allocation11 + $0x4] sm:$0xf]  ;;  %v610_v51 = vld [vmem:[%s4095_s22 + $0x4] sm:$0xf] }
 0x2c6   : > { %v1066_v56 = vmul.f32 %v1058_v48, %v3751_v19  ;;  %v1074_v57 = vmul.f32 %v1058_v48, %v3749_v18  ;;  %v1059_v59 = vsub.f32 %v1055_v50, %v2692_v30  ;;  %v3792_v39 = vcombine.low %v604_v37, %v604_v37  ;;  %v609_v50 = vld [vmem:[%s4095_s22] sm:$0xf] }
 0x2c7   : > { %v1064_v61 = vmul.f32 %v1056_v54, %v3758_v27  ;;  %v1072_v62 = vmul.f32 %v1056_v54, %v3756_v25  ;;  %v1057_v63 = vsub.f32 %v1053_v55, %v971_v38  ;;  %v3790_v38 = vcombine.low %v601_v36, %v601_v36 }
 0x2c8   : > { %v1067_v0 = vmul.f32 %v1059_v59, %v3765_v33  ;;  %v1075_v1 = vmul.f32 %v1059_v59, %v3763_v32  ;;  %v1070_v2 = vsub.f32 %v1062_v40, %v1066_v56  ;;  %v1082_v3 = vadd.f32 %v1078_v41, %v1074_v57  ;;  %v611_v56 = vld [vmem:[%s4095_s22 + $0x8] sm:$0xf]  ;;  %v612_v57 = vld [vmem:[%s4095_s22 + $0xc] sm:$0xf] }
 0x2c9   : > { %v1065_v4 = vmul.f32 %v1057_v63, %v3776_v49  ;;  %v1073_v6 = vmul.f32 %v1057_v63, %v3772_v42  ;;  %v1068_v8 = vsub.f32 %v1060_v46, %v1064_v61  ;;  %v1080_v9 = vadd.f32 %v1076_v47, %v1072_v62  ;;  %v607_v46 = vld [vmem:[#allocation11 + $0x8] sm:$0xf]  ;;  %v608_v47 = vld [vmem:[#allocation11 + $0xc] sm:$0xf]  ;;  %v2531_v62 = vld [vmem:[%s3664_s20 + $0x8] sm:$0xf] }
 0x2ca   : > { %v1071_v12 = vsub.f32 %v1063_v52, %v1067_v0  ;;  %v1083_v13 = vadd.f32 %v1079_v53, %v1075_v1  ;;  %v1215_v40 = vadd.bf16 %v604_v37, %v601_v36  ;;  %v3804_v45 = vcombine.low %v605_v43, %v606_v44  ;;  %v2532_v63 = vld [vmem:[%s3664_s20 + $0xc] sm:$0xf]  ;;  %v2533_v1 = vld [vmem:[%s3642_s23 + $0x8] sm:$0xf] }
 0x2cb   : > { %v1069_v15 = vsub.f32 %v1061_v58, %v1065_v4  ;;  %v1081_v16 = vadd.f32 %v1077_v60, %v1073_v6  ;;  %v3808_v48 = vcombine.low %v607_v46, %v608_v47  ;;  %v3818_v52 = vcombine.low %v609_v50, %v610_v51 }
 0x2cc   : > { %v1085_v17 = vpack.c.bf16 %v1071_v12, %v1070_v2  ;;  %v1087_v23 = vpack.c.bf16 %v1083_v13, %v1082_v3  ;;  %v3800_v41 = vcombine.low %v1215_v40, %v1215_v40  ;;  %v1427_v53 = vadd.bf16 %v609_v50, %v605_v43  ;;  %v2534_v2 = vld [vmem:[%s3642_s23 + $0xc] sm:$0xf]  ;;  %s2831_s23 = smul.u32 48, %s3638_s18 }
 0x2cd   : > { %v1084_v24 = vpack.c.bf16 %v1069_v15, %v1068_v8  ;;  %v1086_v28 = vpack.c.bf16 %v1081_v16, %v1080_v9  ;;  %v1428_v54 = vadd.bf16 %v610_v51, %v606_v44  ;;  %v3831_v58 = vcombine.low %v611_v56, %v612_v57 }
 0x2ce   : > { %v1217_v30 = vadd.bf16 %v1087_v23, %v1085_v17  ;;  %v1429_v59 = vadd.bf16 %v611_v56, %v607_v46  ;;  %v1430_v60 = vadd.bf16 %v612_v57, %v608_v47  ;;  %v2535_v0 = vcombine.low %v2531_v62, %v2532_v63  ;;  %s3868_s20 = scalar_lea.vmem [#allocation14], %s2831_s23  ;;  %s3873_s4 = scalar_lea.vmem [#allocation15], %s2831_s23 }
 0x2cf   : > { %2699 = vmatprep.subr.bf16.mxu0 %v1084_v24  ;;  %2707 = vmatprep.subr.bf16.mxu1 %v1086_v28  ;;  %v1216_v31 = vadd.bf16 %v1086_v28, %v1084_v24  ;;  %v3821_v55 = vcombine.low %v1427_v53, %v1428_v54  ;;  %v1628_v3 = vadd.bf16 %v2533_v1, %v2531_v62  ;;  %s2268_s15 = sshll.u32 %s3868_s20, 4  ;;  %s2285_s12 = sshll.u32 %s3873_s4, 4  ;;  %s3933_s15 = int_to_ptr.vmem [resolvable:$true] %s2268_s15  ;;  %s3945_s12 = int_to_ptr.vmem [resolvable:$true] %s2285_s12 }
 0x2d0   : > { %2700 = vmatpush3.bf16.msra.mxu0 %v1084_v24  ;;  %2708 = vmatpush3.bf16.msra.mxu1 %v1086_v28  ;;  %v3834_v61 = vcombine.low %v1429_v59, %v1430_v60  ;;  %v1629_v4 = vadd.bf16 %v2534_v2, %v2532_v63  ;;  %v2538_v51 = vcombine.low %v2533_v1, %v2534_v2  ;;  %s3168_s0 = scalar_lea.vmem %s3933_s15, 768  ;;  %p3175_p0 = scmp.lt.s32.totalorder %s3933_s15, %s3173_s2 }
 0x2d1   : > { %2701 = vmatprep.subr.bf16.mxu0 %v1085_v17  ;;  %2709 = vmatprep.subr.bf16.mxu1 %v1087_v23  ;;  %p3169_p9 = scmp.ne.s32.totalorder %s3933_s15, %s3168_s0  ;;  %p3176_p2 = scmp.lt.s32.totalorder %s3174_s24, %s3168_s0 }
 0x2d2   : > { %v2541_v6 = vcombine.low %v1628_v3, %v1629_v4 }
 0x2d3   : > { %p3170_p1 = pnand %p3169_p9, %p4097_p12  ;;  %p3177_p8 = por %p3176_p2, %p3175_p0 }
 0x2d4   : > { %2702 = vmatpush3.bf16.msra.mxu0 %v1085_v17  ;;  %2710 = vmatpush3.bf16.msra.mxu1 %v1087_v23 }
 0x2d5   : > { %2715 = vmatprep.subr.bf16.mxu0 %v1216_v31  ;;  %2723 = vmatprep.subr.bf16.mxu1 %v3804_v45  ;;  %p3171_p13 = pneg %p3170_p1 }
 0x2d7   : > { %2704 = vmatmul.mubr.msk.bf16.vlgmr.msra.gmra.mrb[12].mxu0 %vm1096_vm1, %v3790_v38  ;;  %2712 = vmatmul.mubr.msk.bf16.vlgmr.msra.gmra.mrb[12].mxu1 %vm1096_vm1, %v3792_v39  ;;  %p3178_p4 = pnand %p3177_p8, %p3171_p13 }
 0x2d8   : > { %2716 = vmatpush3.bf16.msra.mxu0 %v1216_v31  ;;  %2719 = vmatprep.mubr.msk.bf16.mxu0 %vm1096_vm1, %v3744_v11 }
 0x2d9   : > { %2717 = vmatprep.subr.bf16.mxu0 %v1217_v30  ;;  %2724 = vmatpush3.bf16.msra.mxu1 %v3804_v45 }
 0x2da   : > { %2725 = vmatprep.subr.bf16.mxu1 %v3808_v48 }
 0x2dc   : > { %2718 = vmatpush3.bf16.msra.mxu0 %v1217_v30 }
 0x2dd   : > { %2726 = vmatpush3.bf16.msra.mxu1 %v3808_v48  ;;  %2731 = vmatprep.subr.bf16.mxu0 %v3818_v52 }
 0x2de   : > { %2739 = vmatprep.subr.bf16.mxu1 %v3821_v55 }
 0x2df   : > { %2720 = vmatmul.mubr.msk.bf16.vlgmr.msra.gmra.mrb[16].mxu0 %vm1096_vm1, %v3800_v41 }
 0x2e0   : > { %2732 = vmatpush3.bf16.msra.mxu0 %v3818_v52 }
 0x2e1   : > { %2733 = vmatprep.subr.bf16.mxu0 %v3831_v58 }
 0x2e4   : > { %2734 = vmatpush3.bf16.msra.mxu0 %v3831_v58 }
 0x2e5   : > { %2747 = vmatprep.subr.bf16.mxu0 %v2535_v0 }
 0x3aa   : > { %v2705_v8 = vpop.f32.mrb[12].mxu0  ;;  %v2713_v9 = vpop.f32.mrb[12].mxu1 }
 0x3ab   : > { %v1282_v12 = vsub.f32 %v2705_v8, %v2713_v9  ;;  %v1137_v13 = vpop.f32.mrb[13].mxu0  ;;  %v1199_v15 = vpop.f32.mrb[13].mxu1 }
 0x3ac   : > { %v1280_v16 = vsub.f32 %v1137_v13, %v1199_v15  ;;  %v2706_v17 = vpop.f32.mrb[14].mxu0  ;;  %v2714_v23 = vpop.f32.mrb[14].mxu1 }
 0x3ad   : > { %v1140_v24 = vpop.f32.mrb[15].mxu0  ;;  %v1202_v28 = vpop.f32.mrb[15].mxu1  ;;  %v1290_v36 = vpack.c.bf16 %v1282_v12, %v1282_v12 }
 0x3ae   : > { %v1281_v30 = vsub.f32 %v1140_v24, %v1202_v28 }
 0x3b0   : > { %v1289_v31 = vpack.c.bf16 %v1281_v30, %v1280_v16 }
 0x3b2   : > { %v2721_v37 = vpop.f32.mrb[16].mxu0  ;;  %2727 = vmatprep.mubr.msk.bf16.mxu1 %vm1096_vm1, %v1289_v31 }
 0x3b3   : > { %v1285_v40 = vsub.f32 %v2721_v37, %v2705_v8  ;;  %v1266_v43 = vpop.f32.mrb[17].mxu0  ;;  %2728 = vmatmul.mubr.msk.bf16.vlgmr.msra.gmra.mrb[16].mxu1 %vm1096_vm1, %v1290_v36 }
 0x3b4   : > { %v1283_v44 = vsub.f32 %v1266_v43, %v1137_v13  ;;  %v2722_v46 = vpop.f32.mrb[18].mxu0  ;;  %2740 = vmatpush3.bf16.msra.mxu1 %v3821_v55 }
 0x3b5   : > { %v1288_v47 = vsub.f32 %v1285_v40, %v2713_v9  ;;  %v1269_v50 = vpop.f32.mrb[19].mxu0  ;;  %2741 = vmatprep.subr.bf16.mxu1 %v3834_v61 }
 0x3b6   : > { %v1286_v53 = vsub.f32 %v1283_v44, %v1199_v15  ;;  %v1284_v54 = vsub.f32 %v1269_v50, %v1140_v24 }
 0x3b7   : > { %v1292_v56 = vpack.c.bf16 %v1288_v47, %v1288_v47 }
 0x3b8   : > { %v1287_v57 = vsub.f32 %v1284_v54, %v1202_v28  ;;  %2742 = vmatpush3.bf16.msra.mxu1 %v3834_v61 }
 0x3b9   : > { %v1426_v59 = vadd.bf16 %v1292_v56, %v1290_v36  ;;  %2753 = vmatprep.subr.bf16.mxu1 %v2538_v51 }
 0x3ba   : > { %v1291_v60 = vpack.c.bf16 %v1287_v57, %v1286_v53 }
 0x3bc   : > { %v1425_v62 = vadd.bf16 %v1291_v60, %v1289_v31  ;;  %2735 = vmatprep.mubr.msk.bf16.mxu0 %vm1096_vm1, %v1291_v60 }
 0x3bd   : > { %2736 = vmatmul.mubr.msk.bf16.vlgmr.msra.gmra.mrb[20].mxu0 %vm1096_vm1, %v1292_v56 }
 0x3be   : > { %2743 = vmatprep.mubr.msk.bf16.mxu1 %vm1096_vm1, %v1425_v62  ;;  %2748 = vmatpush3.bf16.msra.mxu0 %v2535_v0 }
 0x3bf   : > { %2744 = vmatmul.mubr.msk.bf16.vlgmr.msra.gmra.mrb[20].mxu1 %vm1096_vm1, %v1426_v59  ;;  %2749 = vmatprep.mubr.msk.bf16.mxu0 %vm641_vm0, %v3676_v10 }
 0x3c0   : > { %2754 = vmatpush3.bf16.msra.mxu1 %v2538_v51  ;;  %2759 = vmatprep.subr.bf16.mxu0 %v2541_v6 }
 0x3c1   : > { %2755 = vmatprep.mubr.msk.bf16.mxu1 %vm641_vm0, %v3687_v14  ;;  %2765 = vmatprep.subr.bf16.mxu1 %v3718_v29 }
 0x3c5   : > { %2750 = vmatmul.mubr.msk.bf16.vlgmr.msra.gmra.mrb[24].mxu0 %vm641_vm0, %v3698_v20 }
 0x3c6   : > { %2760 = vmatpush3.bf16.msra.mxu0 %v2541_v6  ;;  %2761 = vmatprep.mubr.msk.bf16.mxu0 %vm641_vm0, %v3704_v22 }
 0x3c7   : > { %2756 = vmatmul.mubr.msk.bf16.vlgmr.msra.gmra.mrb[24].mxu1 %vm641_vm0, %v3700_v21  ;;  %2771 = vmatprep.subr.bf16.mxu0 %v3722_v34 }
 0x3c8   : > { %2766 = vmatpush3.bf16.msra.mxu1 %v3718_v29 }
 0x3c9   : > { %2777 = vmatprep.subr.bf16.mxu1 %v3724_v35 }
 0x3cd   : > { %2762 = vmatmul.mubr.msk.bf16.vlgmr.msra.gmra.mrb[28].mxu0 %vm641_vm0, %v3714_v26 }
 0x3ce   : > { %2772 = vmatpush3.bf16.msra.mxu0 %v3722_v34 }
 0x486   : > { %v2729_v10 = vpop.f32.mrb[16].mxu1 }
 0x487   : > { %v1345_v14 = vpop.f32.mrb[17].mxu1 }
 0x488   : > { %v2730_v20 = vpop.f32.mrb[18].mxu1 }
 0x489   : > { %v1348_v63 = vpop.f32.mrb[19].mxu1 }
 0x490   : > { %v2737_v22 = vpop.f32.mrb[20].mxu0 }
 0x491   : > { %v1499_v0 = vsub.f32 %v2729_v10, %v2737_v22  ;;  %v1411_v1 = vpop.f32.mrb[21].mxu0 }
 0x492   : > { %v1497_v21 = vsub.f32 %v1345_v14, %v1411_v1  ;;  %v2738_v2 = vpop.f32.mrb[22].mxu0  ;;  %v2745_v3 = vpop.f32.mrb[20].mxu1 }
 0x493   : > { %1508 = vst [vmem:[%s3868_s20 + $0x10] sm:$0xff] %v1499_v0  ;;  %v1502_v26 = vsub.f32 %v2745_v3, %v2729_v10  ;;  %v1414_v29 = vpop.f32.mrb[23].mxu0  ;;  %v1483_v34 = vpop.f32.mrb[21].mxu1 }
 0x494   : > { %1506 = vst [vmem:[%s3868_s20] sm:$0xff] %v1497_v21  ;;  %v1498_v4 = vsub.f32 %v1348_v63, %v1414_v29  ;;  %v1500_v6 = vsub.f32 %v1483_v34, %v1345_v14  ;;  %v2746_v8 = vpop.f32.mrb[22].mxu1 }
 0x495   : > { %v1505_v9 = vsub.f32 %v1502_v26, %v2737_v22  ;;  %v1486_v12 = vpop.f32.mrb[23].mxu1 }
 0x496   : > { %1507 = vst [vmem:[%s3868_s20 + $0x8] sm:$0xff] %v1498_v4  ;;  %v1503_v13 = vsub.f32 %v1500_v6, %v1411_v1  ;;  %v1501_v15 = vsub.f32 %v1486_v12, %v1348_v63 }
 0x497   : > { %1511 = vst [vmem:[%s3873_s4 + $0x10] sm:$0xff] %v1505_v9 }
 0x498   : > { %1509 = vst [vmem:[%s3873_s4] sm:$0xff] %v1503_v13  ;;  %v1504_v16 = vsub.f32 %v1501_v15, %v1414_v29  ;;  %v2751_v17 = vpop.f32.mrb[24].mxu0 }
 0x499   : > { %v1558_v23 = vpop.f32.mrb[25].mxu0 }
 0x49a   : > { %1510 = vst [vmem:[%s3873_s4 + $0x8] sm:$0xff] %v1504_v16  ;;  %v2752_v24 = vpop.f32.mrb[26].mxu0  ;;  %v2757_v28 = vpop.f32.mrb[24].mxu1 }
 0x49b   : > { %v1687_v30 = vsub.f32 %v2751_v17, %v2757_v28  ;;  %v1561_v31 = vpop.f32.mrb[27].mxu0  ;;  %v1613_v36 = vpop.f32.mrb[25].mxu1 }
 0x49c   : > { %v1685_v37 = vsub.f32 %v1558_v23, %v1613_v36  ;;  %v2758_v40 = vpop.f32.mrb[26].mxu1 }
 0x49d   : > { %v1688_v43 = vsub.f32 %v2752_v24, %v2758_v40  ;;  %v1616_v44 = vpop.f32.mrb[27].mxu1 }
 0x49e   : > { %v1686_v46 = vsub.f32 %v1561_v31, %v1616_v44 }
 0x49f   : > { %v1698_v47 = vpack.c.bf16 %v1688_v43, %v1687_v30 }
 0x4a0   : > { %v1697_v50 = vpack.c.bf16 %v1686_v46, %v1685_v37  ;;  %v2763_v51 = vpop.f32.mrb[28].mxu0 }
 0x4a1   : > { %v1691_v53 = vsub.f32 %v2763_v51, %v2751_v17  ;;  %v1670_v54 = vpop.f32.mrb[29].mxu0 }
 0x4a2   : > { %v1689_v56 = vsub.f32 %v1670_v54, %v1558_v23  ;;  %v2764_v57 = vpop.f32.mrb[30].mxu0  ;;  %2767 = vmatprep.mubr.msk.bf16.mxu1 %vm641_vm0, %v1697_v50 }
 0x4a3   : > { %v1695_v59 = vsub.f32 %v1691_v53, %v2757_v28  ;;  %v1692_v60 = vsub.f32 %v2764_v57, %v2752_v24  ;;  %v1673_v62 = vpop.f32.mrb[31].mxu0  ;;  %2768 = vmatmul.mubr.msk.bf16.vlgmr.msra.gmra.mrb[28].mxu1 %vm641_vm0, %v1698_v47 }
 0x4a4   : > { %v1693_v10 = vsub.f32 %v1689_v56, %v1613_v36  ;;  %v1690_v14 = vsub.f32 %v1673_v62, %v1561_v31  ;;  %2778 = vmatpush3.bf16.msra.mxu1 %v3724_v35 }
 0x4a5   : > { %v1696_v20 = vsub.f32 %v1692_v60, %v2758_v40 }
 0x4a6   : > { %v1694_v63 = vsub.f32 %v1690_v14, %v1616_v44 }
 0x4a7   : > { %v1700_v22 = vpack.c.bf16 %v1696_v20, %v1695_v59 }
 0x4a8   : > { %v1699_v0 = vpack.c.bf16 %v1694_v63, %v1693_v10 }
 0x4a9   : > { %v1812_v1 = vadd.bf16 %v1700_v22, %v1698_v47 }
 0x4aa   : > { %v1811_v21 = vadd.bf16 %v1699_v0, %v1697_v50  ;;  %2773 = vmatprep.mubr.msk.bf16.mxu0 %vm641_vm0, %v1699_v0 }
 0x4ab   : > { %2774 = vmatmul.mubr.msk.bf16.vlgmr.msra.gmra.mrb[32].mxu0 %vm641_vm0, %v1700_v22 }
 0x4ac   : > { %2779 = vmatprep.mubr.msk.bf16.mxu1 %vm641_vm0, %v1811_v21  ;;  %2787 = vmatprep.mubr.msk.bf16.mxu0 %vm1096_vm1, %v3736_v5 }
 0x4ad   : > { %2780 = vmatmul.mubr.msk.bf16.vlgmr.msra.gmra.mrb[32].mxu1 %vm641_vm0, %v1812_v1 }
 0x4ae   : > { %2795 = vmatprep.mubr.msk.bf16.mxu1 %vm1096_vm1, %v3738_v7 }
 0x576   : > { %v2769_v35 = vpop.f32.mrb[28].mxu1 }
 0x577   : > { %v1741_v2 = vpop.f32.mrb[29].mxu1 }
 0x578   : > { %v2770_v3 = vpop.f32.mrb[30].mxu1 }
 0x579   : > { %v1744_v26 = vpop.f32.mrb[31].mxu1 }
 0x57e   : > { %v2775_v29 = vpop.f32.mrb[32].mxu0 }
 0x57f   : > { %v1870_v34 = vsub.f32 %v2769_v35, %v2775_v29  ;;  %v1796_v4 = vpop.f32.mrb[33].mxu0 }
 0x580   : > { %v1868_v6 = vsub.f32 %v1741_v2, %v1796_v4  ;;  %v2776_v8 = vpop.f32.mrb[34].mxu0  ;;  %v2781_v9 = vpop.f32.mrb[32].mxu1 }
 0x581   : > { %v1871_v12 = vsub.f32 %v2770_v3, %v2776_v8  ;;  %v1874_v13 = vsub.f32 %v2781_v9, %v2769_v35  ;;  %v1799_v15 = vpop.f32.mrb[35].mxu0  ;;  %v1853_v16 = vpop.f32.mrb[33].mxu1  ;;  %v1882_v5 = vmul.f32 %v1870_v34, %v3749_v18  ;;  %v1898_v17 = vmul.f32 %v1870_v34, %v3751_v19 }
 0x582   : > { %v1869_v23 = vsub.f32 %v1744_v26, %v1799_v15  ;;  %v1872_v7 = vsub.f32 %v1853_v16, %v1741_v2  ;;  %v2782_v24 = vpop.f32.mrb[34].mxu1  ;;  %v1880_v28 = vmul.f32 %v1868_v6, %v3756_v25  ;;  %v1896_v30 = vmul.f32 %v1868_v6, %v3758_v27 }
 0x583   : > { %v1878_v31 = vsub.f32 %v1874_v13, %v2775_v29  ;;  %v1875_v36 = vsub.f32 %v2782_v24, %v2770_v3  ;;  %v1856_v37 = vpop.f32.mrb[35].mxu1  ;;  %v1883_v40 = vmul.f32 %v1871_v12, %v3763_v32  ;;  %v1899_v43 = vmul.f32 %v1871_v12, %v3765_v33 }
 0x584   : > { %v1876_v44 = vsub.f32 %v1872_v7, %v1796_v4  ;;  %v1873_v46 = vsub.f32 %v1856_v37, %v1744_v26  ;;  %v1881_v51 = vmul.f32 %v1869_v23, %v3772_v42  ;;  %v1897_v54 = vmul.f32 %v1869_v23, %v3776_v49 }
 0x585   : > { %v1886_v47 = vmul.f32 %v1878_v31, %v3751_v19  ;;  %v1894_v50 = vmul.f32 %v1878_v31, %v3749_v18  ;;  %v1879_v53 = vsub.f32 %v1875_v36, %v2776_v8 }
 0x586   : > { %v1884_v56 = vmul.f32 %v1876_v44, %v3758_v27  ;;  %v1892_v57 = vmul.f32 %v1876_v44, %v3756_v25  ;;  %v1877_v59 = vsub.f32 %v1873_v46, %v1799_v15 }
 0x587   : > { %v1887_v60 = vmul.f32 %v1879_v53, %v3765_v33  ;;  %v1895_v62 = vmul.f32 %v1879_v53, %v3763_v32  ;;  %v1890_v10 = vsub.f32 %v1882_v5, %v1886_v47  ;;  %v1902_v14 = vadd.f32 %v1898_v17, %v1894_v50 }
 0x588   : > { %v1885_v19 = vmul.f32 %v1877_v59, %v3776_v49  ;;  %v1893_v18 = vmul.f32 %v1877_v59, %v3772_v42  ;;  %v1888_v20 = vsub.f32 %v1880_v28, %v1884_v56  ;;  %v1900_v63 = vadd.f32 %v1896_v30, %v1892_v57 }
 0x589   : > { %v1891_v22 = vsub.f32 %v1883_v40, %v1887_v60  ;;  %v1903_v0 = vadd.f32 %v1899_v43, %v1895_v62 }
 0x58a   : > { %v1889_v1 = vsub.f32 %v1881_v51, %v1885_v19  ;;  %v1901_v21 = vadd.f32 %v1897_v54, %v1893_v18 }
 0x58b   : > { %v1905_v27 = vpack.c.bf16 %v1891_v22, %v1890_v10  ;;  %v1907_v35 = vpack.c.bf16 %v1903_v0, %v1902_v14 }
 0x58c   : > { %v1904_v25 = vpack.c.bf16 %v1889_v1, %v1888_v20  ;;  %v1906_v2 = vpack.c.bf16 %v1901_v21, %v1900_v63 }
 0x58d   : > { %v2005_v3 = vadd.bf16 %v1907_v35, %v1905_v27 }
 0x58e   : > { %2783 = vmatprep.subr.bf16.mxu0 %v1904_v25  ;;  %2791 = vmatprep.subr.bf16.mxu1 %v1906_v2  ;;  %v2004_v32 = vadd.bf16 %v1906_v2, %v1904_v25 }
 0x58f   : > { %2784 = vmatpush3.bf16.msra.mxu0 %v1904_v25  ;;  %2792 = vmatpush3.bf16.msra.mxu1 %v1906_v2 }
 0x590   : > { %2785 = vmatprep.subr.bf16.mxu0 %v1905_v27  ;;  %2793 = vmatprep.subr.bf16.mxu1 %v1907_v35 }
 0x593   : > { %2786 = vmatpush3.bf16.msra.mxu0 %v1905_v27  ;;  %2794 = vmatpush3.bf16.msra.mxu1 %v1907_v35 }
 0x594   : > { %2799 = vmatprep.subr.bf16.mxu0 %v2004_v32  ;;  %2807 = vmatprep.subr.bf16.mxu1 %v3804_v45 }
 0x596   : > { %2788 = vmatmul.mubr.msk.bf16.vlgmr.msra.gmra.mrb[36].mxu0 %vm1096_vm1, %v3790_v38  ;;  %2796 = vmatmul.mubr.msk.bf16.vlgmr.msra.gmra.mrb[36].mxu1 %vm1096_vm1, %v3792_v39 }
 0x597   : > { %2800 = vmatpush3.bf16.msra.mxu0 %v2004_v32  ;;  %2803 = vmatprep.mubr.msk.bf16.mxu0 %vm1096_vm1, %v3744_v11 }
 0x598   : > { %2801 = vmatprep.subr.bf16.mxu0 %v2005_v3  ;;  %2808 = vmatpush3.bf16.msra.mxu1 %v3804_v45 }
 0x599   : > { %2809 = vmatprep.subr.bf16.mxu1 %v3808_v48 }
 0x59b   : > { %2802 = vmatpush3.bf16.msra.mxu0 %v2005_v3 }
 0x59c   : > { %2810 = vmatpush3.bf16.msra.mxu1 %v3808_v48  ;;  %2815 = vmatprep.subr.bf16.mxu0 %v3818_v52 }
 0x59d   : > { %2823 = vmatprep.subr.bf16.mxu1 %v3821_v55 }
 0x59e   : > { %2804 = vmatmul.mubr.msk.bf16.vlgmr.msra.gmra.mrb[40].mxu0 %vm1096_vm1, %v3800_v41 }
 0x59f   : > { %2816 = vmatpush3.bf16.msra.mxu0 %v3818_v52 }
 0x5a0   : > { %2817 = vmatprep.subr.bf16.mxu0 %v3831_v58 }
 0x5a3   : > { %2818 = vmatpush3.bf16.msra.mxu0 %v3831_v58 }
 0x669   : > { %v2789_v11 = vpop.f32.mrb[36].mxu0  ;;  %v2797_v33 = vpop.f32.mrb[36].mxu1 }
 0x66a   : > { %v2056_v42 = vsub.f32 %v2789_v11, %v2797_v33  ;;  %v1942_v49 = vpop.f32.mrb[37].mxu0  ;;  %v1990_v38 = vpop.f32.mrb[37].mxu1 }
 0x66b   : > { %v2054_v39 = vsub.f32 %v1942_v49, %v1990_v38  ;;  %v2790_v45 = vpop.f32.mrb[38].mxu0  ;;  %v2798_v48 = vpop.f32.mrb[38].mxu1 }
 0x66c   : > { %v1945_v26 = vpop.f32.mrb[39].mxu0  ;;  %v1993_v29 = vpop.f32.mrb[39].mxu1  ;;  %v2064_v6 = vpack.c.bf16 %v2056_v42, %v2056_v42 }
 0x66d   : > { %v2055_v34 = vsub.f32 %v1945_v26, %v1993_v29 }
 0x66f   : > { %v2063_v4 = vpack.c.bf16 %v2055_v34, %v2054_v39 }
 0x671   : > { %v2805_v41 = vpop.f32.mrb[40].mxu0  ;;  %2811 = vmatprep.mubr.msk.bf16.mxu1 %vm1096_vm1, %v2063_v4 }
 0x672   : > { %v2059_v52 = vsub.f32 %v2805_v41, %v2789_v11  ;;  %v2040_v8 = vpop.f32.mrb[41].mxu0  ;;  %2812 = vmatmul.mubr.msk.bf16.vlgmr.msra.gmra.mrb[40].mxu1 %vm1096_vm1, %v2064_v6 }
 0x673   : > { %v2057_v58 = vsub.f32 %v2040_v8, %v1942_v49  ;;  %v2806_v9 = vpop.f32.mrb[42].mxu0  ;;  %2824 = vmatpush3.bf16.msra.mxu1 %v3821_v55 }
 0x674   : > { %v2062_v12 = vsub.f32 %v2059_v52, %v2797_v33  ;;  %v2043_v13 = vpop.f32.mrb[43].mxu0  ;;  %2825 = vmatprep.subr.bf16.mxu1 %v3834_v61 }
 0x675   : > { %v2060_v15 = vsub.f32 %v2057_v58, %v1990_v38  ;;  %v2058_v16 = vsub.f32 %v2043_v13, %v1945_v26 }
 0x676   : > { %v2066_v5 = vpack.c.bf16 %v2062_v12, %v2062_v12 }
 0x677   : > { %v2061_v17 = vsub.f32 %v2058_v16, %v1993_v29  ;;  %2826 = vmatpush3.bf16.msra.mxu1 %v3834_v61 }
 0x678   : > { %v2176_v23 = vadd.bf16 %v2066_v5, %v2064_v6 }
 0x679   : > { %v2065_v7 = vpack.c.bf16 %v2061_v17, %v2060_v15 }
 0x67b   : > { %v2175_v24 = vadd.bf16 %v2065_v7, %v2063_v4  ;;  %2819 = vmatprep.mubr.msk.bf16.mxu0 %vm1096_vm1, %v2065_v7 }
 0x67c   : > { %2820 = vmatmul.mubr.msk.bf16.vlgmr.msra.gmra.mrb[44].mxu0 %vm1096_vm1, %v2066_v5 }
 0x67d   : > { %2827 = vmatprep.mubr.msk.bf16.mxu1 %vm1096_vm1, %v2175_v24 }
 0x67e   : > { %2828 = vmatmul.mubr.msk.bf16.vlgmr.msra.gmra.mrb[44].mxu1 %vm1096_vm1, %v2176_v23 }
 0x745   : > { %v2813_v55 = vpop.f32.mrb[40].mxu1 }
 0x746   : > { %v2107_v28 = vpop.f32.mrb[41].mxu1 }
 0x747   : > { %v2814_v30 = vpop.f32.mrb[42].mxu1 }
 0x748   : > { %v2110_v31 = vpop.f32.mrb[43].mxu1 }
 0x74f   : > { %v2821_v61 = vpop.f32.mrb[44].mxu0 }
 0x750   : > { %v2233_v36 = vsub.f32 %v2813_v55, %v2821_v61  ;;  %v2161_v37 = vpop.f32.mrb[45].mxu0 }
 0x751   : > { %v2231_v40 = vsub.f32 %v2107_v28, %v2161_v37  ;;  %v2822_v43 = vpop.f32.mrb[46].mxu0  ;;  %v2829_v44 = vpop.f32.mrb[44].mxu1 }
 0x752   : > { %2564 = vst [vmem:[%s3868_s20 + $0x28] sm:$0xff] %v2233_v36  ;;  %v2236_v46 = vsub.f32 %v2829_v44, %v2813_v55  ;;  %v2164_v47 = vpop.f32.mrb[47].mxu0  ;;  %v2217_v50 = vpop.f32.mrb[45].mxu1 }
 0x753   : > { %2562 = vst [vmem:[%s3868_s20 + $0x18] sm:$0xff] %v2231_v40  ;;  %v2232_v51 = vsub.f32 %v2110_v31, %v2164_v47  ;;  %v2234_v53 = vsub.f32 %v2217_v50, %v2107_v28  ;;  %v2830_v54 = vpop.f32.mrb[46].mxu1 }
 0x754   : > { %v2239_v56 = vsub.f32 %v2236_v46, %v2821_v61  ;;  %v2220_v57 = vpop.f32.mrb[47].mxu1 }
 0x755   : > { %2563 = vst [vmem:[%s3868_s20 + $0x20] sm:$0xff] %v2232_v51  ;;  %v2237_v59 = vsub.f32 %v2234_v53, %v2161_v37  ;;  %v2235_v60 = vsub.f32 %v2220_v57, %v2110_v31 }
 0x756   : > { %2567 = vst [vmem:[%s3873_s4 + $0x28] sm:$0xff] %v2239_v56 }
 0x757   : > { %3181 = shalt.err (!%p3178_p4)
}
 0x758   : > { %s3182_s20 = scalar_lea.hbm %s3943_s16, 768  ;;  %s3186_s1 = scalar_lea.hbm %s4096_s10, 1536 }
 0x759   : > { %p3183_p10 = scmp.ne.s32.totalorder %s3943_s16, %s3182_s20  ;;  %p3187_p5 = scmp.lt.u32.totalorder %s3943_s16, %s4096_s10 }
 0x75a   : > { %p3188_p7 = scmp.lt.u32.totalorder %s3186_s1, %s3182_s20  ;;  %p3190_p9 = scmp.lt.u32.totalorder %s3182_s20, %s3943_s16 }
 0x75b   : > { %p3184_p11 = pnand %p3183_p10, %p4097_p12 }
 0x75c   : > { %p3189_p6 = por %p3188_p7, %p3187_p5 }
 0x75d   : > { %p3185_p3 = pneg %p3184_p11 }
 0x75e   : > { %p3191_p1 = por %p3190_p9, %p3189_p6 }
 0x760   : > { %p3192_p13 = pnand %p3191_p1, %p3185_p3 }
 0x762   : > { %3195 = shalt.err (!%p3192_p13)
}
 0x763   : > { %s3292_s0 = smov 128   ;;  %s3293_s3 = smov 8   ;;  %2565 = vst [vmem:[%s3873_s4 + $0x18] sm:$0xff] %v2237_v59  ;;  %v2238_v62 = vsub.f32 %v2235_v60, %v2164_v47 }
 0x764   : > { %s4098_s23 = scalar_lea.sflag [#allocation4], %s3638_s18  ;;  %s4099_s24 = smul.u32 768, %s3386_s14 }
 0x765   : > { %2860 = dma.vmem_to_hbm [thread:$0]  (%p4097_p12), %s3933_s15, 768, %s3943_s16, %s4098_s23, %s3292_s0, %s3292_s0, %s3293_s3  }
 0x766   : > { %s4100_s1 = sld [smem:[#allocation35_spill]]  ;;  %2566 = vst [vmem:[%s3873_s4 + $0x20] sm:$0xff] %v2238_v62  ;;  %s2254_s5 = scalar_lea.sflag [#allocation16], %s3638_s18 }
 0x767   : > { %s3196_s6 = scalar_lea.vmem %s3945_s12, 768  ;;  %s3294_s7 = smov [#allocation15]  }
 0x768   : > { %p3197_p0 = scmp.ne.s32.totalorder %s3945_s12, %s3196_s6  ;;  %s3200_s8 = sshll.u32 %s3294_s7, 4  ;;  %s3201_s8 = int_to_ptr.vmem [resolvable:$false] %s3200_s8 }
 0x769   : > { %s3202_s10 = scalar_lea.vmem %s3201_s8, 1536  ;;  %p3203_p4 = scmp.lt.s32.totalorder %s3945_s12, %s3201_s8 }
 0x76a   : > { %p3198_p2 = pnand %p3197_p0, %p4097_p12  ;;  %p3204_p10 = scmp.lt.s32.totalorder %s3202_s10, %s3196_s6 }
 0x76c   : > { %s3982_s2 = scalar_lea.hbm %s4100_s1, %s4099_s24  ;;  %p3199_p8 = pneg %p3198_p2 }
 0x76d   : > { %p3205_p11 = por %p3204_p10, %p3203_p4 }
 0x76f   : > { %p3206_p3 = pnand %p3205_p11, %p3199_p8 }
 0x771   : > { %3209 = shalt.err (!%p3206_p3)
}
 0x772   : > { %s3210_s14 = scalar_lea.hbm %s3982_s2, 768  ;;  %s3214_s7 = scalar_lea.hbm %s4100_s1, 1536 }
 0x773   : > { %p3211_p5 = scmp.ne.s32.totalorder %s3982_s2, %s3210_s14  ;;  %p3215_p9 = scmp.lt.u32.totalorder %s3982_s2, %s4100_s1 }
 0x774   : > { %p3216_p1 = scmp.lt.u32.totalorder %s3214_s7, %s3210_s14  ;;  %p3218_p0 = scmp.lt.u32.totalorder %s3210_s14, %s3982_s2 }
 0x775   : > { %p3212_p7 = pnand %p3211_p5, %p4097_p12 }
 0x776   : > { %p3217_p13 = por %p3216_p1, %p3215_p9 }
 0x777   : > { %p3213_p6 = pneg %p3212_p7 }
 0x778   : > { %p3219_p2 = por %p3218_p0, %p3217_p13 }
 0x77a   : > { %p3220_p8 = pnand %p3219_p2, %p3213_p6 }
 0x77c   : > { %3223 = shalt.err (!%p3220_p8)
}
 0x77d   : > { %2861 = dma.vmem_to_hbm [thread:$0]  (%p4097_p12), %s3945_s12, 768, %s3982_s2, %s2254_s5, %s3292_s0, %s3292_s0, %s3293_s3  }
 0x77e PF: > { %s2300_s6 = sand.u32 1, %s3266_s25   ;;  %p4101_p4 = scmp.ne.s32.totalorder %s4080_s17, 0 }
 0x77f   : > { %p4102_p10 = scmp.ge.s32.totalorder %s3278_s28, 2  ;;  %s2301_s10 = scalar_lea.sflag [#allocation4], %s2300_s6 }
 0x781   : > { %p2888_p11 = pnand %p4102_p10, %p4101_p4 }
 0x783   : > { %3257 = dma.done.wait (!%p2888_p11), %s2301_s10, 768  }
 0x784   : > { %3259 = vsyncadd (!%p2888_p11), %s2301_s10, 4294966528  ;;  %s2310_s21 = scalar_lea.sflag [#allocation16], %s2300_s6 }
 0x785   : > { %3261 = dma.done.wait (!%p2888_p11), %s2310_s21, 768  }
 0x786   : > { %3263 = vsyncadd (!%p2888_p11), %s2310_s21, 4294966528  ;;  %p33_p12 = scmp.ge.s32.totalorder %s3556_s9, 4   ;;  %s4103_s25 = smov %s3270_s26 }
 0x787   : > { %s4104_s26 = smov %s3274_s27  ;;  %s4105_s27 = smov %s3567_s29 }
 0x788   : > { %s4106_s28 = smov %s3556_s9  ;;  %35 = sbr.rel (!%p33_p12) target bundleno = 24 (0x18), region = 161 }
 0x78f   :  { %2315 = vsyncpa [#allocation3], 1 }
 0x790   :  { %2317 = vsyncpa [#allocation3 + $0x1], 1 }
 0x791   :  { %2318 = vsyncpa [#allocation6], 1 }
 0x792   :  { %2319 = vsyncpa [#allocation9], 1 }
 0x793   :  { %2320 = vsyncpa [#allocation12], 1 }
 0x794   :  { %2321 = vsyncpa [#allocation4], 1 }
 0x795   :  { %2323 = vsyncpa [#allocation4 + $0x1], 1 }
 0x796   :  { %2324 = vsyncpa [#allocation16], 1 }
 0x797   :  { %2326 = vsyncpa [#allocation16 + $0x1], 1 }

// kernel: tpu_custom_call.1
= control target key start
LH: loop header
LB: loop body
LE: loop exit
PB: predicated region body
PF: predicated region fallthrough
CT: control target
= control target key end

     0   :  { %s4030_s0 = inlined_call_operand.vmem [shape: bf16[4,16,16], index: 0, kind: input, shape index: {}]   ;;  %s4031_s1 = inlined_call_operand.hbm [shape: bf16[4,16,16], index: 1, kind: input, shape index: {}]   ;;  %s4032_s2 = inlined_call_operand.vmem [shape: bf16[32,16], index: 2, kind: input, shape index: {}]   ;;  %s4033_s3 = inlined_call_operand.vmem [shape: bf16[32,16], index: 3, kind: input, shape index: {}]   ;;  %s4034_s4 = inlined_call_operand.hbm [shape: bf16[16,32], index: 4, kind: input, shape index: {}]   ;;  %s4035_s5 = inlined_call_operand.hbm [shape: bf16[16,32], index: 5, kind: input, shape index: {}]   ;;  %s4036_s6 = inlined_call_operand.hbm [shape: bf16[24,32], index: 6, kind: input, shape index: {}]   ;;  %s4037_s7 = inlined_call_operand.hbm [shape: bf16[24,32], index: 7, kind: input, shape index: {}]   ;;  %s4038_s8 = inlined_call_operand.hbm [shape: bf16[32,128], index: 8, kind: input, shape index: {}]   ;;  %s4039_s9 = inlined_call_operand.vmem [shape: bf16[32,128], index: 9, kind: input, shape index: {}]   ;;  %s4040_s10 = inlined_call_operand.vmem [shape: f32[32,32], index: 10, kind: input, shape index: {}]   ;;  %s4041_s11 = inlined_call_operand.hbm [shape: f32[32,32], index: 11, kind: input, shape index: {}]   ;;  %s4042_s12 = inlined_call_operand.hbm [shape: f32[4,24,128], index: 12, kind: output, shape index: {0}]   ;;  %s4043_s13 = inlined_call_operand.hbm [shape: f32[4,24,128], index: 13, kind: output, shape index: {1}]  }
   0x1   :  { %4055 = sst [smem:[#allocation23_spill]] %s4030_s0 }
   0x2   :  { %4056 = sst [smem:[#allocation24_spill]] %s4031_s1 }
   0x3   :  { %4057 = sst [smem:[#allocation25_spill]] %s4032_s2 }
   0x4   :  { %4058 = sst [smem:[#allocation26_spill]] %s4033_s3 }
   0x5   :  { %4059 = sst [smem:[#allocation27_spill]] %s4034_s4 }
   0x6   :  { %4060 = sst [smem:[#allocation28_spill]] %s4035_s5 }
   0x7   :  { %4061 = sst [smem:[#allocation29_spill]] %s4036_s6 }
   0x8   :  { %4062 = sst [smem:[#allocation30_spill]] %s4037_s7 }
   0x9   :  { %4063 = sst [smem:[#allocation31_spill]] %s4038_s8 }
   0xa   :  { %4064 = sst [smem:[#allocation32_spill]] %s4039_s9 }
   0xb   :  { %4065 = sst [smem:[#allocation33_spill]] %s4040_s10 }
   0xc   :  { %4066 = sst [smem:[#allocation34_spill]] %s4042_s12 }
   0xd   :  { %4067 = sst [smem:[#allocation35_spill]] %s4043_s13 }
   0xe   :  { %19 = vsyncpa [#allocation3], 0 }
   0xf   :  { %21 = vsyncpa [#allocation3 + $0x1], 0 }
  0x10   :  { %22 = vsyncpa [#allocation6], 0 }
  0x11   :  { %23 = vsyncpa [#allocation9], 0 }
  0x12   :  { %24 = vsyncpa [#allocation12], 0 }
  0x13   :  { %25 = vsyncpa [#allocation4], 0 }
  0x14   :  { %27 = vsyncpa [#allocation4 + $0x1], 0 }
  0x15   :  { %28 = vsyncpa [#allocation16], 0 }
  0x16   :  { %30 = vsyncpa [#allocation16 + $0x1], 0  ;;  %s3365_s25 = smov 0   ;;  %s3367_s26 = smov 0  }
  0x17   :  { %s3369_s27 = smov 0   ;;  %s3371_s28 = smov 0  }
  0x18 LB: > { %s3280_s29 = smov [#allocation5]   ;;  %s3386_s14 = sadd.s32 4294967295, %s3278_s28   ;;  %s3278_s28 = sphi %s3371_s28, %s4106_s28   ;;  %s3274_s27 = sphi %s3369_s27, %s4105_s27   ;;  %s3270_s26 = sphi %s3367_s26, %s4104_s26   ;;  %s3266_s25 = sphi %s3365_s25, %s4103_s25  }
  0x19   : > { %s373_s30 = sshll.u32 %s3280_s29, 4  ;;  %p2460_p0 = scmp.ge.s32.totalorder %s3278_s28, 1  ;;  %s3391_s30 = int_to_ptr.vmem [resolvable:$true] %s373_s30 }
  0x1a   : > { %p4049_p1 = scmp.eq.s32.totalorder %s3386_s14, 0  ;;  %p355_p2 = scmp.lt.s32.totalorder %s3278_s28, 3 }
  0x1b   : > { %s3281_s16 = smov [#allocation8]   ;;  %s3282_s19 = smov [#allocation11]  }
  0x1c   : > { %p3393_p3 = pnand %p2460_p0, %p355_p2  ;;  %s399_s17 = sshll.u32 %s3281_s16, 4  ;;  %s3406_s17 = int_to_ptr.vmem [resolvable:$true] %s399_s17 }
  0x1d   : > { %s425_s20 = sshll.u32 %s3282_s19, 4  ;;  %s4070_s4 = sld [smem:[#allocation27_spill]]  ;;  %s3408_s20 = int_to_ptr.vmem [resolvable:$true] %s425_s20 }
  0x1e   : > { %s4068_s15 = scalar_select %p3393_p3, 1, 0 }
  0x1f   : > { %p2864_p5 = pneg %p3393_p3 }
  0x21   : > { %p3402_p6 = pnand %p2864_p5, %p4049_p1 }
  0x23   : > { %s2970_s23 = scalar_lea.hbm %s4070_s4, 128  ;;  %p3418_p8 = pneg %p3402_p6 }
  0x24   : > { %p2971_p7 = scmp.ne.s32.totalorder %s4070_s4, %s2970_s23  ;;  %p2977_p11 = scmp.lt.u32.totalorder %s2970_s23, %s4070_s4 }
  0x26   : > { %p2973_p9 = pnand %p3418_p8, %p2971_p7 }
  0x28   : > { %p2974_p10 = pneg %p2973_p9 }
  0x2a   : > { %p2979_p12 = pnand %p2977_p11, %p2974_p10 }
  0x2c   : > { %2982 = shalt.err (!%p2979_p12)
}
  0x2d   : > { %s2983_s21 = scalar_lea.vmem %s3391_s30, 128  ;;  %p2991_p5 = scmp.lt.s32.totalorder %s3391_s30, %s3391_s30 }
  0x2e   : > { %p2984_p13 = scmp.ne.s32.totalorder %s3391_s30, %s2983_s21  ;;  %p2992_p4 = scmp.lt.s32.totalorder %s2983_s21, %s2983_s21 }
  0x30   : > { %p2986_p0 = pnand %p2984_p13, %p3418_p8  ;;  %p2993_p7 = por %p2992_p4, %p2991_p5 }
  0x32   : > { %p2987_p2 = pneg %p2986_p0 }
  0x34   : > { %p2994_p9 = pnand %p2993_p7, %p2987_p2 }
  0x36   : > { %2997 = shalt.err (!%p2994_p9)
}
  0x37   : > { %s4051_s22 = smov 64   ;;  %s3284_s13 = smov 4  }
  0x38   : > { %2867 = dma.hbm_to_vmem [thread:$0]  (!%p3402_p6), %s4070_s4, 128, %s3391_s30, [#allocation6], %s4051_s22, %s4051_s22, %s3284_s13  }
  0x39   : > { %s4072_s6 = sld [smem:[#allocation29_spill]] }
  0x3f   : > { %s2998_s21 = scalar_lea.hbm %s4072_s6, 192 }
  0x40   : > { %p2999_p4 = scmp.ne.s32.totalorder %s4072_s6, %s2998_s21  ;;  %p3005_p12 = scmp.lt.u32.totalorder %s2998_s21, %s4072_s6 }
  0x42   : > { %p3001_p10 = pnand %p2999_p4, %p3418_p8 }
  0x44   : > { %p3002_p11 = pneg %p3001_p10 }
  0x46   : > { %p3007_p13 = pnand %p3005_p12, %p3002_p11 }
  0x48   : > { %3010 = shalt.err (!%p3007_p13)
}
  0x49   : > { %s3011_s30 = scalar_lea.vmem %s3406_s17, 192  ;;  %p3019_p7 = scmp.lt.s32.totalorder %s3406_s17, %s3406_s17 }
  0x4a   : > { %p3012_p0 = scmp.ne.s32.totalorder %s3406_s17, %s3011_s30  ;;  %p3020_p9 = scmp.lt.s32.totalorder %s3011_s30, %s3011_s30 }
  0x4c   : > { %p3014_p2 = pnand %p3012_p0, %p3418_p8  ;;  %p3021_p4 = por %p3020_p9, %p3019_p7 }
  0x4e   : > { %p3015_p5 = pneg %p3014_p2 }
  0x50   : > { %p3022_p10 = pnand %p3021_p4, %p3015_p5 }
  0x52   : > { %3025 = shalt.err (!%p3022_p10)
}
  0x53   : > { %2873 = dma.hbm_to_vmem [thread:$0]  (!%p3402_p6), %s4072_s6, 192, %s3406_s17, [#allocation9], %s4051_s22, %s4051_s22, %s3284_s13  }
  0x54   : > { %s4073_s8 = sld [smem:[#allocation31_spill]] }
  0x5a   : > { %s3026_s23 = scalar_lea.hbm %s4073_s8, 256 }
  0x5b   : > { %p3027_p11 = scmp.ne.s32.totalorder %s4073_s8, %s3026_s23  ;;  %p3033_p0 = scmp.lt.u32.totalorder %s3026_s23, %s4073_s8 }
  0x5d   : > { %p3029_p12 = pnand %p3027_p11, %p3418_p8 }
  0x5f   : > { %p3030_p13 = pneg %p3029_p12 }
  0x61   : > { %p3035_p2 = pnand %p3033_p0, %p3030_p13 }
  0x63   : > { %3038 = shalt.err (!%p3035_p2)
}
  0x64   : > { %s3039_s17 = scalar_lea.vmem %s3408_s20, 256  ;;  %p3047_p4 = scmp.lt.s32.totalorder %s3408_s20, %s3408_s20 }
  0x65   : > { %p3040_p5 = scmp.ne.s32.totalorder %s3408_s20, %s3039_s17  ;;  %p3048_p10 = scmp.lt.s32.totalorder %s3039_s17, %s3039_s17 }
  0x67   : > { %p3042_p7 = pnand %p3040_p5, %p3418_p8  ;;  %p3049_p11 = por %p3048_p10, %p3047_p4 }
  0x69   : > { %p3043_p9 = pneg %p3042_p7 }
  0x6b   : > { %p3050_p12 = pnand %p3049_p11, %p3043_p9 }
  0x6d   : > { %3053 = shalt.err (!%p3050_p12)
}
  0x6e   : > { %2879 = dma.hbm_to_vmem [thread:$0]  (!%p3402_p6), %s4073_s8, 256, %s3408_s20, [#allocation12], %s4051_s22, %s4051_s22, %s3284_s13  }
  0x6f   : > { %s3285_s9 = smov [#allocation7]   ;;  %s3286_s12 = smov [#allocation10]  }
  0x70   : > { %s386_s10 = sshll.u32 %s3285_s9, 4  ;;  %s412_s23 = sshll.u32 %s3286_s12, 4  ;;  %s387_s10 = int_to_ptr.vmem [resolvable:$true] %s386_s10  ;;  %s413_s23 = int_to_ptr.vmem [resolvable:$true] %s412_s23 }
  0x71   : > { %s4074_s5 = sld [smem:[#allocation28_spill]] }
  0x77   : > { %s3054_s19 = scalar_lea.hbm %s4074_s5, 128 }
  0x78   : > { %p3055_p13 = scmp.ne.s32.totalorder %s4074_s5, %s3054_s19  ;;  %p3061_p5 = scmp.lt.u32.totalorder %s3054_s19, %s4074_s5 }
  0x7a   : > { %p3057_p0 = pnand %p3055_p13, %p3418_p8 }
  0x7c   : > { %p3058_p2 = pneg %p3057_p0 }
  0x7e   : > { %p3063_p7 = pnand %p3061_p5, %p3058_p2 }
  0x80   : > { %3066 = shalt.err (!%p3063_p7)
}
  0x81   : > { %s3067_s20 = scalar_lea.vmem %s387_s10, 128  ;;  %p3075_p11 = scmp.lt.s32.totalorder %s387_s10, %s387_s10 }
  0x82   : > { %p3068_p9 = scmp.ne.s32.totalorder %s387_s10, %s3067_s20  ;;  %p3076_p12 = scmp.lt.s32.totalorder %s3067_s20, %s3067_s20 }
  0x84   : > { %p3070_p4 = pnand %p3068_p9, %p3418_p8  ;;  %p3077_p1 = por %p3076_p12, %p3075_p11 }
  0x86   : > { %p3071_p10 = pneg %p3070_p4 }
  0x88   : > { %p3078_p3 = pnand %p3077_p1, %p3071_p10 }
  0x8a   : > { %3081 = shalt.err (!%p3078_p3)
}
  0x8b   : > { %2870 = dma.hbm_to_vmem [thread:$0]  (!%p3402_p6), %s4074_s5, 128, %s387_s10, [#allocation6], %s4051_s22, %s4051_s22, %s3284_s13  }
  0x8c   : > { %s4075_s7 = sld [smem:[#allocation30_spill]] }
  0x92   : > { %s3082_s24 = scalar_lea.hbm %s4075_s7, 192 }
  0x93   : > { %p3083_p1 = scmp.ne.s32.totalorder %s4075_s7, %s3082_s24  ;;  %p3089_p0 = scmp.lt.u32.totalorder %s3082_s24, %s4075_s7 }
  0x95   : > { %p3085_p3 = pnand %p3083_p1, %p3418_p8 }
  0x97   : > { %p3086_p13 = pneg %p3085_p3 }
  0x99   : > { %p3091_p2 = pnand %p3089_p0, %p3086_p13 }
  0x9b   : > { %3094 = shalt.err (!%p3091_p2)
}
  0x9c   : > { %s3095_s30 = scalar_lea.vmem %s413_s23, 192  ;;  %p3103_p4 = scmp.lt.s32.totalorder %s413_s23, %s413_s23 }
  0x9d   : > { %p3096_p5 = scmp.ne.s32.totalorder %s413_s23, %s3095_s30  ;;  %p3104_p10 = scmp.lt.s32.totalorder %s3095_s30, %s3095_s30 }
  0x9f   : > { %p3098_p7 = pnand %p3096_p5, %p3418_p8  ;;  %p3105_p11 = por %p3104_p10, %p3103_p4 }
  0xa1   : > { %p3099_p9 = pneg %p3098_p7 }
  0xa3   : > { %p3106_p12 = pnand %p3105_p11, %p3099_p9 }
  0xa5   : > { %3109 = shalt.err (!%p3106_p12)
}
  0xa6   : > { %2876 = dma.hbm_to_vmem [thread:$0]  (!%p3402_p6), %s4075_s7, 192, %s413_s23, [#allocation9], %s4051_s22, %s4051_s22, %s3284_s13  }
  0xa7   : > { %s3287_s4 = smov [#allocation13]   ;;  %s3110_s24 = scalar_lea.hbm %s4041_s11, 512 }
  0xa8   : > { %s444_s3 = sshll.u32 %s3287_s4, 4  ;;  %p3111_p1 = scmp.ne.s32.totalorder %s4041_s11, %s3110_s24  ;;  %s445_s3 = int_to_ptr.vmem [resolvable:$true] %s444_s3 }
  0xa9   : > { %p3117_p0 = scmp.lt.u32.totalorder %s3110_s24, %s4041_s11 }
  0xaa   : > { %p3113_p3 = pnand %p3111_p1, %p3418_p8 }
  0xac   : > { %p3114_p13 = pneg %p3113_p3 }
  0xae   : > { %p3119_p2 = pnand %p3117_p0, %p3114_p13 }
  0xb0   : > { %3122 = shalt.err (!%p3119_p2)
}
  0xb1   : > { %s3123_s23 = scalar_lea.vmem %s445_s3, 512  ;;  %p3131_p4 = scmp.lt.s32.totalorder %s445_s3, %s445_s3 }
  0xb2   : > { %p3124_p5 = scmp.ne.s32.totalorder %s445_s3, %s3123_s23  ;;  %p3132_p10 = scmp.lt.s32.totalorder %s3123_s23, %s3123_s23 }
  0xb4   : > { %p3126_p7 = pnand %p3124_p5, %p3418_p8  ;;  %p3133_p11 = por %p3132_p10, %p3131_p4 }
  0xb6   : > { %p3127_p9 = pneg %p3126_p7 }
  0xb8   : > { %p3134_p12 = pnand %p3133_p11, %p3127_p9 }
  0xba   : > { %3137 = shalt.err (!%p3134_p12)
}
  0xbb   : > { %s3288_s30 = smov 128   ;;  %s3289_s16 = smov 8  }
  0xbc   : > { %2882 = dma.hbm_to_vmem [thread:$0]  (!%p3402_p6), %s4041_s11, 512, %s445_s3, [#allocation12], %s3288_s30, %s3288_s30, %s3289_s16  }
  0xbd   : > { %s2459_s4 = sadd.s32 4294967294, %s3278_s28   ;;  %s3556_s9 = sadd.s32 1, %s3278_s28  }
  0xbe   : > { %s66_s12 = ssub.s32 %s3278_s28, %s3556_s9  ;;  %s69_s24 = sadd.s32 1, %s3274_s27 }
  0xbf   : > { %p67_p8 = scmp.eq.s32.totalorder %s66_s12, 0  ;;  %p76_p1 = scmp.ne.s32.totalorder %s3274_s27, %s3270_s26 }
  0xc0   : > { %p77_p3 = scmp.eq.s32.totalorder %s3278_s28, 0  ;;  %p82_p13 = scmp.ne.s32.totalorder %s3270_s26, %s3266_s25 }
  0xc1   : > { %s3567_s29 = scalar_select %p67_p8, %s3274_s27, %s69_s24  }
  0xc2   : > { %p3569_p0 = por %p77_p3, %p76_p1  ;;  %p4077_p2 = scmp.eq.s32.totalorder %s3386_s14, 0 }
  0xc3   : > { %p316_p5 = scmp.eq.s32.totalorder %s3386_s14, 1  ;;  %p322_p7 = scmp.eq.s32.totalorder %s2459_s4, 1 }
  0xc4   : > { %p3575_p6 = por %p4077_p2, %p82_p13  ;;  %p2900_p9 = scmp.lt.s32.totalorder %s3278_s28, 2 }
  0xc5   : > { %s468_s19 = sand.u32 1, %s3274_s27   ;;  %p3582_p4 = por %p316_p5, %p76_p1 }
  0xc6   : > { %p3586_p10 = por %p322_p7, %p82_p13  ;;  %s2468_s23 = sshll.u32 %s468_s19, 4 }
  0xc7   : > { %s4079_s21 = scalar_select %p3582_p4, 1, 0 }
  0xc8   : > { %s4080_s17 = scalar_select %p3586_p10, 1, 0 }
  0xc9   : > { %s2577_s30 = sshll.u32 %s3278_s28, 8  ;;  %s4081_s1 = sld [smem:[#allocation24_spill]] }
  0xca   : > { %s472_s4 = scalar_lea.vmem [#allocation2], %s2468_s23  ;;  %p3600_p11 = pnand %p2900_p9, %p3569_p0 }
  0xcb   : > { %s480_s12 = sshll.u32 %s472_s4, 4  ;;  %s3604_s22 = scalar_lea.sflag [#allocation3], %s468_s19  ;;  %s3596_s12 = int_to_ptr.vmem [resolvable:$true] %s480_s12 }
  0xcc   : > { %p3140_p8 = pneg %p3600_p11 }
  0xcf   : > { %s3594_s20 = scalar_lea.hbm %s4081_s1, %s2577_s30  ;;  %s3143_s18 = scalar_lea.hbm %s4081_s1, 512 }
  0xd0   : > { %s3138_s16 = scalar_lea.hbm %s3594_s20, 256  ;;  %p3144_p13 = scmp.lt.u32.totalorder %s3594_s20, %s4081_s1 }
  0xd1   : > { %p3139_p12 = scmp.ne.s32.totalorder %s3594_s20, %s3138_s16  ;;  %p3145_p0 = scmp.lt.u32.totalorder %s3143_s18, %s3138_s16 }
  0xd2   : > { %p3147_p5 = scmp.lt.u32.totalorder %s3138_s16, %s3594_s20 }
  0xd3   : > { %p3141_p1 = pnand %p3140_p8, %p3139_p12  ;;  %p3146_p2 = por %p3145_p0, %p3144_p13 }
  0xd5   : > { %p3142_p3 = pneg %p3141_p1  ;;  %p3148_p7 = por %p3147_p5, %p3146_p2 }
  0xd7   : > { %p3149_p9 = pnand %p3148_p7, %p3142_p3 }
  0xd9   : > { %3152 = shalt.err (!%p3149_p9)
}
  0xda   : > { %s3153_s19 = scalar_lea.vmem %s3596_s12, 256  ;;  %s3290_s23 = smov [#allocation2]  }
  0xdb   : > { %p3154_p12 = scmp.ne.s32.totalorder %s3596_s12, %s3153_s19  ;;  %s3158_s30 = sshll.u32 %s3290_s23, 4  ;;  %s3159_s30 = int_to_ptr.vmem [resolvable:$false] %s3158_s30 }
  0xdc   : > { %s3160_s10 = scalar_lea.vmem %s3159_s30, 512  ;;  %p3161_p4 = scmp.lt.s32.totalorder %s3596_s12, %s3159_s30 }
  0xdd   : > { %p3156_p1 = pnand %p3154_p12, %p3140_p8  ;;  %p3162_p13 = scmp.lt.s32.totalorder %s3160_s10, %s3153_s19 }
  0xdf   : > { %p3157_p10 = pneg %p3156_p1  ;;  %p3163_p0 = por %p3162_p13, %p3161_p4 }
  0xe1   : > { %p3164_p2 = pnand %p3163_p0, %p3157_p10 }
  0xe3   : > { %3167 = shalt.err (!%p3164_p2)
}
  0xe4   : > { %s4083_s16 = smov 64   ;;  %p4084_p8 = scmp.ne.s32.totalorder %s4068_s15, 0 }
  0xe5   : > { %2886 = dma.hbm_to_vmem [thread:$0]  (!%p3600_p11), %s3594_s20, 256, %s3596_s12, %s3604_s22, %s4083_s16, %s4083_s16, %s3284_s13  }
  0xe6   : > { %492 = sbr.rel (%p4084_p8) target bundleno = 1918 (0x77e), region = 68  ;;  %s3638_s18 = sand.u32 (!%p4084_p8), 1, %s3270_s26  }
  0xe7   : > { %s2473_s4 = sshll.u32 (!%p4084_p8), %s3638_s18, 4  ;;  %s495_s19 = scalar_lea.sflag (!%p4084_p8), [#allocation3], %s3638_s18 }
  0xe8   : > { %s3642_s23 = scalar_lea.vmem (!%p4084_p8), [#allocation2], %s2473_s4 }
  0xed   : > { %3241 = dma.done.wait (%p3575_p6), %s495_s19, 256  }
  0xee   : > { %3243 = vsyncadd (%p3575_p6), %s495_s19, 4294967040  ;;  %p4085_p4 = scmp.eq.s32.totalorder %s3386_s14, 0 }
  0xf0   : > { %3245 = dma.done.wait (%p4085_p4), [#allocation6], 256   ;;  %p4086_p10 = pmov %p4085_p4 }
  0xf1   : > { %p4087_p11 = pmov %p4085_p4 }
  0xf2   : > { %3247 = vsyncadd (%p4086_p10), [#allocation6], 4294967040 }
  0xf3   : > { %3249 = dma.done.wait (%p4087_p11), [#allocation9], 384   ;;  %p4088_p3 = pmov %p4085_p4 }
  0xf5   : > { %3251 = vsyncadd (%p4088_p3), [#allocation9], 4294966912  ;;  %p4089_p5 = pmov %p4088_p3 }
  0xf6   : > { %p4090_p7 = pmov %p4088_p3 }
  0xf7   : > { %3253 = dma.done.wait (%p4089_p5), [#allocation12], 768  }
  0xf8   : > { %3255 = vsyncadd (%p4090_p7), [#allocation12], 4294966528  ;;  %s2480_s15 = sshll.u32 %s3386_s14, 1  ;;  %s4091_s0 = sld [smem:[#allocation23_spill]]  ;;  %vm641_vm0 = vcmask 130048   ;;  %vm1096_vm1 = vcmask 261120  }
  0xf9   : > { %p577_p6 = scmp.lt.s32.totalorder %s2480_s15, 3  ;;  %v623_v2 = vld [vmem:[%s3642_s23] sm:$0xf]  ;;  %v624_v4 = vld [vmem:[%s3642_s23 + $0x4] sm:$0xf]  ;;  %s4092_s2 = sld [smem:[#allocation25_spill]] }
  0xfa   : > { %v2490_v8 = vcombine.low %v623_v2, %v624_v4  ;;  %s4093_s19 = sld [smem:[#allocation26_spill]]  ;;  %v595_v27 = vld [vmem:[#allocation5] sm:$0xf]  ;;  %v596_v28 = vld [vmem:[#allocation5 + $0x4] sm:$0xf]  ;;  %s4094_s13 = sld [smem:[#allocation33_spill]] }
  0xfb   : > { %s4108_s15 = smov (!%p577_p6, %s2480_s15), 3  ;;  %v3718_v29 = vcombine.low %v595_v27, %v596_v28  ;;  %v597_v30 = vld [vmem:[#allocation7] sm:$0xf]  ;;  %v598_v31 = vld [vmem:[#allocation7 + $0x4] sm:$0xf]  ;;  %s4053_s3 = smul.u32 768, %s3386_s14 }
  0xfc   : > { %s2578_s22 = sshll.u32 %s4108_s15, 3  ;;  %2669 = vmatprep.subr.bf16.mxu1 %v2490_v8  ;;  %v985_v32 = vadd.bf16 %v597_v30, %v595_v27  ;;  %v986_v33 = vadd.bf16 %v598_v31, %v596_v28  ;;  %v3722_v34 = vcombine.low %v597_v30, %v598_v31  ;;  %v3758_v27 = vld [vmem:[#allocation13] sm:$0xff]  ;;  %s4096_s10 = sld [smem:[#allocation34_spill]] }
  0xfd   : > { %2670 = vmatpush3.bf16.msra.mxu1 %v2490_v8  ;;  %p4097_p12 = scmp.ne.s32.totalorder %s4079_s21, 0  ;;  %s3291_s1 = smov [#allocation14]  }
  0xfe   : > { %s3664_s20 = scalar_lea.vmem %s4091_s0, %s2578_s22  ;;  %2681 = vmatprep.subr.bf16.mxu1 %v3718_v29  ;;  %v3724_v35 = vcombine.low %v985_v32, %v986_v33  ;;  %v3765_v33 = vld [vmem:[#allocation13 + $0x18] sm:$0xff]  ;;  %s4095_s22 = sld [smem:[#allocation32_spill]] }
  0xff   : > { %v621_v0 = vld [vmem:[%s3664_s20] sm:$0xf]  ;;  %v622_v1 = vld [vmem:[%s3664_s20 + $0x4] sm:$0xf]  ;;  %v589_v13 = vld [vmem:[%s4092_s2 + $0x8] sm:$0xf] }
 0x100   : > { %v2485_v3 = vcombine.low %v621_v0, %v622_v1  ;;  %v772_v5 = vadd.bf16 %v623_v2, %v621_v0  ;;  %v587_v6 = vld [vmem:[%s4092_s2] sm:$0xf]  ;;  %v588_v7 = vld [vmem:[%s4092_s2 + $0x4] sm:$0xf]  ;;  %v773_v9 = vadd.bf16 %v624_v4, %v622_v1  ;;  %v590_v17 = vld [vmem:[%s4092_s2 + $0xc] sm:$0xf] }
 0x101   : > { %v3676_v10 = vcombine.low %v587_v6, %v588_v7  ;;  %v591_v11 = vld [vmem:[%s4093_s19] sm:$0xf]  ;;  %v592_v12 = vld [vmem:[%s4093_s19 + $0x4] sm:$0xf]  ;;  %v593_v18 = vld [vmem:[%s4093_s19 + $0x8] sm:$0xf]  ;;  %v3698_v20 = vcombine.low %v589_v13, %v590_v17 }
 0x102   : > { %2663 = vmatprep.subr.bf16.mxu0 %v2485_v3  ;;  %v3687_v14 = vcombine.low %v591_v11, %v592_v12  ;;  %v768_v15 = vadd.bf16 %v591_v11, %v587_v6  ;;  %v769_v16 = vadd.bf16 %v592_v12, %v588_v7  ;;  %v594_v19 = vld [vmem:[%s4093_s19 + $0xc] sm:$0xf]  ;;  %v2495_v23 = vcombine.low %v772_v5, %v773_v9  ;;  %v599_v2 = vld [vmem:[#allocation8] sm:$0xf]  ;;  %v602_v4 = vld [vmem:[#allocation10] sm:$0xf]  ;;  %s3943_s16 = scalar_lea.hbm %s4096_s10, %s4053_s3 }
 0x103   : > { %2664 = vmatpush3.bf16.msra.mxu0 %v2485_v3  ;;  %v3700_v21 = vcombine.low %v593_v18, %v594_v19  ;;  %2665 = vmatprep.mubr.msk.bf16.mxu0 %vm641_vm0, %v3676_v10  ;;  %v770_v24 = vadd.bf16 %v593_v18, %v589_v13  ;;  %v771_v25 = vadd.bf16 %v594_v19, %v590_v17  ;;  %v600_v3 = vld [vmem:[#allocation8 + $0x4] sm:$0xf]  ;;  %v603_v6 = vld [vmem:[#allocation10 + $0x4] sm:$0xf]  ;;  %v3751_v19 = vld [vmem:[#allocation13 + $0x10] sm:$0xff]  ;;  %s3172_s2 = sshll.u32 %s3291_s1, 4  ;;  %s3173_s2 = int_to_ptr.vmem [resolvable:$false] %s3172_s2 }
 0x104   : > { %v3704_v22 = vcombine.low %v768_v15, %v769_v16  ;;  %2671 = vmatprep.mubr.msk.bf16.mxu1 %vm641_vm0, %v3687_v14  ;;  %2675 = vmatprep.subr.bf16.mxu0 %v2495_v23  ;;  %v3736_v5 = vcombine.low %v599_v2, %v600_v3  ;;  %v3738_v7 = vcombine.low %v602_v4, %v603_v6  ;;  %v3749_v18 = vld [vmem:[%s4094_s13 + $0x10] sm:$0xff]  ;;  %v3763_v32 = vld [vmem:[%s4094_s13 + $0x18] sm:$0xff]  ;;  %s3174_s24 = scalar_lea.vmem %s3173_s2, 1536 }
 0x105   : > { %2672 = vmatmul.mubr.msk.bf16.vlgmr.msra.gmra.mrb[0].mxu1 %vm641_vm0, %v3700_v21  ;;  %v3714_v26 = vcombine.low %v770_v24, %v771_v25  ;;  %v1213_v8 = vadd.bf16 %v602_v4, %v599_v2  ;;  %v1214_v9 = vadd.bf16 %v603_v6, %v600_v3  ;;  %v3756_v25 = vld [vmem:[%s4094_s13] sm:$0xff] }
 0x106   : > { %2666 = vmatmul.mubr.msk.bf16.vlgmr.msra.gmra.mrb[0].mxu0 %vm641_vm0, %v3698_v20  ;;  %2682 = vmatpush3.bf16.msra.mxu1 %v3718_v29 }
 0x107   : > { %2676 = vmatpush3.bf16.msra.mxu0 %v2495_v23  ;;  %2677 = vmatprep.mubr.msk.bf16.mxu0 %vm641_vm0, %v3704_v22  ;;  %v3744_v11 = vcombine.low %v1213_v8, %v1214_v9 }
 0x108   : > { %2687 = vmatprep.subr.bf16.mxu0 %v3722_v34  ;;  %2693 = vmatprep.subr.bf16.mxu1 %v3724_v35 }
 0x10e   : > { %2678 = vmatmul.mubr.msk.bf16.vlgmr.msra.gmra.mrb[4].mxu0 %vm641_vm0, %v3714_v26 }
 0x10f   : > { %2688 = vmatpush3.bf16.msra.mxu0 %v3722_v34 }
 0x1d8   : > { %v2673_v37 = vpop.f32.mrb[0].mxu1 }
 0x1d9   : > { %v2667_v36 = vpop.f32.mrb[0].mxu0  ;;  %v753_v40 = vpop.f32.mrb[1].mxu1 }
 0x1da   : > { %v682_v38 = vpop.f32.mrb[1].mxu0  ;;  %v847_v39 = vsub.f32 %v2667_v36, %v2673_v37  ;;  %v2674_v43 = vpop.f32.mrb[2].mxu1 }
 0x1db   : > { %v2668_v41 = vpop.f32.mrb[2].mxu0  ;;  %v845_v42 = vsub.f32 %v682_v38, %v753_v40  ;;  %v756_v46 = vpop.f32.mrb[3].mxu1 }
 0x1dc   : > { %v685_v44 = vpop.f32.mrb[3].mxu0  ;;  %v848_v45 = vsub.f32 %v2668_v41, %v2674_v43 }
 0x1dd   : > { %v846_v47 = vsub.f32 %v685_v44, %v756_v46 }
 0x1de   : > { %v858_v48 = vpack.c.bf16 %v848_v45, %v847_v39 }
 0x1df   : > { %v857_v49 = vpack.c.bf16 %v846_v47, %v845_v42  ;;  %v3772_v42 = vld [vmem:[%s4094_s13 + $0x8] sm:$0xff] }
 0x1e1   : > { %v2679_v50 = vpop.f32.mrb[4].mxu0  ;;  %2683 = vmatprep.mubr.msk.bf16.mxu1 %vm641_vm0, %v857_v49 }
 0x1e2   : > { %v851_v51 = vsub.f32 %v2679_v50, %v2667_v36  ;;  %v830_v52 = vpop.f32.mrb[5].mxu0  ;;  %2684 = vmatmul.mubr.msk.bf16.vlgmr.msra.gmra.mrb[4].mxu1 %vm641_vm0, %v858_v48 }
 0x1e3   : > { %v849_v53 = vsub.f32 %v830_v52, %v682_v38  ;;  %v2680_v54 = vpop.f32.mrb[6].mxu0  ;;  %2694 = vmatpush3.bf16.msra.mxu1 %v3724_v35 }
 0x1e4   : > { %v855_v55 = vsub.f32 %v851_v51, %v2673_v37  ;;  %v852_v56 = vsub.f32 %v2680_v54, %v2668_v41  ;;  %v833_v57 = vpop.f32.mrb[7].mxu0 }
 0x1e5   : > { %v853_v58 = vsub.f32 %v849_v53, %v753_v40  ;;  %v850_v59 = vsub.f32 %v833_v57, %v685_v44 }
 0x1e6   : > { %v856_v60 = vsub.f32 %v852_v56, %v2674_v43 }
 0x1e7   : > { %v854_v61 = vsub.f32 %v850_v59, %v756_v46 }
 0x1e8   : > { %v860_v62 = vpack.c.bf16 %v856_v60, %v855_v55 }
 0x1e9   : > { %v859_v63 = vpack.c.bf16 %v854_v61, %v853_v58 }
 0x1ea   : > { %v984_v0 = vadd.bf16 %v860_v62, %v858_v48 }
 0x1eb   : > { %v983_v1 = vadd.bf16 %v859_v63, %v857_v49  ;;  %2689 = vmatprep.mubr.msk.bf16.mxu0 %vm641_vm0, %v859_v63  ;;  %v3776_v49 = vld [vmem:[#allocation13 + $0x8] sm:$0xff] }
 0x1ec   : > { %2690 = vmatmul.mubr.msk.bf16.vlgmr.msra.gmra.mrb[8].mxu0 %vm641_vm0, %v860_v62 }
 0x1ed   : > { %2695 = vmatprep.mubr.msk.bf16.mxu1 %vm641_vm0, %v983_v1  ;;  %2703 = vmatprep.mubr.msk.bf16.mxu0 %vm1096_vm1, %v3736_v5 }
 0x1ee   : > { %2696 = vmatmul.mubr.msk.bf16.vlgmr.msra.gmra.mrb[8].mxu1 %vm641_vm0, %v984_v0 }
 0x1ef   : > { %2711 = vmatprep.mubr.msk.bf16.mxu1 %vm1096_vm1, %v3738_v7 }
 0x2b5   : > { %v2685_v12 = vpop.f32.mrb[4].mxu1 }
 0x2b6   : > { %v907_v13 = vpop.f32.mrb[5].mxu1 }
 0x2b7   : > { %v2686_v15 = vpop.f32.mrb[6].mxu1 }
 0x2b8   : > { %v910_v16 = vpop.f32.mrb[7].mxu1 }
 0x2bf   : > { %v2691_v17 = vpop.f32.mrb[8].mxu0 }
 0x2c0   : > { %v1050_v23 = vsub.f32 %v2685_v12, %v2691_v17  ;;  %v968_v24 = vpop.f32.mrb[9].mxu0 }
 0x2c1   : > { %v1048_v28 = vsub.f32 %v907_v13, %v968_v24  ;;  %v2692_v30 = vpop.f32.mrb[10].mxu0  ;;  %v2697_v31 = vpop.f32.mrb[8].mxu1 }
 0x2c2   : > { %v1051_v36 = vsub.f32 %v2686_v15, %v2692_v30  ;;  %v1054_v37 = vsub.f32 %v2697_v31, %v2685_v12  ;;  %v971_v38 = vpop.f32.mrb[11].mxu0  ;;  %v1033_v39 = vpop.f32.mrb[9].mxu1  ;;  %v1062_v40 = vmul.f32 %v1050_v23, %v3749_v18  ;;  %v1078_v41 = vmul.f32 %v1050_v23, %v3751_v19 }
 0x2c3   : > { %v1049_v43 = vsub.f32 %v910_v16, %v971_v38  ;;  %v1052_v44 = vsub.f32 %v1033_v39, %v907_v13  ;;  %v2698_v45 = vpop.f32.mrb[10].mxu1  ;;  %v1060_v46 = vmul.f32 %v1048_v28, %v3756_v25  ;;  %v1076_v47 = vmul.f32 %v1048_v28, %v3758_v27 }
 0x2c4   : > { %v1058_v48 = vsub.f32 %v1054_v37, %v2691_v17  ;;  %v1055_v50 = vsub.f32 %v2698_v45, %v2686_v15  ;;  %v1036_v51 = vpop.f32.mrb[11].mxu1  ;;  %v1063_v52 = vmul.f32 %v1051_v36, %v3763_v32  ;;  %v1079_v53 = vmul.f32 %v1051_v36, %v3765_v33  ;;  %v601_v36 = vld [vmem:[#allocation8 + $0x8] sm:$0xf]  ;;  %v604_v37 = vld [vmem:[#allocation10 + $0x8] sm:$0xf] }
 0x2c5   : > { %v1056_v54 = vsub.f32 %v1052_v44, %v968_v24  ;;  %v1053_v55 = vsub.f32 %v1036_v51, %v910_v16  ;;  %v1061_v58 = vmul.f32 %v1049_v43, %v3772_v42  ;;  %v1077_v60 = vmul.f32 %v1049_v43, %v3776_v49  ;;  %v605_v43 = vld [vmem:[#allocation11] sm:$0xf]  ;;  %v606_v44 = vld [vmem:[#allocation11 + $0x4] sm:$0xf]  ;;  %v610_v51 = vld [vmem:[%s4095_s22 + $0x4] sm:$0xf] }
 0x2c6   : > { %v1066_v56 = vmul.f32 %v1058_v48, %v3751_v19  ;;  %v1074_v57 = vmul.f32 %v1058_v48, %v3749_v18  ;;  %v1059_v59 = vsub.f32 %v1055_v50, %v2692_v30  ;;  %v3792_v39 = vcombine.low %v604_v37, %v604_v37  ;;  %v609_v50 = vld [vmem:[%s4095_s22] sm:$0xf] }
 0x2c7   : > { %v1064_v61 = vmul.f32 %v1056_v54, %v3758_v27  ;;  %v1072_v62 = vmul.f32 %v1056_v54, %v3756_v25  ;;  %v1057_v63 = vsub.f32 %v1053_v55, %v971_v38  ;;  %v3790_v38 = vcombine.low %v601_v36, %v601_v36 }
 0x2c8   : > { %v1067_v0 = vmul.f32 %v1059_v59, %v3765_v33  ;;  %v1075_v1 = vmul.f32 %v1059_v59, %v3763_v32  ;;  %v1070_v2 = vsub.f32 %v1062_v40, %v1066_v56  ;;  %v1082_v3 = vadd.f32 %v1078_v41, %v1074_v57  ;;  %v611_v56 = vld [vmem:[%s4095_s22 + $0x8] sm:$0xf]  ;;  %v612_v57 = vld [vmem:[%s4095_s22 + $0xc] sm:$0xf] }
 0x2c9   : > { %v1065_v4 = vmul.f32 %v1057_v63, %v3776_v49  ;;  %v1073_v6 = vmul.f32 %v1057_v63, %v3772_v42  ;;  %v1068_v8 = vsub.f32 %v1060_v46, %v1064_v61  ;;  %v1080_v9 = vadd.f32 %v1076_v47, %v1072_v62  ;;  %v607_v46 = vld [vmem:[#allocation11 + $0x8] sm:$0xf]  ;;  %v608_v47 = vld [vmem:[#allocation11 + $0xc] sm:$0xf]  ;;  %v2531_v62 = vld [vmem:[%s3664_s20 + $0x8] sm:$0xf] }
 0x2ca   : > { %v1071_v12 = vsub.f32 %v1063_v52, %v1067_v0  ;;  %v1083_v13 = vadd.f32 %v1079_v53, %v1075_v1  ;;  %v1215_v40 = vadd.bf16 %v604_v37, %v601_v36  ;;  %v3804_v45 = vcombine.low %v605_v43, %v606_v44  ;;  %v2532_v63 = vld [vmem:[%s3664_s20 + $0xc] sm:$0xf]  ;;  %v2533_v1 = vld [vmem:[%s3642_s23 + $0x8] sm:$0xf] }
 0x2cb   : > { %v1069_v15 = vsub.f32 %v1061_v58, %v1065_v4  ;;  %v1081_v16 = vadd.f32 %v1077_v60, %v1073_v6  ;;  %v3808_v48 = vcombine.low %v607_v46, %v608_v47  ;;  %v3818_v52 = vcombine.low %v609_v50, %v610_v51 }
 0x2cc   : > { %v1085_v17 = vpack.c.bf16 %v1071_v12, %v1070_v2  ;;  %v1087_v23 = vpack.c.bf16 %v1083_v13, %v1082_v3  ;;  %v3800_v41 = vcombine.low %v1215_v40, %v1215_v40  ;;  %v1427_v53 = vadd.bf16 %v609_v50, %v605_v43  ;;  %v2534_v2 = vld [vmem:[%s3642_s23 + $0xc] sm:$0xf]  ;;  %s2831_s23 = smul.u32 48, %s3638_s18 }
 0x2cd   : > { %v1084_v24 = vpack.c.bf16 %v1069_v15, %v1068_v8  ;;  %v1086_v28 = vpack.c.bf16 %v1081_v16, %v1080_v9  ;;  %v1428_v54 = vadd.bf16 %v610_v51, %v606_v44  ;;  %v3831_v58 = vcombine.low %v611_v56, %v612_v57 }
 0x2ce   : > { %v1217_v30 = vadd.bf16 %v1087_v23, %v1085_v17  ;;  %v1429_v59 = vadd.bf16 %v611_v56, %v607_v46  ;;  %v1430_v60 = vadd.bf16 %v612_v57, %v608_v47  ;;  %v2535_v0 = vcombine.low %v2531_v62, %v2532_v63  ;;  %s3868_s20 = scalar_lea.vmem [#allocation14], %s2831_s23  ;;  %s3873_s4 = scalar_lea.vmem [#allocation15], %s2831_s23 }
 0x2cf   : > { %2699 = vmatprep.subr.bf16.mxu0 %v1084_v24  ;;  %2707 = vmatprep.subr.bf16.mxu1 %v1086_v28  ;;  %v1216_v31 = vadd.bf16 %v1086_v28, %v1084_v24  ;;  %v3821_v55 = vcombine.low %v1427_v53, %v1428_v54  ;;  %v1628_v3 = vadd.bf16 %v2533_v1, %v2531_v62  ;;  %s2268_s15 = sshll.u32 %s3868_s20, 4  ;;  %s2285_s12 = sshll.u32 %s3873_s4, 4  ;;  %s3933_s15 = int_to_ptr.vmem [resolvable:$true] %s2268_s15  ;;  %s3945_s12 = int_to_ptr.vmem [resolvable:$true] %s2285_s12 }
 0x2d0   : > { %2700 = vmatpush3.bf16.msra.mxu0 %v1084_v24  ;;  %2708 = vmatpush3.bf16.msra.mxu1 %v1086_v28  ;;  %v3834_v61 = vcombine.low %v1429_v59, %v1430_v60  ;;  %v1629_v4 = vadd.bf16 %v2534_v2, %v2532_v63  ;;  %v2538_v51 = vcombine.low %v2533_v1, %v2534_v2  ;;  %s3168_s0 = scalar_lea.vmem %s3933_s15, 768  ;;  %p3175_p0 = scmp.lt.s32.totalorder %s3933_s15, %s3173_s2 }
 0x2d1   : > { %2701 = vmatprep.subr.bf16.mxu0 %v1085_v17  ;;  %2709 = vmatprep.subr.bf16.mxu1 %v1087_v23  ;;  %p3169_p9 = scmp.ne.s32.totalorder %s3933_s15, %s3168_s0  ;;  %p3176_p2 = scmp.lt.s32.totalorder %s3174_s24, %s3168_s0 }
 0x2d2   : > { %v2541_v6 = vcombine.low %v1628_v3, %v1629_v4 }
 0x2d3   : > { %p3170_p1 = pnand %p3169_p9, %p4097_p12  ;;  %p3177_p8 = por %p3176_p2, %p3175_p0 }
 0x2d4   : > { %2702 = vmatpush3.bf16.msra.mxu0 %v1085_v17  ;;  %2710 = vmatpush3.bf16.msra.mxu1 %v1087_v23 }
 0x2d5   : > { %2715 = vmatprep.subr.bf16.mxu0 %v1216_v31  ;;  %2723 = vmatprep.subr.bf16.mxu1 %v3804_v45  ;;  %p3171_p13 = pneg %p3170_p1 }
 0x2d7   : > { %2704 = vmatmul.mubr.msk.bf16.vlgmr.msra.gmra.mrb[12].mxu0 %vm1096_vm1, %v3790_v38  ;;  %2712 = vmatmul.mubr.msk.bf16.vlgmr.msra.gmra.mrb[12].mxu1 %vm1096_vm1, %v3792_v39  ;;  %p3178_p4 = pnand %p3177_p8, %p3171_p13 }
 0x2d8   : > { %2716 = vmatpush3.bf16.msra.mxu0 %v1216_v31  ;;  %2719 = vmatprep.mubr.msk.bf16.mxu0 %vm1096_vm1, %v3744_v11 }
 0x2d9   : > { %2717 = vmatprep.subr.bf16.mxu0 %v1217_v30  ;;  %2724 = vmatpush3.bf16.msra.mxu1 %v3804_v45 }
 0x2da   : > { %2725 = vmatprep.subr.bf16.mxu1 %v3808_v48 }
 0x2dc   : > { %2718 = vmatpush3.bf16.msra.mxu0 %v1217_v30 }
 0x2dd   : > { %2726 = vmatpush3.bf16.msra.mxu1 %v3808_v48  ;;  %2731 = vmatprep.subr.bf16.mxu0 %v3818_v52 }
 0x2de   : > { %2739 = vmatprep.subr.bf16.mxu1 %v3821_v55 }
 0x2df   : > { %2720 = vmatmul.mubr.msk.bf16.vlgmr.msra.gmra.mrb[16].mxu0 %vm1096_vm1, %v3800_v41 }
 0x2e0   : > { %2732 = vmatpush3.bf16.msra.mxu0 %v3818_v52 }
 0x2e1   : > { %2733 = vmatprep.subr.bf16.mxu0 %v3831_v58 }
 0x2e4   : > { %2734 = vmatpush3.bf16.msra.mxu0 %v3831_v58 }
 0x2e5   : > { %2747 = vmatprep.subr.bf16.mxu0 %v2535_v0 }
 0x3aa   : > { %v2705_v8 = vpop.f32.mrb[12].mxu0  ;;  %v2713_v9 = vpop.f32.mrb[12].mxu1 }
 0x3ab   : > { %v1282_v12 = vsub.f32 %v2705_v8, %v2713_v9  ;;  %v1137_v13 = vpop.f32.mrb[13].mxu0  ;;  %v1199_v15 = vpop.f32.mrb[13].mxu1 }
 0x3ac   : > { %v1280_v16 = vsub.f32 %v1137_v13, %v1199_v15  ;;  %v2706_v17 = vpop.f32.mrb[14].mxu0  ;;  %v2714_v23 = vpop.f32.mrb[14].mxu1 }
 0x3ad   : > { %v1140_v24 = vpop.f32.mrb[15].mxu0  ;;  %v1202_v28 = vpop.f32.mrb[15].mxu1  ;;  %v1290_v36 = vpack.c.bf16 %v1282_v12, %v1282_v12 }
 0x3ae   : > { %v1281_v30 = vsub.f32 %v1140_v24, %v1202_v28 }
 0x3b0   : > { %v1289_v31 = vpack.c.bf16 %v1281_v30, %v1280_v16 }
 0x3b2   : > { %v2721_v37 = vpop.f32.mrb[16].mxu0  ;;  %2727 = vmatprep.mubr.msk.bf16.mxu1 %vm1096_vm1, %v1289_v31 }
 0x3b3   : > { %v1285_v40 = vsub.f32 %v2721_v37, %v2705_v8  ;;  %v1266_v43 = vpop.f32.mrb[17].mxu0  ;;  %2728 = vmatmul.mubr.msk.bf16.vlgmr.msra.gmra.mrb[16].mxu1 %vm1096_vm1, %v1290_v36 }
 0x3b4   : > { %v1283_v44 = vsub.f32 %v1266_v43, %v1137_v13  ;;  %v2722_v46 = vpop.f32.mrb[18].mxu0  ;;  %2740 = vmatpush3.bf16.msra.mxu1 %v3821_v55 }
 0x3b5   : > { %v1288_v47 = vsub.f32 %v1285_v40, %v2713_v9  ;;  %v1269_v50 = vpop.f32.mrb[19].mxu0  ;;  %2741 = vmatprep.subr.bf16.mxu1 %v3834_v61 }
 0x3b6   : > { %v1286_v53 = vsub.f32 %v1283_v44, %v1199_v15  ;;  %v1284_v54 = vsub.f32 %v1269_v50, %v1140_v24 }
 0x3b7   : > { %v1292_v56 = vpack.c.bf16 %v1288_v47, %v1288_v47 }
 0x3b8   : > { %v1287_v57 = vsub.f32 %v1284_v54, %v1202_v28  ;;  %2742 = vmatpush3.bf16.msra.mxu1 %v3834_v61 }
 0x3b9   : > { %v1426_v59 = vadd.bf16 %v1292_v56, %v1290_v36  ;;  %2753 = vmatprep.subr.bf16.mxu1 %v2538_v51 }
 0x3ba   : > { %v1291_v60 = vpack.c.bf16 %v1287_v57, %v1286_v53 }
 0x3bc   : > { %v1425_v62 = vadd.bf16 %v1291_v60, %v1289_v31  ;;  %2735 = vmatprep.mubr.msk.bf16.mxu0 %vm1096_vm1, %v1291_v60 }
 0x3bd   : > { %2736 = vmatmul.mubr.msk.bf16.vlgmr.msra.gmra.mrb[20].mxu0 %vm1096_vm1, %v1292_v56 }
 0x3be   : > { %2743 = vmatprep.mubr.msk.bf16.mxu1 %vm1096_vm1, %v1425_v62  ;;  %2748 = vmatpush3.bf16.msra.mxu0 %v2535_v0 }
 0x3bf   : > { %2744 = vmatmul.mubr.msk.bf16.vlgmr.msra.gmra.mrb[20].mxu1 %vm1096_vm1, %v1426_v59  ;;  %2749 = vmatprep.mubr.msk.bf16.mxu0 %vm641_vm0, %v3676_v10 }
 0x3c0   : > { %2754 = vmatpush3.bf16.msra.mxu1 %v2538_v51  ;;  %2759 = vmatprep.subr.bf16.mxu0 %v2541_v6 }
 0x3c1   : > { %2755 = vmatprep.mubr.msk.bf16.mxu1 %vm641_vm0, %v3687_v14  ;;  %2765 = vmatprep.subr.bf16.mxu1 %v3718_v29 }
 0x3c5   : > { %2750 = vmatmul.mubr.msk.bf16.vlgmr.msra.gmra.mrb[24].mxu0 %vm641_vm0, %v3698_v20 }
 0x3c6   : > { %2760 = vmatpush3.bf16.msra.mxu0 %v2541_v6  ;;  %2761 = vmatprep.mubr.msk.bf16.mxu0 %vm641_vm0, %v3704_v22 }
 0x3c7   : > { %2756 = vmatmul.mubr.msk.bf16.vlgmr.msra.gmra.mrb[24].mxu1 %vm641_vm0, %v3700_v21  ;;  %2771 = vmatprep.subr.bf16.mxu0 %v3722_v34 }
 0x3c8   : > { %2766 = vmatpush3.bf16.msra.mxu1 %v3718_v29 }
 0x3c9   : > { %2777 = vmatprep.subr.bf16.mxu1 %v3724_v35 }
 0x3cd   : > { %2762 = vmatmul.mubr.msk.bf16.vlgmr.msra.gmra.mrb[28].mxu0 %vm641_vm0, %v3714_v26 }
 0x3ce   : > { %2772 = vmatpush3.bf16.msra.mxu0 %v3722_v34 }
 0x486   : > { %v2729_v10 = vpop.f32.mrb[16].mxu1 }
 0x487   : > { %v1345_v14 = vpop.f32.mrb[17].mxu1 }
 0x488   : > { %v2730_v20 = vpop.f32.mrb[18].mxu1 }
 0x489   : > { %v1348_v63 = vpop.f32.mrb[19].mxu1 }
 0x490   : > { %v2737_v22 = vpop.f32.mrb[20].mxu0 }
 0x491   : > { %v1499_v0 = vsub.f32 %v2729_v10, %v2737_v22  ;;  %v1411_v1 = vpop.f32.mrb[21].mxu0 }
 0x492   : > { %v1497_v21 = vsub.f32 %v1345_v14, %v1411_v1  ;;  %v2738_v2 = vpop.f32.mrb[22].mxu0  ;;  %v2745_v3 = vpop.f32.mrb[20].mxu1 }
 0x493   : > { %1508 = vst [vmem:[%s3868_s20 + $0x10] sm:$0xff] %v1499_v0  ;;  %v1502_v26 = vsub.f32 %v2745_v3, %v2729_v10  ;;  %v1414_v29 = vpop.f32.mrb[23].mxu0  ;;  %v1483_v34 = vpop.f32.mrb[21].mxu1 }
 0x494   : > { %1506 = vst [vmem:[%s3868_s20] sm:$0xff] %v1497_v21  ;;  %v1498_v4 = vsub.f32 %v1348_v63, %v1414_v29  ;;  %v1500_v6 = vsub.f32 %v1483_v34, %v1345_v14  ;;  %v2746_v8 = vpop.f32.mrb[22].mxu1 }
 0x495   : > { %v1505_v9 = vsub.f32 %v1502_v26, %v2737_v22  ;;  %v1486_v12 = vpop.f32.mrb[23].mxu1 }
 0x496   : > { %1507 = vst [vmem:[%s3868_s20 + $0x8] sm:$0xff] %v1498_v4  ;;  %v1503_v13 = vsub.f32 %v1500_v6, %v1411_v1  ;;  %v1501_v15 = vsub.f32 %v1486_v12, %v1348_v63 }
 0x497   : > { %1511 = vst [vmem:[%s3873_s4 + $0x10] sm:$0xff] %v1505_v9 }
 0x498   : > { %1509 = vst [vmem:[%s3873_s4] sm:$0xff] %v1503_v13  ;;  %v1504_v16 = vsub.f32 %v1501_v15, %v1414_v29  ;;  %v2751_v17 = vpop.f32.mrb[24].mxu0 }
 0x499   : > { %v1558_v23 = vpop.f32.mrb[25].mxu0 }
 0x49a   : > { %1510 = vst [vmem:[%s3873_s4 + $0x8] sm:$0xff] %v1504_v16  ;;  %v2752_v24 = vpop.f32.mrb[26].mxu0  ;;  %v2757_v28 = vpop.f32.mrb[24].mxu1 }
 0x49b   : > { %v1687_v30 = vsub.f32 %v2751_v17, %v2757_v28  ;;  %v1561_v31 = vpop.f32.mrb[27].mxu0  ;;  %v1613_v36 = vpop.f32.mrb[25].mxu1 }
 0x49c   : > { %v1685_v37 = vsub.f32 %v1558_v23, %v1613_v36  ;;  %v2758_v40 = vpop.f32.mrb[26].mxu1 }
 0x49d   : > { %v1688_v43 = vsub.f32 %v2752_v24, %v2758_v40  ;;  %v1616_v44 = vpop.f32.mrb[27].mxu1 }
 0x49e   : > { %v1686_v46 = vsub.f32 %v1561_v31, %v1616_v44 }
 0x49f   : > { %v1698_v47 = vpack.c.bf16 %v1688_v43, %v1687_v30 }
 0x4a0   : > { %v1697_v50 = vpack.c.bf16 %v1686_v46, %v1685_v37  ;;  %v2763_v51 = vpop.f32.mrb[28].mxu0 }
 0x4a1   : > { %v1691_v53 = vsub.f32 %v2763_v51, %v2751_v17  ;;  %v1670_v54 = vpop.f32.mrb[29].mxu0 }
 0x4a2   : > { %v1689_v56 = vsub.f32 %v1670_v54, %v1558_v23  ;;  %v2764_v57 = vpop.f32.mrb[30].mxu0  ;;  %2767 = vmatprep.mubr.msk.bf16.mxu1 %vm641_vm0, %v1697_v50 }
 0x4a3   : > { %v1695_v59 = vsub.f32 %v1691_v53, %v2757_v28  ;;  %v1692_v60 = vsub.f32 %v2764_v57, %v2752_v24  ;;  %v1673_v62 = vpop.f32.mrb[31].mxu0  ;;  %2768 = vmatmul.mubr.msk.bf16.vlgmr.msra.gmra.mrb[28].mxu1 %vm641_vm0, %v1698_v47 }
 0x4a4   : > { %v1693_v10 = vsub.f32 %v1689_v56, %v1613_v36  ;;  %v1690_v14 = vsub.f32 %v1673_v62, %v1561_v31  ;;  %2778 = vmatpush3.bf16.msra.mxu1 %v3724_v35 }
 0x4a5   : > { %v1696_v20 = vsub.f32 %v1692_v60, %v2758_v40 }
 0x4a6   : > { %v1694_v63 = vsub.f32 %v1690_v14, %v1616_v44 }
 0x4a7   : > { %v1700_v22 = vpack.c.bf16 %v1696_v20, %v1695_v59 }
 0x4a8   : > { %v1699_v0 = vpack.c.bf16 %v1694_v63, %v1693_v10 }
 0x4a9   : > { %v1812_v1 = vadd.bf16 %v1700_v22, %v1698_v47 }
 0x4aa   : > { %v1811_v21 = vadd.bf16 %v1699_v0, %v1697_v50  ;;  %2773 = vmatprep.mubr.msk.bf16.mxu0 %vm641_vm0, %v1699_v0 }
 0x4ab   : > { %2774 = vmatmul.mubr.msk.bf16.vlgmr.msra.gmra.mrb[32].mxu0 %vm641_vm0, %v1700_v22 }
 0x4ac   : > { %2779 = vmatprep.mubr.msk.bf16.mxu1 %vm641_vm0, %v1811_v21  ;;  %2787 = vmatprep.mubr.msk.bf16.mxu0 %vm1096_vm1, %v3736_v5 }
 0x4ad   : > { %2780 = vmatmul.mubr.msk.bf16.vlgmr.msra.gmra.mrb[32].mxu1 %vm641_vm0, %v1812_v1 }
 0x4ae   : > { %2795 = vmatprep.mubr.msk.bf16.mxu1 %vm1096_vm1, %v3738_v7 }
 0x576   : > { %v2769_v35 = vpop.f32.mrb[28].mxu1 }
 0x577   : > { %v1741_v2 = vpop.f32.mrb[29].mxu1 }
 0x578   : > { %v2770_v3 = vpop.f32.mrb[30].mxu1 }
 0x579   : > { %v1744_v26 = vpop.f32.mrb[31].mxu1 }
 0x57e   : > { %v2775_v29 = vpop.f32.mrb[32].mxu0 }
 0x57f   : > { %v1870_v34 = vsub.f32 %v2769_v35, %v2775_v29  ;;  %v1796_v4 = vpop.f32.mrb[33].mxu0 }
 0x580   : > { %v1868_v6 = vsub.f32 %v1741_v2, %v1796_v4  ;;  %v2776_v8 = vpop.f32.mrb[34].mxu0  ;;  %v2781_v9 = vpop.f32.mrb[32].mxu1 }
 0x581   : > { %v1871_v12 = vsub.f32 %v2770_v3, %v2776_v8  ;;  %v1874_v13 = vsub.f32 %v2781_v9, %v2769_v35  ;;  %v1799_v15 = vpop.f32.mrb[35].mxu0  ;;  %v1853_v16 = vpop.f32.mrb[33].mxu1  ;;  %v1882_v5 = vmul.f32 %v1870_v34, %v3749_v18  ;;  %v1898_v17 = vmul.f32 %v1870_v34, %v3751_v19 }
 0x582   : > { %v1869_v23 = vsub.f32 %v1744_v26, %v1799_v15  ;;  %v1872_v7 = vsub.f32 %v1853_v16, %v1741_v2  ;;  %v2782_v24 = vpop.f32.mrb[34].mxu1  ;;  %v1880_v28 = vmul.f32 %v1868_v6, %v3756_v25  ;;  %v1896_v30 = vmul.f32 %v1868_v6, %v3758_v27 }
 0x583   : > { %v1878_v31 = vsub.f32 %v1874_v13, %v2775_v29  ;;  %v1875_v36 = vsub.f32 %v2782_v24, %v2770_v3  ;;  %v1856_v37 = vpop.f32.mrb[35].mxu1  ;;  %v1883_v40 = vmul.f32 %v1871_v12, %v3763_v32  ;;  %v1899_v43 = vmul.f32 %v1871_v12, %v3765_v33 }
 0x584   : > { %v1876_v44 = vsub.f32 %v1872_v7, %v1796_v4  ;;  %v1873_v46 = vsub.f32 %v1856_v37, %v1744_v26  ;;  %v1881_v51 = vmul.f32 %v1869_v23, %v3772_v42  ;;  %v1897_v54 = vmul.f32 %v1869_v23, %v3776_v49 }
 0x585   : > { %v1886_v47 = vmul.f32 %v1878_v31, %v3751_v19  ;;  %v1894_v50 = vmul.f32 %v1878_v31, %v3749_v18  ;;  %v1879_v53 = vsub.f32 %v1875_v36, %v2776_v8 }
 0x586   : > { %v1884_v56 = vmul.f32 %v1876_v44, %v3758_v27  ;;  %v1892_v57 = vmul.f32 %v1876_v44, %v3756_v25  ;;  %v1877_v59 = vsub.f32 %v1873_v46, %v1799_v15 }
 0x587   : > { %v1887_v60 = vmul.f32 %v1879_v53, %v3765_v33  ;;  %v1895_v62 = vmul.f32 %v1879_v53, %v3763_v32  ;;  %v1890_v10 = vsub.f32 %v1882_v5, %v1886_v47  ;;  %v1902_v14 = vadd.f32 %v1898_v17, %v1894_v50 }
 0x588   : > { %v1885_v19 = vmul.f32 %v1877_v59, %v3776_v49  ;;  %v1893_v18 = vmul.f32 %v1877_v59, %v3772_v42  ;;  %v1888_v20 = vsub.f32 %v1880_v28, %v1884_v56  ;;  %v1900_v63 = vadd.f32 %v1896_v30, %v1892_v57 }
 0x589   : > { %v1891_v22 = vsub.f32 %v1883_v40, %v1887_v60  ;;  %v1903_v0 = vadd.f32 %v1899_v43, %v1895_v62 }
 0x58a   : > { %v1889_v1 = vsub.f32 %v1881_v51, %v1885_v19  ;;  %v1901_v21 = vadd.f32 %v1897_v54, %v1893_v18 }
 0x58b   : > { %v1905_v27 = vpack.c.bf16 %v1891_v22, %v1890_v10  ;;  %v1907_v35 = vpack.c.bf16 %v1903_v0, %v1902_v14 }
 0x58c   : > { %v1904_v25 = vpack.c.bf16 %v1889_v1, %v1888_v20  ;;  %v1906_v2 = vpack.c.bf16 %v1901_v21, %v1900_v63 }
 0x58d   : > { %v2005_v3 = vadd.bf16 %v1907_v35, %v1905_v27 }
 0x58e   : > { %2783 = vmatprep.subr.bf16.mxu0 %v1904_v25  ;;  %2791 = vmatprep.subr.bf16.mxu1 %v1906_v2  ;;  %v2004_v32 = vadd.bf16 %v1906_v2, %v1904_v25 }
 0x58f   : > { %2784 = vmatpush3.bf16.msra.mxu0 %v1904_v25  ;;  %2792 = vmatpush3.bf16.msra.mxu1 %v1906_v2 }
 0x590   : > { %2785 = vmatprep.subr.bf16.mxu0 %v1905_v27  ;;  %2793 = vmatprep.subr.bf16.mxu1 %v1907_v35 }
 0x593   : > { %2786 = vmatpush3.bf16.msra.mxu0 %v1905_v27  ;;  %2794 = vmatpush3.bf16.msra.mxu1 %v1907_v35 }
 0x594   : > { %2799 = vmatprep.subr.bf16.mxu0 %v2004_v32  ;;  %2807 = vmatprep.subr.bf16.mxu1 %v3804_v45 }
 0x596   : > { %2788 = vmatmul.mubr.msk.bf16.vlgmr.msra.gmra.mrb[36].mxu0 %vm1096_vm1, %v3790_v38  ;;  %2796 = vmatmul.mubr.msk.bf16.vlgmr.msra.gmra.mrb[36].mxu1 %vm1096_vm1, %v3792_v39 }
 0x597   : > { %2800 = vmatpush3.bf16.msra.mxu0 %v2004_v32  ;;  %2803 = vmatprep.mubr.msk.bf16.mxu0 %vm1096_vm1, %v3744_v11 }
 0x598   : > { %2801 = vmatprep.subr.bf16.mxu0 %v2005_v3  ;;  %2808 = vmatpush3.bf16.msra.mxu1 %v3804_v45 }
 0x599   : > { %2809 = vmatprep.subr.bf16.mxu1 %v3808_v48 }
 0x59b   : > { %2802 = vmatpush3.bf16.msra.mxu0 %v2005_v3 }
 0x59c   : > { %2810 = vmatpush3.bf16.msra.mxu1 %v3808_v48  ;;  %2815 = vmatprep.subr.bf16.mxu0 %v3818_v52 }
 0x59d   : > { %2823 = vmatprep.subr.bf16.mxu1 %v3821_v55 }
 0x59e   : > { %2804 = vmatmul.mubr.msk.bf16.vlgmr.msra.gmra.mrb[40].mxu0 %vm1096_vm1, %v3800_v41 }
 0x59f   : > { %2816 = vmatpush3.bf16.msra.mxu0 %v3818_v52 }
 0x5a0   : > { %2817 = vmatprep.subr.bf16.mxu0 %v3831_v58 }
 0x5a3   : > { %2818 = vmatpush3.bf16.msra.mxu0 %v3831_v58 }
 0x669   : > { %v2789_v11 = vpop.f32.mrb[36].mxu0  ;;  %v2797_v33 = vpop.f32.mrb[36].mxu1 }
 0x66a   : > { %v2056_v42 = vsub.f32 %v2789_v11, %v2797_v33  ;;  %v1942_v49 = vpop.f32.mrb[37].mxu0  ;;  %v1990_v38 = vpop.f32.mrb[37].mxu1 }
 0x66b   : > { %v2054_v39 = vsub.f32 %v1942_v49, %v1990_v38  ;;  %v2790_v45 = vpop.f32.mrb[38].mxu0  ;;  %v2798_v48 = vpop.f32.mrb[38].mxu1 }
 0x66c   : > { %v1945_v26 = vpop.f32.mrb[39].mxu0  ;;  %v1993_v29 = vpop.f32.mrb[39].mxu1  ;;  %v2064_v6 = vpack.c.bf16 %v2056_v42, %v2056_v42 }
 0x66d   : > { %v2055_v34 = vsub.f32 %v1945_v26, %v1993_v29 }
 0x66f   : > { %v2063_v4 = vpack.c.bf16 %v2055_v34, %v2054_v39 }
 0x671   : > { %v2805_v41 = vpop.f32.mrb[40].mxu0  ;;  %2811 = vmatprep.mubr.msk.bf16.mxu1 %vm1096_vm1, %v2063_v4 }
 0x672   : > { %v2059_v52 = vsub.f32 %v2805_v41, %v2789_v11  ;;  %v2040_v8 = vpop.f32.mrb[41].mxu0  ;;  %2812 = vmatmul.mubr.msk.bf16.vlgmr.msra.gmra.mrb[40].mxu1 %vm1096_vm1, %v2064_v6 }
 0x673   : > { %v2057_v58 = vsub.f32 %v2040_v8, %v1942_v49  ;;  %v2806_v9 = vpop.f32.mrb[42].mxu0  ;;  %2824 = vmatpush3.bf16.msra.mxu1 %v3821_v55 }
 0x674   : > { %v2062_v12 = vsub.f32 %v2059_v52, %v2797_v33  ;;  %v2043_v13 = vpop.f32.mrb[43].mxu0  ;;  %2825 = vmatprep.subr.bf16.mxu1 %v3834_v61 }
 0x675   : > { %v2060_v15 = vsub.f32 %v2057_v58, %v1990_v38  ;;  %v2058_v16 = vsub.f32 %v2043_v13, %v1945_v26 }
 0x676   : > { %v2066_v5 = vpack.c.bf16 %v2062_v12, %v2062_v12 }
 0x677   : > { %v2061_v17 = vsub.f32 %v2058_v16, %v1993_v29  ;;  %2826 = vmatpush3.bf16.msra.mxu1 %v3834_v61 }
 0x678   : > { %v2176_v23 = vadd.bf16 %v2066_v5, %v2064_v6 }
 0x679   : > { %v2065_v7 = vpack.c.bf16 %v2061_v17, %v2060_v15 }
 0x67b   : > { %v2175_v24 = vadd.bf16 %v2065_v7, %v2063_v4  ;;  %2819 = vmatprep.mubr.msk.bf16.mxu0 %vm1096_vm1, %v2065_v7 }
 0x67c   : > { %2820 = vmatmul.mubr.msk.bf16.vlgmr.msra.gmra.mrb[44].mxu0 %vm1096_vm1, %v2066_v5 }
 0x67d   : > { %2827 = vmatprep.mubr.msk.bf16.mxu1 %vm1096_vm1, %v2175_v24 }
 0x67e   : > { %2828 = vmatmul.mubr.msk.bf16.vlgmr.msra.gmra.mrb[44].mxu1 %vm1096_vm1, %v2176_v23 }
 0x745   : > { %v2813_v55 = vpop.f32.mrb[40].mxu1 }
 0x746   : > { %v2107_v28 = vpop.f32.mrb[41].mxu1 }
 0x747   : > { %v2814_v30 = vpop.f32.mrb[42].mxu1 }
 0x748   : > { %v2110_v31 = vpop.f32.mrb[43].mxu1 }
 0x74f   : > { %v2821_v61 = vpop.f32.mrb[44].mxu0 }
 0x750   : > { %v2233_v36 = vsub.f32 %v2813_v55, %v2821_v61  ;;  %v2161_v37 = vpop.f32.mrb[45].mxu0 }
 0x751   : > { %v2231_v40 = vsub.f32 %v2107_v28, %v2161_v37  ;;  %v2822_v43 = vpop.f32.mrb[46].mxu0  ;;  %v2829_v44 = vpop.f32.mrb[44].mxu1 }
 0x752   : > { %2564 = vst [vmem:[%s3868_s20 + $0x28] sm:$0xff] %v2233_v36  ;;  %v2236_v46 = vsub.f32 %v2829_v44, %v2813_v55  ;;  %v2164_v47 = vpop.f32.mrb[47].mxu0  ;;  %v2217_v50 = vpop.f32.mrb[45].mxu1 }
 0x753   : > { %2562 = vst [vmem:[%s3868_s20 + $0x18] sm:$0xff] %v2231_v40  ;;  %v2232_v51 = vsub.f32 %v2110_v31, %v2164_v47  ;;  %v2234_v53 = vsub.f32 %v2217_v50, %v2107_v28  ;;  %v2830_v54 = vpop.f32.mrb[46].mxu1 }
 0x754   : > { %v2239_v56 = vsub.f32 %v2236_v46, %v2821_v61  ;;  %v2220_v57 = vpop.f32.mrb[47].mxu1 }
 0x755   : > { %2563 = vst [vmem:[%s3868_s20 + $0x20] sm:$0xff] %v2232_v51  ;;  %v2237_v59 = vsub.f32 %v2234_v53, %v2161_v37  ;;  %v2235_v60 = vsub.f32 %v2220_v57, %v2110_v31 }
 0x756   : > { %2567 = vst [vmem:[%s3873_s4 + $0x28] sm:$0xff] %v2239_v56 }
 0x757   : > { %3181 = shalt.err (!%p3178_p4)
}
 0x758   : > { %s3182_s20 = scalar_lea.hbm %s3943_s16, 768  ;;  %s3186_s1 = scalar_lea.hbm %s4096_s10, 1536 }
 0x759   : > { %p3183_p10 = scmp.ne.s32.totalorder %s3943_s16, %s3182_s20  ;;  %p3187_p5 = scmp.lt.u32.totalorder %s3943_s16, %s4096_s10 }
 0x75a   : > { %p3188_p7 = scmp.lt.u32.totalorder %s3186_s1, %s3182_s20  ;;  %p3190_p9 = scmp.lt.u32.totalorder %s3182_s20, %s3943_s16 }
 0x75b   : > { %p3184_p11 = pnand %p3183_p10, %p4097_p12 }
 0x75c   : > { %p3189_p6 = por %p3188_p7, %p3187_p5 }
 0x75d   : > { %p3185_p3 = pneg %p3184_p11 }
 0x75e   : > { %p3191_p1 = por %p3190_p9, %p3189_p6 }
 0x760   : > { %p3192_p13 = pnand %p3191_p1, %p3185_p3 }
 0x762   : > { %3195 = shalt.err (!%p3192_p13)
}
 0x763   : > { %s3292_s0 = smov 128   ;;  %s3293_s3 = smov 8   ;;  %2565 = vst [vmem:[%s3873_s4 + $0x18] sm:$0xff] %v2237_v59  ;;  %v2238_v62 = vsub.f32 %v2235_v60, %v2164_v47 }
 0x764   : > { %s4098_s23 = scalar_lea.sflag [#allocation4], %s3638_s18  ;;  %s4099_s24 = smul.u32 768, %s3386_s14 }
 0x765   : > { %2860 = dma.vmem_to_hbm [thread:$0]  (%p4097_p12), %s3933_s15, 768, %s3943_s16, %s4098_s23, %s3292_s0, %s3292_s0, %s3293_s3  }
 0x766   : > { %s4100_s1 = sld [smem:[#allocation35_spill]]  ;;  %2566 = vst [vmem:[%s3873_s4 + $0x20] sm:$0xff] %v2238_v62  ;;  %s2254_s5 = scalar_lea.sflag [#allocation16], %s3638_s18 }
 0x767   : > { %s3196_s6 = scalar_lea.vmem %s3945_s12, 768  ;;  %s3294_s7 = smov [#allocation15]  }
 0x768   : > { %p3197_p0 = scmp.ne.s32.totalorder %s3945_s12, %s3196_s6  ;;  %s3200_s8 = sshll.u32 %s3294_s7, 4  ;;  %s3201_s8 = int_to_ptr.vmem [resolvable:$false] %s3200_s8 }
 0x769   : > { %s3202_s10 = scalar_lea.vmem %s3201_s8, 1536  ;;  %p3203_p4 = scmp.lt.s32.totalorder %s3945_s12, %s3201_s8 }
 0x76a   : > { %p3198_p2 = pnand %p3197_p0, %p4097_p12  ;;  %p3204_p10 = scmp.lt.s32.totalorder %s3202_s10, %s3196_s6 }
 0x76c   : > { %s3982_s2 = scalar_lea.hbm %s4100_s1, %s4099_s24  ;;  %p3199_p8 = pneg %p3198_p2 }
 0x76d   : > { %p3205_p11 = por %p3204_p10, %p3203_p4 }
 0x76f   : > { %p3206_p3 = pnand %p3205_p11, %p3199_p8 }
 0x771   : > { %3209 = shalt.err (!%p3206_p3)
}
 0x772   : > { %s3210_s14 = scalar_lea.hbm %s3982_s2, 768  ;;  %s3214_s7 = scalar_lea.hbm %s4100_s1, 1536 }
 0x773   : > { %p3211_p5 = scmp.ne.s32.totalorder %s3982_s2, %s3210_s14  ;;  %p3215_p9 = scmp.lt.u32.totalorder %s3982_s2, %s4100_s1 }
 0x774   : > { %p3216_p1 = scmp.lt.u32.totalorder %s3214_s7, %s3210_s14  ;;  %p3218_p0 = scmp.lt.u32.totalorder %s3210_s14, %s3982_s2 }
 0x775   : > { %p3212_p7 = pnand %p3211_p5, %p4097_p12 }
 0x776   : > { %p3217_p13 = por %p3216_p1, %p3215_p9 }
 0x777   : > { %p3213_p6 = pneg %p3212_p7 }
 0x778   : > { %p3219_p2 = por %p3218_p0, %p3217_p13 }
 0x77a   : > { %p3220_p8 = pnand %p3219_p2, %p3213_p6 }
 0x77c   : > { %3223 = shalt.err (!%p3220_p8)
}
 0x77d   : > { %2861 = dma.vmem_to_hbm [thread:$0]  (%p4097_p12), %s3945_s12, 768, %s3982_s2, %s2254_s5, %s3292_s0, %s3292_s0, %s3293_s3  }
 0x77e PF: > { %s2300_s6 = sand.u32 1, %s3266_s25   ;;  %p4101_p4 = scmp.ne.s32.totalorder %s4080_s17, 0 }
 0x77f   : > { %p4102_p10 = scmp.ge.s32.totalorder %s3278_s28, 2  ;;  %s2301_s10 = scalar_lea.sflag [#allocation4], %s2300_s6 }
 0x781   : > { %p2888_p11 = pnand %p4102_p10, %p4101_p4 }
 0x783   : > { %3257 = dma.done.wait (!%p2888_p11), %s2301_s10, 768  }
 0x784   : > { %3259 = vsyncadd (!%p2888_p11), %s2301_s10, 4294966528  ;;  %s2310_s21 = scalar_lea.sflag [#allocation16], %s2300_s6 }
 0x785   : > { %3261 = dma.done.wait (!%p2888_p11), %s2310_s21, 768  }
 0x786   : > { %3263 = vsyncadd (!%p2888_p11), %s2310_s21, 4294966528  ;;  %p33_p12 = scmp.ge.s32.totalorder %s3556_s9, 4   ;;  %s4103_s25 = smov %s3270_s26 }
 0x787   : > { %s4104_s26 = smov %s3274_s27  ;;  %s4105_s27 = smov %s3567_s29 }
 0x788   : > { %s4106_s28 = smov %s3556_s9  ;;  %35 = sbr.rel (!%p33_p12) target bundleno = 24 (0x18), region = 161 }
 0x78f   :  { %2315 = vsyncpa [#allocation3], 1 }
 0x790   :  { %2317 = vsyncpa [#allocation3 + $0x1], 1 }
 0x791   :  { %2318 = vsyncpa [#allocation6], 1 }
 0x792   :  { %2319 = vsyncpa [#allocation9], 1 }
 0x793   :  { %2320 = vsyncpa [#allocation12], 1 }
 0x794   :  { %2321 = vsyncpa [#allocation4], 1 }
 0x795   :  { %2323 = vsyncpa [#allocation4 + $0x1], 1 }
 0x796   :  { %2324 = vsyncpa [#allocation16], 1 }
 0x797   :  { %2326 = vsyncpa [#allocation16 + $0x1], 1 }

</bundles_post_ra>
